<compile_context>
chip_gen: v7x
topology: tpu7x:2x2x1
jax: 0.10.0
libtpu: 0.0.40
codegen_flags: <defaults>
</compile_context>

<pallas_src>
import jax
import jax.numpy as jnp
from jax import lax
from jax.experimental import pallas as pl
from jax.experimental.pallas import tpu as pltpu

HIDDEN = 32          # hidden_size
INPUT_VOCAB = 16     # input_size  (encoder embedding vocab)
OUTPUT_VOCAB = 20    # output_size (decoder embedding vocab / logits)
SEQ_LEN = 8          # encoder input sentence length
MAX_LEN = 13         # decoding max length (matches the reference)
VPAD = 128           # lane-dense padded vocab / token-lane width
NEG = -1e30          # effective -inf for padded logit lanes

_VMEM = pl.BlockSpec(memory_space=pltpu.MemorySpace.VMEM)


# ---------------------------------------------------------------------------
# Fused kernel: encoder recurrence + greedy decode loop
# ---------------------------------------------------------------------------
def seq2seq_kernel(xseq_ref, ewih_ref, ewhh_ref, eb_ref,
                   demb_ref, dwcomb_ref, dbcomb_ref,
                   logp_ref, tok_ref, len_ref):
    H = HIDDEN
    f32 = jnp.float32

    def lstm_gates(gates, c):
        # PyTorch gate order i, f, g, o.  Two transcendental pushes over the
        # full 4H vector instead of four over 32-lane slices.
        sig = jax.nn.sigmoid(gates)
        th = jnp.tanh(gates)
        i = sig[:, 0:H]
        f = sig[:, H:2 * H]
        g = th[:, 2 * H:3 * H]
        o = sig[:, 3 * H:4 * H]
        c_new = f * c + i * g
        h_new = o * jnp.tanh(c_new)
        return h_new, c_new

    # ----------------------- encoder -----------------------
    # Hoisted input projection: one (S,H)@(H,4H) matmul; both biases folded in.
    xproj = (jnp.dot(xseq_ref[...], ewih_ref[...], preferred_element_type=f32)
             + eb_ref[...])                                            # (S, 4H)
    whh = ewhh_ref[...]
    h = jnp.zeros((1, H), f32)                                         # init_hidden = zeros
    c = jnp.zeros((1, H), f32)
    for t in range(SEQ_LEN):                                           # static unroll (serial chain)
        gates = xproj[t:t + 1, :] + jnp.dot(h, whh, preferred_element_type=f32)
        h, c = lstm_gates(gates, c)

    # -------------------- greedy decoder --------------------
    lane = lax.broadcasted_iota(jnp.int32, (1, VPAD), 1)               # (1, VPAD)
    tok = jnp.zeros((1, 1), jnp.int32)                                 # argmax(zeros(1)) == 0
    done = jnp.zeros((1, 1), jnp.int32)
    length = jnp.ones((1, 1), jnp.int32)
    sent = jnp.zeros((1, VPAD), jnp.int32)                             # sentence[0] = 0

    demb = demb_ref[...]                                               # (VPAD, H) padded table
    wcomb = dwcomb_ref[...]                                            # (2H, 4H + VPAD)
    bcomb = dbcomb_ref[...]                                            # (1,  4H + VPAD)

    for s in range(MAX_LEN - 1):                                       # static unroll, <= 12 steps
        # relu(embedding(token)) via a one-hot matmul (keeps the data-dependent
        # lookup fully in vector land; no scalar extraction needed).
        onehot = (lane == tok).astype(f32)                             # (1, VPAD)
        x = jnp.maximum(jnp.dot(onehot, demb, preferred_element_type=f32), 0.0)   # (1, H)

        # Single fused MXU push: gates + (padded) logits in one matmul.
        xh = jnp.concatenate([x, h], axis=-1)                          # (1, 2H)
        fused = jnp.dot(xh, wcomb, preferred_element_type=f32) + bcomb  # (1, 4H + VPAD)
        gates = fused[:, :4 * H]
        logits = fused[:, 4 * H:]                                      # pad lanes ~= -1e30

        h_new, c_new = lstm_gates(gates, c)

        # LogSoftmax(dim=0) over the vocab (logits come from x, as in the reference).
        m = jnp.max(logits, axis=-1, keepdims=True)
        lse = m + jnp.log(jnp.sum(jnp.exp(logits - m), axis=-1, keepdims=True))
        logp = logits - lse                                            # (1, VPAD)

        # Greedy argmax (first max index), kept as a (1,1) vector value.
        vmax = jnp.max(logp, axis=-1, keepdims=True)
        new_tok = jnp.min(jnp.where(logp == vmax, lane, jnp.int32(VPAD)),
                          axis=-1, keepdims=True)                      # (1, 1) int32

        # Store this step's log-probs / token.  Rows & lanes past the final
        # `length` are never read by the host, so post-EOS steps are harmless.
        logp_ref[pl.ds(s, 1), :] = logp
        sent = jnp.where(lane == (s + 1), new_tok, sent)

        # Only `length` / `done` need gating.
        active = done == 0
        length = jnp.where(active, length + 1, length)
        done = jnp.where(jnp.logical_and(active, new_tok == 1), jnp.int32(1), done)
        h, c, tok = h_new, c_new, new_tok

    tok_ref[...] = sent
    len_ref[...] = length


# ---------------------------------------------------------------------------
# Parameter init (PyTorch-like) and one-time packing for the fused kernel
# ---------------------------------------------------------------------------
def init_params(key):
    ks = jax.random.split(key, 12)
    bound = 1.0 / jnp.sqrt(HIDDEN)
    u = lambda k, shape: jax.random.uniform(k, shape, jnp.float32, -bound, bound)
    return {
        "enc_embedding": jax.random.normal(ks[0], (INPUT_VOCAB, HIDDEN), jnp.float32),
        "enc_wih": u(ks[1], (HIDDEN, 4 * HIDDEN)),      # W_ih^T
        "enc_whh": u(ks[2], (HIDDEN, 4 * HIDDEN)),      # W_hh^T
        "enc_bih": u(ks[3], (1, 4 * HIDDEN)),
        "enc_bhh": u(ks[4], (1, 4 * HIDDEN)),
        "dec_embedding": jax.random.normal(ks[5], (OUTPUT_VOCAB, HIDDEN), jnp.float32),
        "dec_wih": u(ks[6], (HIDDEN, 4 * HIDDEN)),
        "dec_whh": u(ks[7], (HIDDEN, 4 * HIDDEN)),
        "dec_bih": u(ks[8], (1, 4 * HIDDEN)),
        "dec_bhh": u(ks[9], (1, 4 * HIDDEN)),
        "dec_wout": u(ks[10], (HIDDEN, OUTPUT_VOCAB)),  # Linear weight^T
        "dec_bout": u(ks[11], (1, OUTPUT_VOCAB)),
    }


def pack_params(p):
    """One-time weight packing for the fused kernel."""
    f32 = jnp.float32
    enc_b = (p["enc_bih"] + p["enc_bhh"]).astype(f32)                           # (1, 4H)

    # decoder embedding table padded to a 128-row one-hot lookup
    demb_pad = jnp.zeros((VPAD, HIDDEN), f32).at[:OUTPUT_VOCAB].set(p["dec_embedding"])

    # fused decoder weight: [[Wih | Wout_pad]; [Whh | 0]],  bias: [bih+bhh | bout_pad]
    wout_pad = jnp.zeros((HIDDEN, VPAD), f32).at[:, :OUTPUT_VOCAB].set(p["dec_wout"])
    bout_pad = jnp.full((1, VPAD), NEG, f32).at[:, :OUTPUT_VOCAB].set(p["dec_bout"])
    w_top = jnp.concatenate([p["dec_wih"], wout_pad], axis=1)                   # (H, 4H+VPAD)
    w_bot = jnp.concatenate([p["dec_whh"], jnp.zeros((HIDDEN, VPAD), f32)], axis=1)
    dwcomb = jnp.concatenate([w_top, w_bot], axis=0)                            # (2H, 4H+VPAD)
    dbcomb = jnp.concatenate([p["dec_bih"] + p["dec_bhh"], bout_pad], axis=1)   # (1, 4H+VPAD)

    return {
        "enc_embedding": p["enc_embedding"],
        "enc_wih": p["enc_wih"], "enc_whh": p["enc_whh"], "enc_b": enc_b,
        "dec_emb_pad": demb_pad, "dec_wcomb": dwcomb, "dec_bcomb": dbcomb,
    }


# ---------------------------------------------------------------------------
# Single jitted forward: encoder embedding gather + one pallas_call
# ---------------------------------------------------------------------------
@jax.jit
def run_seq2seq(sentence_tokens, pk):
    emb_seq = pk["enc_embedding"][sentence_tokens]            # (S, H)
    return pl.pallas_call(
        seq2seq_kernel,
        out_shape=(jax.ShapeDtypeStruct((MAX_LEN - 1, VPAD), jnp.float32),   # per-step log-probs
                   jax.ShapeDtypeStruct((1, VPAD), jnp.int32),               # sentence token ids
                   jax.ShapeDtypeStruct((1, 1), jnp.int32)),                 # final length
        in_specs=[_VMEM] * 7,
        out_specs=(_VMEM, _VMEM, _VMEM),
    )(emb_seq, pk["enc_wih"], pk["enc_whh"], pk["enc_b"],
      pk["dec_emb_pad"], pk["dec_wcomb"], pk["dec_bcomb"])


def model_forward(sentence_tokens, packed):
    """Model.forward: encode, greedy-decode until token==1 or max_len.
    Exactly one device->host sync (reads the three result buffers once)."""
    # TODO(synk): teacher-forcing branch (random.random() < help_parameter) is
    # unreachable with the default help_parameter=-1 and is not implemented.
    logp, tokens, length = jax.device_get(run_seq2seq(sentence_tokens, packed))
    n = int(length[0, 0])                                     # reference `length` after the loop
    sentence = [int(t) for t in tokens[0, :n]]                # starts with token 0
    outputs = [jnp.asarray(logp[i, :OUTPUT_VOCAB]) for i in range(n - 1)]
    return sentence, outputs


if __name__ == "__main__":
    key = jax.random.PRNGKey(0)
    pkey, skey = jax.random.split(key)
    params = init_params(pkey)
    packed = pack_params(params)
    sentence_tokens = jax.random.randint(skey, (SEQ_LEN,), 0, INPUT_VOCAB, dtype=jnp.int32)

    raw = run_seq2seq(sentence_tokens, packed)
    jax.block_until_ready(raw)

    sentence, outputs = model_forward(sentence_tokens, packed)
    assert 2 <= len(sentence) <= MAX_LEN
    assert len(outputs) == len(sentence) - 1
    assert sentence[0] == 0
    print("KERNEL_OK")
</pallas_src>

<mosaic_0001>
module attributes {stable_mosaic.version = 11 : i64} {
  func.func @seq2seq_kernel(%arg0: memref<8x32xf32, #tpu.memory_space<vmem>>, %arg1: memref<32x128xf32, #tpu.memory_space<vmem>>, %arg2: memref<32x128xf32, #tpu.memory_space<vmem>>, %arg3: memref<1x128xf32, #tpu.memory_space<vmem>>, %arg4: memref<128x32xf32, #tpu.memory_space<vmem>>, %arg5: memref<64x256xf32, #tpu.memory_space<vmem>>, %arg6: memref<1x256xf32, #tpu.memory_space<vmem>>, %arg7: memref<12x128xf32, #tpu.memory_space<vmem>>, %arg8: memref<1x128xi32, #tpu.memory_space<vmem>>, %arg9: memref<1x1xi32, #tpu.memory_space<vmem>>) attributes {dimension_semantics = [], scalar_prefetch = 0 : i64, scratch_operands = 0 : i64, tpu.core_type = #tpu.core_type<tc>} {
    %c0 = arith.constant 0 : index
    %c0_0 = arith.constant 0 : index
    %0 = vector.load %arg0[%c0, %c0_0] : memref<8x32xf32, #tpu.memory_space<vmem>>, vector<8x32xf32>
    %c0_1 = arith.constant 0 : index
    %c0_2 = arith.constant 0 : index
    %1 = vector.load %arg1[%c0_1, %c0_2] : memref<32x128xf32, #tpu.memory_space<vmem>>, vector<32x128xf32>
    %cst = arith.constant dense<0.000000e+00> : vector<8x128xf32>
    %2 = tpu.matmul %0, %1, %cst {dimension_numbers = #tpu.dot_dimension_numbers<[1], [0], [0], [1], [0, 0, 1, 1], [], []>} : vector<8x32xf32>, vector<32x128xf32>, vector<8x128xf32> -> vector<8x128xf32>
    %c0_3 = arith.constant 0 : index
    %c0_4 = arith.constant 0 : index
    %3 = vector.load %arg3[%c0_3, %c0_4] : memref<1x128xf32, #tpu.memory_space<vmem>>, vector<1x128xf32>
    %4 = vector.broadcast %3 : vector<1x128xf32> to vector<8x128xf32>
    %5 = arith.addf %2, %4 : vector<8x128xf32>
    %c0_5 = arith.constant 0 : index
    %c0_6 = arith.constant 0 : index
    %6 = vector.load %arg2[%c0_5, %c0_6] : memref<32x128xf32, #tpu.memory_space<vmem>>, vector<32x128xf32>
    %cst_7 = arith.constant 0.000000e+00 : f32
    %7 = vector.broadcast %cst_7 : f32 to vector<1x32xf32>
    %cst_8 = arith.constant 0.000000e+00 : f32
    %8 = vector.broadcast %cst_8 : f32 to vector<1x32xf32>
    %9 = vector.extract_strided_slice %5 {offsets = [0, 0], sizes = [1, 128], strides = [1, 1]} : vector<8x128xf32> to vector<1x128xf32>
    %cst_9 = arith.constant dense<0.000000e+00> : vector<1x128xf32>
    %10 = tpu.matmul %7, %6, %cst_9 {dimension_numbers = #tpu.dot_dimension_numbers<[1], [0], [0], [1], [0, 0, 1, 1], [], []>} : vector<1x32xf32>, vector<32x128xf32>, vector<1x128xf32> -> vector<1x128xf32>
    %11 = arith.addf %9, %10 : vector<1x128xf32>
    %12 = arith.negf %11 : vector<1x128xf32>
    %13 = math.exp %12 : vector<1x128xf32>
    %cst_10 = arith.constant 1.000000e+00 : f32
    %14 = vector.broadcast %cst_10 : f32 to vector<1x128xf32>
    %15 = arith.addf %14, %13 : vector<1x128xf32>
    %16 = arith.divf %14, %15 : vector<1x128xf32>
    %17 = math.tanh %11 : vector<1x128xf32>
    %18 = vector.extract_strided_slice %16 {offsets = [0, 0], sizes = [1, 32], strides = [1, 1]} : vector<1x128xf32> to vector<1x32xf32>
    %19 = vector.extract_strided_slice %16 {offsets = [0, 32], sizes = [1, 32], strides = [1, 1]} : vector<1x128xf32> to vector<1x32xf32>
    %20 = vector.extract_strided_slice %17 {offsets = [0, 64], sizes = [1, 32], strides = [1, 1]} : vector<1x128xf32> to vector<1x32xf32>
    %21 = vector.extract_strided_slice %16 {offsets = [0, 96], sizes = [1, 32], strides = [1, 1]} : vector<1x128xf32> to vector<1x32xf32>
    %22 = arith.mulf %19, %8 : vector<1x32xf32>
    %23 = arith.mulf %18, %20 : vector<1x32xf32>
    %24 = arith.addf %22, %23 : vector<1x32xf32>
    %25 = math.tanh %24 : vector<1x32xf32>
    %26 = arith.mulf %21, %25 : vector<1x32xf32>
    %27 = vector.extract_strided_slice %5 {offsets = [1, 0], sizes = [1, 128], strides = [1, 1]} : vector<8x128xf32> to vector<1x128xf32>
    %cst_11 = arith.constant dense<0.000000e+00> : vector<1x128xf32>
    %28 = tpu.matmul %26, %6, %cst_11 {dimension_numbers = #tpu.dot_dimension_numbers<[1], [0], [0], [1], [0, 0, 1, 1], [], []>} : vector<1x32xf32>, vector<32x128xf32>, vector<1x128xf32> -> vector<1x128xf32>
    %29 = arith.addf %27, %28 : vector<1x128xf32>
    %30 = arith.negf %29 : vector<1x128xf32>
    %31 = math.exp %30 : vector<1x128xf32>
    %cst_12 = arith.constant 1.000000e+00 : f32
    %32 = vector.broadcast %cst_12 : f32 to vector<1x128xf32>
    %33 = arith.addf %32, %31 : vector<1x128xf32>
    %34 = arith.divf %32, %33 : vector<1x128xf32>
    %35 = math.tanh %29 : vector<1x128xf32>
    %36 = vector.extract_strided_slice %34 {offsets = [0, 0], sizes = [1, 32], strides = [1, 1]} : vector<1x128xf32> to vector<1x32xf32>
    %37 = vector.extract_strided_slice %34 {offsets = [0, 32], sizes = [1, 32], strides = [1, 1]} : vector<1x128xf32> to vector<1x32xf32>
    %38 = vector.extract_strided_slice %35 {offsets = [0, 64], sizes = [1, 32], strides = [1, 1]} : vector<1x128xf32> to vector<1x32xf32>
    %39 = vector.extract_strided_slice %34 {offsets = [0, 96], sizes = [1, 32], strides = [1, 1]} : vector<1x128xf32> to vector<1x32xf32>
    %40 = arith.mulf %37, %24 : vector<1x32xf32>
    %41 = arith.mulf %36, %38 : vector<1x32xf32>
    %42 = arith.addf %40, %41 : vector<1x32xf32>
    %43 = math.tanh %42 : vector<1x32xf32>
    %44 = arith.mulf %39, %43 : vector<1x32xf32>
    %45 = vector.extract_strided_slice %5 {offsets = [2, 0], sizes = [1, 128], strides = [1, 1]} : vector<8x128xf32> to vector<1x128xf32>
    %cst_13 = arith.constant dense<0.000000e+00> : vector<1x128xf32>
    %46 = tpu.matmul %44, %6, %cst_13 {dimension_numbers = #tpu.dot_dimension_numbers<[1], [0], [0], [1], [0, 0, 1, 1], [], []>} : vector<1x32xf32>, vector<32x128xf32>, vector<1x128xf32> -> vector<1x128xf32>
    %47 = arith.addf %45, %46 : vector<1x128xf32>
    %48 = arith.negf %47 : vector<1x128xf32>
    %49 = math.exp %48 : vector<1x128xf32>
    %cst_14 = arith.constant 1.000000e+00 : f32
    %50 = vector.broadcast %cst_14 : f32 to vector<1x128xf32>
    %51 = arith.addf %50, %49 : vector<1x128xf32>
    %52 = arith.divf %50, %51 : vector<1x128xf32>
    %53 = math.tanh %47 : vector<1x128xf32>
    %54 = vector.extract_strided_slice %52 {offsets = [0, 0], sizes = [1, 32], strides = [1, 1]} : vector<1x128xf32> to vector<1x32xf32>
    %55 = vector.extract_strided_slice %52 {offsets = [0, 32], sizes = [1, 32], strides = [1, 1]} : vector<1x128xf32> to vector<1x32xf32>
    %56 = vector.extract_strided_slice %53 {offsets = [0, 64], sizes = [1, 32], strides = [1, 1]} : vector<1x128xf32> to vector<1x32xf32>
    %57 = vector.extract_strided_slice %52 {offsets = [0, 96], sizes = [1, 32], strides = [1, 1]} : vector<1x128xf32> to vector<1x32xf32>
    %58 = arith.mulf %55, %42 : vector<1x32xf32>
    %59 = arith.mulf %54, %56 : vector<1x32xf32>
    %60 = arith.addf %58, %59 : vector<1x32xf32>
    %61 = math.tanh %60 : vector<1x32xf32>
    %62 = arith.mulf %57, %61 : vector<1x32xf32>
    %63 = vector.extract_strided_slice %5 {offsets = [3, 0], sizes = [1, 128], strides = [1, 1]} : vector<8x128xf32> to vector<1x128xf32>
    %cst_15 = arith.constant dense<0.000000e+00> : vector<1x128xf32>
    %64 = tpu.matmul %62, %6, %cst_15 {dimension_numbers = #tpu.dot_dimension_numbers<[1], [0], [0], [1], [0, 0, 1, 1], [], []>} : vector<1x32xf32>, vector<32x128xf32>, vector<1x128xf32> -> vector<1x128xf32>
    %65 = arith.addf %63, %64 : vector<1x128xf32>
    %66 = arith.negf %65 : vector<1x128xf32>
    %67 = math.exp %66 : vector<1x128xf32>
    %cst_16 = arith.constant 1.000000e+00 : f32
    %68 = vector.broadcast %cst_16 : f32 to vector<1x128xf32>
    %69 = arith.addf %68, %67 : vector<1x128xf32>
    %70 = arith.divf %68, %69 : vector<1x128xf32>
    %71 = math.tanh %65 : vector<1x128xf32>
    %72 = vector.extract_strided_slice %70 {offsets = [0, 0], sizes = [1, 32], strides = [1, 1]} : vector<1x128xf32> to vector<1x32xf32>
    %73 = vector.extract_strided_slice %70 {offsets = [0, 32], sizes = [1, 32], strides = [1, 1]} : vector<1x128xf32> to vector<1x32xf32>
    %74 = vector.extract_strided_slice %71 {offsets = [0, 64], sizes = [1, 32], strides = [1, 1]} : vector<1x128xf32> to vector<1x32xf32>
    %75 = vector.extract_strided_slice %70 {offsets = [0, 96], sizes = [1, 32], strides = [1, 1]} : vector<1x128xf32> to vector<1x32xf32>
    %76 = arith.mulf %73, %60 : vector<1x32xf32>
    %77 = arith.mulf %72, %74 : vector<1x32xf32>
    %78 = arith.addf %76, %77 : vector<1x32xf32>
    %79 = math.tanh %78 : vector<1x32xf32>
    %80 = arith.mulf %75, %79 : vector<1x32xf32>
    %81 = vector.extract_strided_slice %5 {offsets = [4, 0], sizes = [1, 128], strides = [1, 1]} : vector<8x128xf32> to vector<1x128xf32>
    %cst_17 = arith.constant dense<0.000000e+00> : vector<1x128xf32>
    %82 = tpu.matmul %80, %6, %cst_17 {dimension_numbers = #tpu.dot_dimension_numbers<[1], [0], [0], [1], [0, 0, 1, 1], [], []>} : vector<1x32xf32>, vector<32x128xf32>, vector<1x128xf32> -> vector<1x128xf32>
    %83 = arith.addf %81, %82 : vector<1x128xf32>
    %84 = arith.negf %83 : vector<1x128xf32>
    %85 = math.exp %84 : vector<1x128xf32>
    %cst_18 = arith.constant 1.000000e+00 : f32
    %86 = vector.broadcast %cst_18 : f32 to vector<1x128xf32>
    %87 = arith.addf %86, %85 : vector<1x128xf32>
    %88 = arith.divf %86, %87 : vector<1x128xf32>
    %89 = math.tanh %83 : vector<1x128xf32>
    %90 = vector.extract_strided_slice %88 {offsets = [0, 0], sizes = [1, 32], strides = [1, 1]} : vector<1x128xf32> to vector<1x32xf32>
    %91 = vector.extract_strided_slice %88 {offsets = [0, 32], sizes = [1, 32], strides = [1, 1]} : vector<1x128xf32> to vector<1x32xf32>
    %92 = vector.extract_strided_slice %89 {offsets = [0, 64], sizes = [1, 32], strides = [1, 1]} : vector<1x128xf32> to vector<1x32xf32>
    %93 = vector.extract_strided_slice %88 {offsets = [0, 96], sizes = [1, 32], strides = [1, 1]} : vector<1x128xf32> to vector<1x32xf32>
    %94 = arith.mulf %91, %78 : vector<1x32xf32>
    %95 = arith.mulf %90, %92 : vector<1x32xf32>
    %96 = arith.addf %94, %95 : vector<1x32xf32>
    %97 = math.tanh %96 : vector<1x32xf32>
    %98 = arith.mulf %93, %97 : vector<1x32xf32>
    %99 = vector.extract_strided_slice %5 {offsets = [5, 0], sizes = [1, 128], strides = [1, 1]} : vector<8x128xf32> to vector<1x128xf32>
    %cst_19 = arith.constant dense<0.000000e+00> : vector<1x128xf32>
    %100 = tpu.matmul %98, %6, %cst_19 {dimension_numbers = #tpu.dot_dimension_numbers<[1], [0], [0], [1], [0, 0, 1, 1], [], []>} : vector<1x32xf32>, vector<32x128xf32>, vector<1x128xf32> -> vector<1x128xf32>
    %101 = arith.addf %99, %100 : vector<1x128xf32>
    %102 = arith.negf %101 : vector<1x128xf32>
    %103 = math.exp %102 : vector<1x128xf32>
    %cst_20 = arith.constant 1.000000e+00 : f32
    %104 = vector.broadcast %cst_20 : f32 to vector<1x128xf32>
    %105 = arith.addf %104, %103 : vector<1x128xf32>
    %106 = arith.divf %104, %105 : vector<1x128xf32>
    %107 = math.tanh %101 : vector<1x128xf32>
    %108 = vector.extract_strided_slice %106 {offsets = [0, 0], sizes = [1, 32], strides = [1, 1]} : vector<1x128xf32> to vector<1x32xf32>
    %109 = vector.extract_strided_slice %106 {offsets = [0, 32], sizes = [1, 32], strides = [1, 1]} : vector<1x128xf32> to vector<1x32xf32>
    %110 = vector.extract_strided_slice %107 {offsets = [0, 64], sizes = [1, 32], strides = [1, 1]} : vector<1x128xf32> to vector<1x32xf32>
    %111 = vector.extract_strided_slice %106 {offsets = [0, 96], sizes = [1, 32], strides = [1, 1]} : vector<1x128xf32> to vector<1x32xf32>
    %112 = arith.mulf %109, %96 : vector<1x32xf32>
    %113 = arith.mulf %108, %110 : vector<1x32xf32>
    %114 = arith.addf %112, %113 : vector<1x32xf32>
    %115 = math.tanh %114 : vector<1x32xf32>
    %116 = arith.mulf %111, %115 : vector<1x32xf32>
    %117 = vector.extract_strided_slice %5 {offsets = [6, 0], sizes = [1, 128], strides = [1, 1]} : vector<8x128xf32> to vector<1x128xf32>
    %cst_21 = arith.constant dense<0.000000e+00> : vector<1x128xf32>
    %118 = tpu.matmul %116, %6, %cst_21 {dimension_numbers = #tpu.dot_dimension_numbers<[1], [0], [0], [1], [0, 0, 1, 1], [], []>} : vector<1x32xf32>, vector<32x128xf32>, vector<1x128xf32> -> vector<1x128xf32>
    %119 = arith.addf %117, %118 : vector<1x128xf32>
    %120 = arith.negf %119 : vector<1x128xf32>
    %121 = math.exp %120 : vector<1x128xf32>
    %cst_22 = arith.constant 1.000000e+00 : f32
    %122 = vector.broadcast %cst_22 : f32 to vector<1x128xf32>
    %123 = arith.addf %122, %121 : vector<1x128xf32>
    %124 = arith.divf %122, %123 : vector<1x128xf32>
    %125 = math.tanh %119 : vector<1x128xf32>
    %126 = vector.extract_strided_slice %124 {offsets = [0, 0], sizes = [1, 32], strides = [1, 1]} : vector<1x128xf32> to vector<1x32xf32>
    %127 = vector.extract_strided_slice %124 {offsets = [0, 32], sizes = [1, 32], strides = [1, 1]} : vector<1x128xf32> to vector<1x32xf32>
    %128 = vector.extract_strided_slice %125 {offsets = [0, 64], sizes = [1, 32], strides = [1, 1]} : vector<1x128xf32> to vector<1x32xf32>
    %129 = vector.extract_strided_slice %124 {offsets = [0, 96], sizes = [1, 32], strides = [1, 1]} : vector<1x128xf32> to vector<1x32xf32>
    %130 = arith.mulf %127, %114 : vector<1x32xf32>
    %131 = arith.mulf %126, %128 : vector<1x32xf32>
    %132 = arith.addf %130, %131 : vector<1x32xf32>
    %133 = math.tanh %132 : vector<1x32xf32>
    %134 = arith.mulf %129, %133 : vector<1x32xf32>
    %135 = vector.extract_strided_slice %5 {offsets = [7, 0], sizes = [1, 128], strides = [1, 1]} : vector<8x128xf32> to vector<1x128xf32>
    %cst_23 = arith.constant dense<0.000000e+00> : vector<1x128xf32>
    %136 = tpu.matmul %134, %6, %cst_23 {dimension_numbers = #tpu.dot_dimension_numbers<[1], [0], [0], [1], [0, 0, 1, 1], [], []>} : vector<1x32xf32>, vector<32x128xf32>, vector<1x128xf32> -> vector<1x128xf32>
    %137 = arith.addf %135, %136 : vector<1x128xf32>
    %138 = arith.negf %137 : vector<1x128xf32>
    %139 = math.exp %138 : vector<1x128xf32>
    %cst_24 = arith.constant 1.000000e+00 : f32
    %140 = vector.broadcast %cst_24 : f32 to vector<1x128xf32>
    %141 = arith.addf %140, %139 : vector<1x128xf32>
    %142 = arith.divf %140, %141 : vector<1x128xf32>
    %143 = math.tanh %137 : vector<1x128xf32>
    %144 = vector.extract_strided_slice %142 {offsets = [0, 0], sizes = [1, 32], strides = [1, 1]} : vector<1x128xf32> to vector<1x32xf32>
    %145 = vector.extract_strided_slice %142 {offsets = [0, 32], sizes = [1, 32], strides = [1, 1]} : vector<1x128xf32> to vector<1x32xf32>
    %146 = vector.extract_strided_slice %143 {offsets = [0, 64], sizes = [1, 32], strides = [1, 1]} : vector<1x128xf32> to vector<1x32xf32>
    %147 = vector.extract_strided_slice %142 {offsets = [0, 96], sizes = [1, 32], strides = [1, 1]} : vector<1x128xf32> to vector<1x32xf32>
    %148 = arith.mulf %145, %132 : vector<1x32xf32>
    %149 = arith.mulf %144, %146 : vector<1x32xf32>
    %150 = arith.addf %148, %149 : vector<1x32xf32>
    %151 = math.tanh %150 : vector<1x32xf32>
    %152 = arith.mulf %147, %151 : vector<1x32xf32>
    %153 = tpu.iota {dimensions = array<i32: 1>} : vector<1x128xi32>
    %c0_i32 = arith.constant 0 : i32
    %154 = vector.broadcast %c0_i32 : i32 to vector<1x1xi32>
    %c0_i32_25 = arith.constant 0 : i32
    %155 = vector.broadcast %c0_i32_25 : i32 to vector<1x1xi32>
    %c1_i32 = arith.constant 1 : i32
    %156 = vector.broadcast %c1_i32 : i32 to vector<1x1xi32>
    %c0_i32_26 = arith.constant 0 : i32
    %157 = vector.broadcast %c0_i32_26 : i32 to vector<1x128xi32>
    %c0_27 = arith.constant 0 : index
    %c0_28 = arith.constant 0 : index
    %158 = vector.load %arg4[%c0_27, %c0_28] : memref<128x32xf32, #tpu.memory_space<vmem>>, vector<128x32xf32>
    %c0_29 = arith.constant 0 : index
    %c0_30 = arith.constant 0 : index
    %159 = vector.load %arg5[%c0_29, %c0_30] : memref<64x256xf32, #tpu.memory_space<vmem>>, vector<64x256xf32>
    %c0_31 = arith.constant 0 : index
    %c0_32 = arith.constant 0 : index
    %160 = vector.load %arg6[%c0_31, %c0_32] : memref<1x256xf32, #tpu.memory_space<vmem>>, vector<1x256xf32>
    %161 = vector.broadcast %154 : vector<1x1xi32> to vector<1x128xi32>
    %162 = arith.cmpi eq, %153, %161 : vector<1x128xi32>
    %163 = arith.extui %162 : vector<1x128xi1> to vector<1x128xi32>
    %164 = arith.sitofp %163 : vector<1x128xi32> to vector<1x128xf32>
    %cst_33 = arith.constant dense<0.000000e+00> : vector<1x32xf32>
    %165 = tpu.matmul %164, %158, %cst_33 {dimension_numbers = #tpu.dot_dimension_numbers<[1], [0], [0], [1], [0, 0, 1, 1], [], []>} : vector<1x128xf32>, vector<128x32xf32>, vector<1x32xf32> -> vector<1x32xf32>
    %cst_34 = arith.constant 0.000000e+00 : f32
    %166 = vector.broadcast %cst_34 : f32 to vector<1x32xf32>
    %167 = arith.maximumf %165, %166 : vector<1x32xf32>
    %168 = tpu.concatenate %167, %152 in 1 : vector<1x32xf32>, vector<1x32xf32> -> vector<1x64xf32>
    %cst_35 = arith.constant dense<0.000000e+00> : vector<1x256xf32>
    %169 = tpu.matmul %168, %159, %cst_35 {dimension_numbers = #tpu.dot_dimension_numbers<[1], [0], [0], [1], [0, 0, 1, 1], [], []>} : vector<1x64xf32>, vector<64x256xf32>, vector<1x256xf32> -> vector<1x256xf32>
    %170 = arith.addf %169, %160 : vector<1x256xf32>
    %171 = vector.extract_strided_slice %170 {offsets = [0, 0], sizes = [1, 128], strides = [1, 1]} : vector<1x256xf32> to vector<1x128xf32>
    %172 = vector.extract_strided_slice %170 {offsets = [0, 128], sizes = [1, 128], strides = [1, 1]} : vector<1x256xf32> to vector<1x128xf32>
    %173 = arith.negf %171 : vector<1x128xf32>
    %174 = math.exp %173 : vector<1x128xf32>
    %cst_36 = arith.constant 1.000000e+00 : f32
    %175 = vector.broadcast %cst_36 : f32 to vector<1x128xf32>
    %176 = arith.addf %175, %174 : vector<1x128xf32>
    %177 = arith.divf %175, %176 : vector<1x128xf32>
    %178 = math.tanh %171 : vector<1x128xf32>
    %179 = vector.extract_strided_slice %177 {offsets = [0, 0], sizes = [1, 32], strides = [1, 1]} : vector<1x128xf32> to vector<1x32xf32>
    %180 = vector.extract_strided_slice %177 {offsets = [0, 32], sizes = [1, 32], strides = [1, 1]} : vector<1x128xf32> to vector<1x32xf32>
    %181 = vector.extract_strided_slice %178 {offsets = [0, 64], sizes = [1, 32], strides = [1, 1]} : vector<1x128xf32> to vector<1x32xf32>
    %182 = vector.extract_strided_slice %177 {offsets = [0, 96], sizes = [1, 32], strides = [1, 1]} : vector<1x128xf32> to vector<1x32xf32>
    %183 = arith.mulf %180, %150 : vector<1x32xf32>
    %184 = arith.mulf %179, %181 : vector<1x32xf32>
    %185 = arith.addf %183, %184 : vector<1x32xf32>
    %186 = math.tanh %185 : vector<1x32xf32>
    %187 = arith.mulf %182, %186 : vector<1x32xf32>
    %cst_37 = arith.constant dense<0xFF800000> : vector<1xf32>
    %188 = vector.multi_reduction <maximumf>, %172, %cst_37 [1] : vector<1x128xf32> to vector<1xf32>
    %189 = vector.shape_cast %188 : vector<1xf32> to vector<1x1xf32>
    %190 = vector.broadcast %189 : vector<1x1xf32> to vector<1x128xf32>
    %191 = arith.subf %172, %190 : vector<1x128xf32>
    %192 = math.exp %191 : vector<1x128xf32>
    %cst_38 = arith.constant dense<0.000000e+00> : vector<1xf32>
    %193 = vector.multi_reduction <add>, %192, %cst_38 [1] : vector<1x128xf32> to vector<1xf32>
    %194 = vector.shape_cast %193 : vector<1xf32> to vector<1x1xf32>
    %195 = math.log %194 : vector<1x1xf32>
    %196 = arith.addf %189, %195 : vector<1x1xf32>
    %197 = vector.broadcast %196 : vector<1x1xf32> to vector<1x128xf32>
    %198 = arith.subf %172, %197 : vector<1x128xf32>
    %cst_39 = arith.constant dense<0xFF800000> : vector<1xf32>
    %199 = vector.multi_reduction <maximumf>, %198, %cst_39 [1] : vector<1x128xf32> to vector<1xf32>
    %200 = vector.shape_cast %199 : vector<1xf32> to vector<1x1xf32>
    %201 = vector.broadcast %200 : vector<1x1xf32> to vector<1x128xf32>
    %202 = arith.cmpf oeq, %198, %201 : vector<1x128xf32>
    %c128_i32 = arith.constant 128 : i32
    %203 = vector.broadcast %c128_i32 : i32 to vector<1x128xi32>
    %204 = arith.select %202, %153, %203 : vector<1x128xi1>, vector<1x128xi32>
    %cst_40 = arith.constant dense<2147483647> : vector<1xi32>
    %205 = vector.multi_reduction <minsi>, %204, %cst_40 [1] : vector<1x128xi32> to vector<1xi32>
    %206 = vector.shape_cast %205 : vector<1xi32> to vector<1x1xi32>
    %c0_41 = arith.constant 0 : index
    %c0_42 = arith.constant 0 : index
    %207 = vector.load %arg7[%c0_41, %c0_42] : memref<12x128xf32, #tpu.memory_space<vmem>>, vector<1x128xf32>
    tpu.vector_store %arg7[%c0_41, %c0_42], %198 {strides = array<i32>} : memref<12x128xf32, #tpu.memory_space<vmem>>, vector<1x128xf32>,
    %c1_i32_43 = arith.constant 1 : i32
    %208 = vector.broadcast %c1_i32_43 : i32 to vector<1x128xi32>
    %209 = arith.cmpi eq, %153, %208 : vector<1x128xi32>
    %210 = vector.shape_cast %206 : vector<1x1xi32> to vector<1x1xi32>
    %211 = vector.broadcast %210 : vector<1x1xi32> to vector<1x128xi32>
    %212 = arith.select %209, %211, %157 : vector<1x128xi1>, vector<1x128xi32>
    %c0_i32_44 = arith.constant 0 : i32
    %213 = vector.broadcast %c0_i32_44 : i32 to vector<1x1xi32>
    %214 = arith.cmpi eq, %155, %213 : vector<1x1xi32>
    %c1_i32_45 = arith.constant 1 : i32
    %215 = vector.broadcast %c1_i32_45 : i32 to vector<1x1xi32>
    %216 = arith.addi %156, %215 : vector<1x1xi32>
    %217 = arith.select %214, %216, %156 : vector<1x1xi1>, vector<1x1xi32>
    %c1_i32_46 = arith.constant 1 : i32
    %218 = vector.broadcast %c1_i32_46 : i32 to vector<1x1xi32>
    %219 = arith.cmpi eq, %206, %218 : vector<1x1xi32>
    %220 = arith.andi %214, %219 : vector<1x1xi1>
    %c1_i32_47 = arith.constant 1 : i32
    %221 = vector.broadcast %c1_i32_47 : i32 to vector<1x1xi32>
    %222 = arith.select %220, %221, %155 : vector<1x1xi1>, vector<1x1xi32>
    %223 = vector.broadcast %206 : vector<1x1xi32> to vector<1x128xi32>
    %224 = arith.cmpi eq, %153, %223 : vector<1x128xi32>
    %225 = arith.extui %224 : vector<1x128xi1> to vector<1x128xi32>
    %226 = arith.sitofp %225 : vector<1x128xi32> to vector<1x128xf32>
    %cst_48 = arith.constant dense<0.000000e+00> : vector<1x32xf32>
    %227 = tpu.matmul %226, %158, %cst_48 {dimension_numbers = #tpu.dot_dimension_numbers<[1], [0], [0], [1], [0, 0, 1, 1], [], []>} : vector<1x128xf32>, vector<128x32xf32>, vector<1x32xf32> -> vector<1x32xf32>
    %cst_49 = arith.constant 0.000000e+00 : f32
    %228 = vector.broadcast %cst_49 : f32 to vector<1x32xf32>
    %229 = arith.maximumf %227, %228 : vector<1x32xf32>
    %230 = tpu.concatenate %229, %187 in 1 : vector<1x32xf32>, vector<1x32xf32> -> vector<1x64xf32>
    %cst_50 = arith.constant dense<0.000000e+00> : vector<1x256xf32>
    %231 = tpu.matmul %230, %159, %cst_50 {dimension_numbers = #tpu.dot_dimension_numbers<[1], [0], [0], [1], [0, 0, 1, 1], [], []>} : vector<1x64xf32>, vector<64x256xf32>, vector<1x256xf32> -> vector<1x256xf32>
    %232 = arith.addf %231, %160 : vector<1x256xf32>
    %233 = vector.extract_strided_slice %232 {offsets = [0, 0], sizes = [1, 128], strides = [1, 1]} : vector<1x256xf32> to vector<1x128xf32>
    %234 = vector.extract_strided_slice %232 {offsets = [0, 128], sizes = [1, 128], strides = [1, 1]} : vector<1x256xf32> to vector<1x128xf32>
    %235 = arith.negf %233 : vector<1x128xf32>
    %236 = math.exp %235 : vector<1x128xf32>
    %cst_51 = arith.constant 1.000000e+00 : f32
    %237 = vector.broadcast %cst_51 : f32 to vector<1x128xf32>
    %238 = arith.addf %237, %236 : vector<1x128xf32>
    %239 = arith.divf %237, %238 : vector<1x128xf32>
    %240 = math.tanh %233 : vector<1x128xf32>
    %241 = vector.extract_strided_slice %239 {offsets = [0, 0], sizes = [1, 32], strides = [1, 1]} : vector<1x128xf32> to vector<1x32xf32>
    %242 = vector.extract_strided_slice %239 {offsets = [0, 32], sizes = [1, 32], strides = [1, 1]} : vector<1x128xf32> to vector<1x32xf32>
    %243 = vector.extract_strided_slice %240 {offsets = [0, 64], sizes = [1, 32], strides = [1, 1]} : vector<1x128xf32> to vector<1x32xf32>
    %244 = vector.extract_strided_slice %239 {offsets = [0, 96], sizes = [1, 32], strides = [1, 1]} : vector<1x128xf32> to vector<1x32xf32>
    %245 = arith.mulf %242, %185 : vector<1x32xf32>
    %246 = arith.mulf %241, %243 : vector<1x32xf32>
    %247 = arith.addf %245, %246 : vector<1x32xf32>
    %248 = math.tanh %247 : vector<1x32xf32>
    %249 = arith.mulf %244, %248 : vector<1x32xf32>
    %cst_52 = arith.constant dense<0xFF800000> : vector<1xf32>
    %250 = vector.multi_reduction <maximumf>, %234, %cst_52 [1] : vector<1x128xf32> to vector<1xf32>
    %251 = vector.shape_cast %250 : vector<1xf32> to vector<1x1xf32>
    %252 = vector.broadcast %251 : vector<1x1xf32> to vector<1x128xf32>
    %253 = arith.subf %234, %252 : vector<1x128xf32>
    %254 = math.exp %253 : vector<1x128xf32>
    %cst_53 = arith.constant dense<0.000000e+00> : vector<1xf32>
    %255 = vector.multi_reduction <add>, %254, %cst_53 [1] : vector<1x128xf32> to vector<1xf32>
    %256 = vector.shape_cast %255 : vector<1xf32> to vector<1x1xf32>
    %257 = math.log %256 : vector<1x1xf32>
    %258 = arith.addf %251, %257 : vector<1x1xf32>
    %259 = vector.broadcast %258 : vector<1x1xf32> to vector<1x128xf32>
    %260 = arith.subf %234, %259 : vector<1x128xf32>
    %cst_54 = arith.constant dense<0xFF800000> : vector<1xf32>
    %261 = vector.multi_reduction <maximumf>, %260, %cst_54 [1] : vector<1x128xf32> to vector<1xf32>
    %262 = vector.shape_cast %261 : vector<1xf32> to vector<1x1xf32>
    %263 = vector.broadcast %262 : vector<1x1xf32> to vector<1x128xf32>
    %264 = arith.cmpf oeq, %260, %263 : vector<1x128xf32>
    %c128_i32_55 = arith.constant 128 : i32
    %265 = vector.broadcast %c128_i32_55 : i32 to vector<1x128xi32>
    %266 = arith.select %264, %153, %265 : vector<1x128xi1>, vector<1x128xi32>
    %cst_56 = arith.constant dense<2147483647> : vector<1xi32>
    %267 = vector.multi_reduction <minsi>, %266, %cst_56 [1] : vector<1x128xi32> to vector<1xi32>
    %268 = vector.shape_cast %267 : vector<1xi32> to vector<1x1xi32>
    %c1 = arith.constant 1 : index
    %c0_57 = arith.constant 0 : index
    %269 = vector.load %arg7[%c1, %c0_57] : memref<12x128xf32, #tpu.memory_space<vmem>>, vector<1x128xf32>
    tpu.vector_store %arg7[%c1, %c0_57], %260 {strides = array<i32>} : memref<12x128xf32, #tpu.memory_space<vmem>>, vector<1x128xf32>,
    %c2_i32 = arith.constant 2 : i32
    %270 = vector.broadcast %c2_i32 : i32 to vector<1x128xi32>
    %271 = arith.cmpi eq, %153, %270 : vector<1x128xi32>
    %272 = vector.shape_cast %268 : vector<1x1xi32> to vector<1x1xi32>
    %273 = vector.broadcast %272 : vector<1x1xi32> to vector<1x128xi32>
    %274 = arith.select %271, %273, %212 : vector<1x128xi1>, vector<1x128xi32>
    %c0_i32_58 = arith.constant 0 : i32
    %275 = vector.broadcast %c0_i32_58 : i32 to vector<1x1xi32>
    %276 = arith.cmpi eq, %222, %275 : vector<1x1xi32>
    %c1_i32_59 = arith.constant 1 : i32
    %277 = vector.broadcast %c1_i32_59 : i32 to vector<1x1xi32>
    %278 = arith.addi %217, %277 : vector<1x1xi32>
    %279 = arith.select %276, %278, %217 : vector<1x1xi1>, vector<1x1xi32>
    %c1_i32_60 = arith.constant 1 : i32
    %280 = vector.broadcast %c1_i32_60 : i32 to vector<1x1xi32>
    %281 = arith.cmpi eq, %268, %280 : vector<1x1xi32>
    %282 = arith.andi %276, %281 : vector<1x1xi1>
    %c1_i32_61 = arith.constant 1 : i32
    %283 = vector.broadcast %c1_i32_61 : i32 to vector<1x1xi32>
    %284 = arith.select %282, %283, %222 : vector<1x1xi1>, vector<1x1xi32>
    %285 = vector.broadcast %268 : vector<1x1xi32> to vector<1x128xi32>
    %286 = arith.cmpi eq, %153, %285 : vector<1x128xi32>
    %287 = arith.extui %286 : vector<1x128xi1> to vector<1x128xi32>
    %288 = arith.sitofp %287 : vector<1x128xi32> to vector<1x128xf32>
    %cst_62 = arith.constant dense<0.000000e+00> : vector<1x32xf32>
    %289 = tpu.matmul %288, %158, %cst_62 {dimension_numbers = #tpu.dot_dimension_numbers<[1], [0], [0], [1], [0, 0, 1, 1], [], []>} : vector<1x128xf32>, vector<128x32xf32>, vector<1x32xf32> -> vector<1x32xf32>
    %cst_63 = arith.constant 0.000000e+00 : f32
    %290 = vector.broadcast %cst_63 : f32 to vector<1x32xf32>
    %291 = arith.maximumf %289, %290 : vector<1x32xf32>
    %292 = tpu.concatenate %291, %249 in 1 : vector<1x32xf32>, vector<1x32xf32> -> vector<1x64xf32>
    %cst_64 = arith.constant dense<0.000000e+00> : vector<1x256xf32>
    %293 = tpu.matmul %292, %159, %cst_64 {dimension_numbers = #tpu.dot_dimension_numbers<[1], [0], [0], [1], [0, 0, 1, 1], [], []>} : vector<1x64xf32>, vector<64x256xf32>, vector<1x256xf32> -> vector<1x256xf32>
    %294 = arith.addf %293, %160 : vector<1x256xf32>
    %295 = vector.extract_strided_slice %294 {offsets = [0, 0], sizes = [1, 128], strides = [1, 1]} : vector<1x256xf32> to vector<1x128xf32>
    %296 = vector.extract_strided_slice %294 {offsets = [0, 128], sizes = [1, 128], strides = [1, 1]} : vector<1x256xf32> to vector<1x128xf32>
    %297 = arith.negf %295 : vector<1x128xf32>
    %298 = math.exp %297 : vector<1x128xf32>
    %cst_65 = arith.constant 1.000000e+00 : f32
    %299 = vector.broadcast %cst_65 : f32 to vector<1x128xf32>
    %300 = arith.addf %299, %298 : vector<1x128xf32>
    %301 = arith.divf %299, %300 : vector<1x128xf32>
    %302 = math.tanh %295 : vector<1x128xf32>
    %303 = vector.extract_strided_slice %301 {offsets = [0, 0], sizes = [1, 32], strides = [1, 1]} : vector<1x128xf32> to vector<1x32xf32>
    %304 = vector.extract_strided_slice %301 {offsets = [0, 32], sizes = [1, 32], strides = [1, 1]} : vector<1x128xf32> to vector<1x32xf32>
    %305 = vector.extract_strided_slice %302 {offsets = [0, 64], sizes = [1, 32], strides = [1, 1]} : vector<1x128xf32> to vector<1x32xf32>
    %306 = vector.extract_strided_slice %301 {offsets = [0, 96], sizes = [1, 32], strides = [1, 1]} : vector<1x128xf32> to vector<1x32xf32>
    %307 = arith.mulf %304, %247 : vector<1x32xf32>
    %308 = arith.mulf %303, %305 : vector<1x32xf32>
    %309 = arith.addf %307, %308 : vector<1x32xf32>
    %310 = math.tanh %309 : vector<1x32xf32>
    %311 = arith.mulf %306, %310 : vector<1x32xf32>
    %cst_66 = arith.constant dense<0xFF800000> : vector<1xf32>
    %312 = vector.multi_reduction <maximumf>, %296, %cst_66 [1] : vector<1x128xf32> to vector<1xf32>
    %313 = vector.shape_cast %312 : vector<1xf32> to vector<1x1xf32>
    %314 = vector.broadcast %313 : vector<1x1xf32> to vector<1x128xf32>
    %315 = arith.subf %296, %314 : vector<1x128xf32>
    %316 = math.exp %315 : vector<1x128xf32>
    %cst_67 = arith.constant dense<0.000000e+00> : vector<1xf32>
    %317 = vector.multi_reduction <add>, %316, %cst_67 [1] : vector<1x128xf32> to vector<1xf32>
    %318 = vector.shape_cast %317 : vector<1xf32> to vector<1x1xf32>
    %319 = math.log %318 : vector<1x1xf32>
    %320 = arith.addf %313, %319 : vector<1x1xf32>
    %321 = vector.broadcast %320 : vector<1x1xf32> to vector<1x128xf32>
    %322 = arith.subf %296, %321 : vector<1x128xf32>
    %cst_68 = arith.constant dense<0xFF800000> : vector<1xf32>
    %323 = vector.multi_reduction <maximumf>, %322, %cst_68 [1] : vector<1x128xf32> to vector<1xf32>
    %324 = vector.shape_cast %323 : vector<1xf32> to vector<1x1xf32>
    %325 = vector.broadcast %324 : vector<1x1xf32> to vector<1x128xf32>
    %326 = arith.cmpf oeq, %322, %325 : vector<1x128xf32>
    %c128_i32_69 = arith.constant 128 : i32
    %327 = vector.broadcast %c128_i32_69 : i32 to vector<1x128xi32>
    %328 = arith.select %326, %153, %327 : vector<1x128xi1>, vector<1x128xi32>
    %cst_70 = arith.constant dense<2147483647> : vector<1xi32>
    %329 = vector.multi_reduction <minsi>, %328, %cst_70 [1] : vector<1x128xi32> to vector<1xi32>
    %330 = vector.shape_cast %329 : vector<1xi32> to vector<1x1xi32>
    %c2 = arith.constant 2 : index
    %c0_71 = arith.constant 0 : index
    %331 = vector.load %arg7[%c2, %c0_71] : memref<12x128xf32, #tpu.memory_space<vmem>>, vector<1x128xf32>
    tpu.vector_store %arg7[%c2, %c0_71], %322 {strides = array<i32>} : memref<12x128xf32, #tpu.memory_space<vmem>>, vector<1x128xf32>,
    %c3_i32 = arith.constant 3 : i32
    %332 = vector.broadcast %c3_i32 : i32 to vector<1x128xi32>
    %333 = arith.cmpi eq, %153, %332 : vector<1x128xi32>
    %334 = vector.shape_cast %330 : vector<1x1xi32> to vector<1x1xi32>
    %335 = vector.broadcast %334 : vector<1x1xi32> to vector<1x128xi32>
    %336 = arith.select %333, %335, %274 : vector<1x128xi1>, vector<1x128xi32>
    %c0_i32_72 = arith.constant 0 : i32
    %337 = vector.broadcast %c0_i32_72 : i32 to vector<1x1xi32>
    %338 = arith.cmpi eq, %284, %337 : vector<1x1xi32>
    %c1_i32_73 = arith.constant 1 : i32
    %339 = vector.broadcast %c1_i32_73 : i32 to vector<1x1xi32>
    %340 = arith.addi %279, %339 : vector<1x1xi32>
    %341 = arith.select %338, %340, %279 : vector<1x1xi1>, vector<1x1xi32>
    %c1_i32_74 = arith.constant 1 : i32
    %342 = vector.broadcast %c1_i32_74 : i32 to vector<1x1xi32>
    %343 = arith.cmpi eq, %330, %342 : vector<1x1xi32>
    %344 = arith.andi %338, %343 : vector<1x1xi1>
    %c1_i32_75 = arith.constant 1 : i32
    %345 = vector.broadcast %c1_i32_75 : i32 to vector<1x1xi32>
    %346 = arith.select %344, %345, %284 : vector<1x1xi1>, vector<1x1xi32>
    %347 = vector.broadcast %330 : vector<1x1xi32> to vector<1x128xi32>
    %348 = arith.cmpi eq, %153, %347 : vector<1x128xi32>
    %349 = arith.extui %348 : vector<1x128xi1> to vector<1x128xi32>
    %350 = arith.sitofp %349 : vector<1x128xi32> to vector<1x128xf32>
    %cst_76 = arith.constant dense<0.000000e+00> : vector<1x32xf32>
    %351 = tpu.matmul %350, %158, %cst_76 {dimension_numbers = #tpu.dot_dimension_numbers<[1], [0], [0], [1], [0, 0, 1, 1], [], []>} : vector<1x128xf32>, vector<128x32xf32>, vector<1x32xf32> -> vector<1x32xf32>
    %cst_77 = arith.constant 0.000000e+00 : f32
    %352 = vector.broadcast %cst_77 : f32 to vector<1x32xf32>
    %353 = arith.maximumf %351, %352 : vector<1x32xf32>
    %354 = tpu.concatenate %353, %311 in 1 : vector<1x32xf32>, vector<1x32xf32> -> vector<1x64xf32>
    %cst_78 = arith.constant dense<0.000000e+00> : vector<1x256xf32>
    %355 = tpu.matmul %354, %159, %cst_78 {dimension_numbers = #tpu.dot_dimension_numbers<[1], [0], [0], [1], [0, 0, 1, 1], [], []>} : vector<1x64xf32>, vector<64x256xf32>, vector<1x256xf32> -> vector<1x256xf32>
    %356 = arith.addf %355, %160 : vector<1x256xf32>
    %357 = vector.extract_strided_slice %356 {offsets = [0, 0], sizes = [1, 128], strides = [1, 1]} : vector<1x256xf32> to vector<1x128xf32>
    %358 = vector.extract_strided_slice %356 {offsets = [0, 128], sizes = [1, 128], strides = [1, 1]} : vector<1x256xf32> to vector<1x128xf32>
    %359 = arith.negf %357 : vector<1x128xf32>
    %360 = math.exp %359 : vector<1x128xf32>
    %cst_79 = arith.constant 1.000000e+00 : f32
    %361 = vector.broadcast %cst_79 : f32 to vector<1x128xf32>
    %362 = arith.addf %361, %360 : vector<1x128xf32>
    %363 = arith.divf %361, %362 : vector<1x128xf32>
    %364 = math.tanh %357 : vector<1x128xf32>
    %365 = vector.extract_strided_slice %363 {offsets = [0, 0], sizes = [1, 32], strides = [1, 1]} : vector<1x128xf32> to vector<1x32xf32>
    %366 = vector.extract_strided_slice %363 {offsets = [0, 32], sizes = [1, 32], strides = [1, 1]} : vector<1x128xf32> to vector<1x32xf32>
    %367 = vector.extract_strided_slice %364 {offsets = [0, 64], sizes = [1, 32], strides = [1, 1]} : vector<1x128xf32> to vector<1x32xf32>
    %368 = vector.extract_strided_slice %363 {offsets = [0, 96], sizes = [1, 32], strides = [1, 1]} : vector<1x128xf32> to vector<1x32xf32>
    %369 = arith.mulf %366, %309 : vector<1x32xf32>
    %370 = arith.mulf %365, %367 : vector<1x32xf32>
    %371 = arith.addf %369, %370 : vector<1x32xf32>
    %372 = math.tanh %371 : vector<1x32xf32>
    %373 = arith.mulf %368, %372 : vector<1x32xf32>
    %cst_80 = arith.constant dense<0xFF800000> : vector<1xf32>
    %374 = vector.multi_reduction <maximumf>, %358, %cst_80 [1] : vector<1x128xf32> to vector<1xf32>
    %375 = vector.shape_cast %374 : vector<1xf32> to vector<1x1xf32>
    %376 = vector.broadcast %375 : vector<1x1xf32> to vector<1x128xf32>
    %377 = arith.subf %358, %376 : vector<1x128xf32>
    %378 = math.exp %377 : vector<1x128xf32>
    %cst_81 = arith.constant dense<0.000000e+00> : vector<1xf32>
    %379 = vector.multi_reduction <add>, %378, %cst_81 [1] : vector<1x128xf32> to vector<1xf32>
    %380 = vector.shape_cast %379 : vector<1xf32> to vector<1x1xf32>
    %381 = math.log %380 : vector<1x1xf32>
    %382 = arith.addf %375, %381 : vector<1x1xf32>
    %383 = vector.broadcast %382 : vector<1x1xf32> to vector<1x128xf32>
    %384 = arith.subf %358, %383 : vector<1x128xf32>
    %cst_82 = arith.constant dense<0xFF800000> : vector<1xf32>
    %385 = vector.multi_reduction <maximumf>, %384, %cst_82 [1] : vector<1x128xf32> to vector<1xf32>
    %386 = vector.shape_cast %385 : vector<1xf32> to vector<1x1xf32>
    %387 = vector.broadcast %386 : vector<1x1xf32> to vector<1x128xf32>
    %388 = arith.cmpf oeq, %384, %387 : vector<1x128xf32>
    %c128_i32_83 = arith.constant 128 : i32
    %389 = vector.broadcast %c128_i32_83 : i32 to vector<1x128xi32>
    %390 = arith.select %388, %153, %389 : vector<1x128xi1>, vector<1x128xi32>
    %cst_84 = arith.constant dense<2147483647> : vector<1xi32>
    %391 = vector.multi_reduction <minsi>, %390, %cst_84 [1] : vector<1x128xi32> to vector<1xi32>
    %392 = vector.shape_cast %391 : vector<1xi32> to vector<1x1xi32>
    %c3 = arith.constant 3 : index
    %c0_85 = arith.constant 0 : index
    %393 = vector.load %arg7[%c3, %c0_85] : memref<12x128xf32, #tpu.memory_space<vmem>>, vector<1x128xf32>
    tpu.vector_store %arg7[%c3, %c0_85], %384 {strides = array<i32>} : memref<12x128xf32, #tpu.memory_space<vmem>>, vector<1x128xf32>,
    %c4_i32 = arith.constant 4 : i32
    %394 = vector.broadcast %c4_i32 : i32 to vector<1x128xi32>
    %395 = arith.cmpi eq, %153, %394 : vector<1x128xi32>
    %396 = vector.shape_cast %392 : vector<1x1xi32> to vector<1x1xi32>
    %397 = vector.broadcast %396 : vector<1x1xi32> to vector<1x128xi32>
    %398 = arith.select %395, %397, %336 : vector<1x128xi1>, vector<1x128xi32>
    %c0_i32_86 = arith.constant 0 : i32
    %399 = vector.broadcast %c0_i32_86 : i32 to vector<1x1xi32>
    %400 = arith.cmpi eq, %346, %399 : vector<1x1xi32>
    %c1_i32_87 = arith.constant 1 : i32
    %401 = vector.broadcast %c1_i32_87 : i32 to vector<1x1xi32>
    %402 = arith.addi %341, %401 : vector<1x1xi32>
    %403 = arith.select %400, %402, %341 : vector<1x1xi1>, vector<1x1xi32>
    %c1_i32_88 = arith.constant 1 : i32
    %404 = vector.broadcast %c1_i32_88 : i32 to vector<1x1xi32>
    %405 = arith.cmpi eq, %392, %404 : vector<1x1xi32>
    %406 = arith.andi %400, %405 : vector<1x1xi1>
    %c1_i32_89 = arith.constant 1 : i32
    %407 = vector.broadcast %c1_i32_89 : i32 to vector<1x1xi32>
    %408 = arith.select %406, %407, %346 : vector<1x1xi1>, vector<1x1xi32>
    %409 = vector.broadcast %392 : vector<1x1xi32> to vector<1x128xi32>
    %410 = arith.cmpi eq, %153, %409 : vector<1x128xi32>
    %411 = arith.extui %410 : vector<1x128xi1> to vector<1x128xi32>
    %412 = arith.sitofp %411 : vector<1x128xi32> to vector<1x128xf32>
    %cst_90 = arith.constant dense<0.000000e+00> : vector<1x32xf32>
    %413 = tpu.matmul %412, %158, %cst_90 {dimension_numbers = #tpu.dot_dimension_numbers<[1], [0], [0], [1], [0, 0, 1, 1], [], []>} : vector<1x128xf32>, vector<128x32xf32>, vector<1x32xf32> -> vector<1x32xf32>
    %cst_91 = arith.constant 0.000000e+00 : f32
    %414 = vector.broadcast %cst_91 : f32 to vector<1x32xf32>
    %415 = arith.maximumf %413, %414 : vector<1x32xf32>
    %416 = tpu.concatenate %415, %373 in 1 : vector<1x32xf32>, vector<1x32xf32> -> vector<1x64xf32>
    %cst_92 = arith.constant dense<0.000000e+00> : vector<1x256xf32>
    %417 = tpu.matmul %416, %159, %cst_92 {dimension_numbers = #tpu.dot_dimension_numbers<[1], [0], [0], [1], [0, 0, 1, 1], [], []>} : vector<1x64xf32>, vector<64x256xf32>, vector<1x256xf32> -> vector<1x256xf32>
    %418 = arith.addf %417, %160 : vector<1x256xf32>
    %419 = vector.extract_strided_slice %418 {offsets = [0, 0], sizes = [1, 128], strides = [1, 1]} : vector<1x256xf32> to vector<1x128xf32>
    %420 = vector.extract_strided_slice %418 {offsets = [0, 128], sizes = [1, 128], strides = [1, 1]} : vector<1x256xf32> to vector<1x128xf32>
    %421 = arith.negf %419 : vector<1x128xf32>
    %422 = math.exp %421 : vector<1x128xf32>
    %cst_93 = arith.constant 1.000000e+00 : f32
    %423 = vector.broadcast %cst_93 : f32 to vector<1x128xf32>
    %424 = arith.addf %423, %422 : vector<1x128xf32>
    %425 = arith.divf %423, %424 : vector<1x128xf32>
    %426 = math.tanh %419 : vector<1x128xf32>
    %427 = vector.extract_strided_slice %425 {offsets = [0, 0], sizes = [1, 32], strides = [1, 1]} : vector<1x128xf32> to vector<1x32xf32>
    %428 = vector.extract_strided_slice %425 {offsets = [0, 32], sizes = [1, 32], strides = [1, 1]} : vector<1x128xf32> to vector<1x32xf32>
    %429 = vector.extract_strided_slice %426 {offsets = [0, 64], sizes = [1, 32], strides = [1, 1]} : vector<1x128xf32> to vector<1x32xf32>
    %430 = vector.extract_strided_slice %425 {offsets = [0, 96], sizes = [1, 32], strides = [1, 1]} : vector<1x128xf32> to vector<1x32xf32>
    %431 = arith.mulf %428, %371 : vector<1x32xf32>
    %432 = arith.mulf %427, %429 : vector<1x32xf32>
    %433 = arith.addf %431, %432 : vector<1x32xf32>
    %434 = math.tanh %433 : vector<1x32xf32>
    %435 = arith.mulf %430, %434 : vector<1x32xf32>
    %cst_94 = arith.constant dense<0xFF800000> : vector<1xf32>
    %436 = vector.multi_reduction <maximumf>, %420, %cst_94 [1] : vector<1x128xf32> to vector<1xf32>
    %437 = vector.shape_cast %436 : vector<1xf32> to vector<1x1xf32>
    %438 = vector.broadcast %437 : vector<1x1xf32> to vector<1x128xf32>
    %439 = arith.subf %420, %438 : vector<1x128xf32>
    %440 = math.exp %439 : vector<1x128xf32>
    %cst_95 = arith.constant dense<0.000000e+00> : vector<1xf32>
    %441 = vector.multi_reduction <add>, %440, %cst_95 [1] : vector<1x128xf32> to vector<1xf32>
    %442 = vector.shape_cast %441 : vector<1xf32> to vector<1x1xf32>
    %443 = math.log %442 : vector<1x1xf32>
    %444 = arith.addf %437, %443 : vector<1x1xf32>
    %445 = vector.broadcast %444 : vector<1x1xf32> to vector<1x128xf32>
    %446 = arith.subf %420, %445 : vector<1x128xf32>
    %cst_96 = arith.constant dense<0xFF800000> : vector<1xf32>
    %447 = vector.multi_reduction <maximumf>, %446, %cst_96 [1] : vector<1x128xf32> to vector<1xf32>
    %448 = vector.shape_cast %447 : vector<1xf32> to vector<1x1xf32>
    %449 = vector.broadcast %448 : vector<1x1xf32> to vector<1x128xf32>
    %450 = arith.cmpf oeq, %446, %449 : vector<1x128xf32>
    %c128_i32_97 = arith.constant 128 : i32
    %451 = vector.broadcast %c128_i32_97 : i32 to vector<1x128xi32>
    %452 = arith.select %450, %153, %451 : vector<1x128xi1>, vector<1x128xi32>
    %cst_98 = arith.constant dense<2147483647> : vector<1xi32>
    %453 = vector.multi_reduction <minsi>, %452, %cst_98 [1] : vector<1x128xi32> to vector<1xi32>
    %454 = vector.shape_cast %453 : vector<1xi32> to vector<1x1xi32>
    %c4 = arith.constant 4 : index
    %c0_99 = arith.constant 0 : index
    %455 = vector.load %arg7[%c4, %c0_99] : memref<12x128xf32, #tpu.memory_space<vmem>>, vector<1x128xf32>
    tpu.vector_store %arg7[%c4, %c0_99], %446 {strides = array<i32>} : memref<12x128xf32, #tpu.memory_space<vmem>>, vector<1x128xf32>,
    %c5_i32 = arith.constant 5 : i32
    %456 = vector.broadcast %c5_i32 : i32 to vector<1x128xi32>
    %457 = arith.cmpi eq, %153, %456 : vector<1x128xi32>
    %458 = vector.shape_cast %454 : vector<1x1xi32> to vector<1x1xi32>
    %459 = vector.broadcast %458 : vector<1x1xi32> to vector<1x128xi32>
    %460 = arith.select %457, %459, %398 : vector<1x128xi1>, vector<1x128xi32>
    %c0_i32_100 = arith.constant 0 : i32
    %461 = vector.broadcast %c0_i32_100 : i32 to vector<1x1xi32>
    %462 = arith.cmpi eq, %408, %461 : vector<1x1xi32>
    %c1_i32_101 = arith.constant 1 : i32
    %463 = vector.broadcast %c1_i32_101 : i32 to vector<1x1xi32>
    %464 = arith.addi %403, %463 : vector<1x1xi32>
    %465 = arith.select %462, %464, %403 : vector<1x1xi1>, vector<1x1xi32>
    %c1_i32_102 = arith.constant 1 : i32
    %466 = vector.broadcast %c1_i32_102 : i32 to vector<1x1xi32>
    %467 = arith.cmpi eq, %454, %466 : vector<1x1xi32>
    %468 = arith.andi %462, %467 : vector<1x1xi1>
    %c1_i32_103 = arith.constant 1 : i32
    %469 = vector.broadcast %c1_i32_103 : i32 to vector<1x1xi32>
    %470 = arith.select %468, %469, %408 : vector<1x1xi1>, vector<1x1xi32>
    %471 = vector.broadcast %454 : vector<1x1xi32> to vector<1x128xi32>
    %472 = arith.cmpi eq, %153, %471 : vector<1x128xi32>
    %473 = arith.extui %472 : vector<1x128xi1> to vector<1x128xi32>
    %474 = arith.sitofp %473 : vector<1x128xi32> to vector<1x128xf32>
    %cst_104 = arith.constant dense<0.000000e+00> : vector<1x32xf32>
    %475 = tpu.matmul %474, %158, %cst_104 {dimension_numbers = #tpu.dot_dimension_numbers<[1], [0], [0], [1], [0, 0, 1, 1], [], []>} : vector<1x128xf32>, vector<128x32xf32>, vector<1x32xf32> -> vector<1x32xf32>
    %cst_105 = arith.constant 0.000000e+00 : f32
    %476 = vector.broadcast %cst_105 : f32 to vector<1x32xf32>
    %477 = arith.maximumf %475, %476 : vector<1x32xf32>
    %478 = tpu.concatenate %477, %435 in 1 : vector<1x32xf32>, vector<1x32xf32> -> vector<1x64xf32>
    %cst_106 = arith.constant dense<0.000000e+00> : vector<1x256xf32>
    %479 = tpu.matmul %478, %159, %cst_106 {dimension_numbers = #tpu.dot_dimension_numbers<[1], [0], [0], [1], [0, 0, 1, 1], [], []>} : vector<1x64xf32>, vector<64x256xf32>, vector<1x256xf32> -> vector<1x256xf32>
    %480 = arith.addf %479, %160 : vector<1x256xf32>
    %481 = vector.extract_strided_slice %480 {offsets = [0, 0], sizes = [1, 128], strides = [1, 1]} : vector<1x256xf32> to vector<1x128xf32>
    %482 = vector.extract_strided_slice %480 {offsets = [0, 128], sizes = [1, 128], strides = [1, 1]} : vector<1x256xf32> to vector<1x128xf32>
    %483 = arith.negf %481 : vector<1x128xf32>
    %484 = math.exp %483 : vector<1x128xf32>
    %cst_107 = arith.constant 1.000000e+00 : f32
    %485 = vector.broadcast %cst_107 : f32 to vector<1x128xf32>
    %486 = arith.addf %485, %484 : vector<1x128xf32>
    %487 = arith.divf %485, %486 : vector<1x128xf32>
    %488 = math.tanh %481 : vector<1x128xf32>
    %489 = vector.extract_strided_slice %487 {offsets = [0, 0], sizes = [1, 32], strides = [1, 1]} : vector<1x128xf32> to vector<1x32xf32>
    %490 = vector.extract_strided_slice %487 {offsets = [0, 32], sizes = [1, 32], strides = [1, 1]} : vector<1x128xf32> to vector<1x32xf32>
    %491 = vector.extract_strided_slice %488 {offsets = [0, 64], sizes = [1, 32], strides = [1, 1]} : vector<1x128xf32> to vector<1x32xf32>
    %492 = vector.extract_strided_slice %487 {offsets = [0, 96], sizes = [1, 32], strides = [1, 1]} : vector<1x128xf32> to vector<1x32xf32>
    %493 = arith.mulf %490, %433 : vector<1x32xf32>
    %494 = arith.mulf %489, %491 : vector<1x32xf32>
    %495 = arith.addf %493, %494 : vector<1x32xf32>
    %496 = math.tanh %495 : vector<1x32xf32>
    %497 = arith.mulf %492, %496 : vector<1x32xf32>
    %cst_108 = arith.constant dense<0xFF800000> : vector<1xf32>
    %498 = vector.multi_reduction <maximumf>, %482, %cst_108 [1] : vector<1x128xf32> to vector<1xf32>
    %499 = vector.shape_cast %498 : vector<1xf32> to vector<1x1xf32>
    %500 = vector.broadcast %499 : vector<1x1xf32> to vector<1x128xf32>
    %501 = arith.subf %482, %500 : vector<1x128xf32>
    %502 = math.exp %501 : vector<1x128xf32>
    %cst_109 = arith.constant dense<0.000000e+00> : vector<1xf32>
    %503 = vector.multi_reduction <add>, %502, %cst_109 [1] : vector<1x128xf32> to vector<1xf32>
    %504 = vector.shape_cast %503 : vector<1xf32> to vector<1x1xf32>
    %505 = math.log %504 : vector<1x1xf32>
    %506 = arith.addf %499, %505 : vector<1x1xf32>
    %507 = vector.broadcast %506 : vector<1x1xf32> to vector<1x128xf32>
    %508 = arith.subf %482, %507 : vector<1x128xf32>
    %cst_110 = arith.constant dense<0xFF800000> : vector<1xf32>
    %509 = vector.multi_reduction <maximumf>, %508, %cst_110 [1] : vector<1x128xf32> to vector<1xf32>
    %510 = vector.shape_cast %509 : vector<1xf32> to vector<1x1xf32>
    %511 = vector.broadcast %510 : vector<1x1xf32> to vector<1x128xf32>
    %512 = arith.cmpf oeq, %508, %511 : vector<1x128xf32>
    %c128_i32_111 = arith.constant 128 : i32
    %513 = vector.broadcast %c128_i32_111 : i32 to vector<1x128xi32>
    %514 = arith.select %512, %153, %513 : vector<1x128xi1>, vector<1x128xi32>
    %cst_112 = arith.constant dense<2147483647> : vector<1xi32>
    %515 = vector.multi_reduction <minsi>, %514, %cst_112 [1] : vector<1x128xi32> to vector<1xi32>
    %516 = vector.shape_cast %515 : vector<1xi32> to vector<1x1xi32>
    %c5 = arith.constant 5 : index
    %c0_113 = arith.constant 0 : index
    %517 = vector.load %arg7[%c5, %c0_113] : memref<12x128xf32, #tpu.memory_space<vmem>>, vector<1x128xf32>
    tpu.vector_store %arg7[%c5, %c0_113], %508 {strides = array<i32>} : memref<12x128xf32, #tpu.memory_space<vmem>>, vector<1x128xf32>,
    %c6_i32 = arith.constant 6 : i32
    %518 = vector.broadcast %c6_i32 : i32 to vector<1x128xi32>
    %519 = arith.cmpi eq, %153, %518 : vector<1x128xi32>
    %520 = vector.shape_cast %516 : vector<1x1xi32> to vector<1x1xi32>
    %521 = vector.broadcast %520 : vector<1x1xi32> to vector<1x128xi32>
    %522 = arith.select %519, %521, %460 : vector<1x128xi1>, vector<1x128xi32>
    %c0_i32_114 = arith.constant 0 : i32
    %523 = vector.broadcast %c0_i32_114 : i32 to vector<1x1xi32>
    %524 = arith.cmpi eq, %470, %523 : vector<1x1xi32>
    %c1_i32_115 = arith.constant 1 : i32
    %525 = vector.broadcast %c1_i32_115 : i32 to vector<1x1xi32>
    %526 = arith.addi %465, %525 : vector<1x1xi32>
    %527 = arith.select %524, %526, %465 : vector<1x1xi1>, vector<1x1xi32>
    %c1_i32_116 = arith.constant 1 : i32
    %528 = vector.broadcast %c1_i32_116 : i32 to vector<1x1xi32>
    %529 = arith.cmpi eq, %516, %528 : vector<1x1xi32>
    %530 = arith.andi %524, %529 : vector<1x1xi1>
    %c1_i32_117 = arith.constant 1 : i32
    %531 = vector.broadcast %c1_i32_117 : i32 to vector<1x1xi32>
    %532 = arith.select %530, %531, %470 : vector<1x1xi1>, vector<1x1xi32>
    %533 = vector.broadcast %516 : vector<1x1xi32> to vector<1x128xi32>
    %534 = arith.cmpi eq, %153, %533 : vector<1x128xi32>
    %535 = arith.extui %534 : vector<1x128xi1> to vector<1x128xi32>
    %536 = arith.sitofp %535 : vector<1x128xi32> to vector<1x128xf32>
    %cst_118 = arith.constant dense<0.000000e+00> : vector<1x32xf32>
    %537 = tpu.matmul %536, %158, %cst_118 {dimension_numbers = #tpu.dot_dimension_numbers<[1], [0], [0], [1], [0, 0, 1, 1], [], []>} : vector<1x128xf32>, vector<128x32xf32>, vector<1x32xf32> -> vector<1x32xf32>
    %cst_119 = arith.constant 0.000000e+00 : f32
    %538 = vector.broadcast %cst_119 : f32 to vector<1x32xf32>
    %539 = arith.maximumf %537, %538 : vector<1x32xf32>
    %540 = tpu.concatenate %539, %497 in 1 : vector<1x32xf32>, vector<1x32xf32> -> vector<1x64xf32>
    %cst_120 = arith.constant dense<0.000000e+00> : vector<1x256xf32>
    %541 = tpu.matmul %540, %159, %cst_120 {dimension_numbers = #tpu.dot_dimension_numbers<[1], [0], [0], [1], [0, 0, 1, 1], [], []>} : vector<1x64xf32>, vector<64x256xf32>, vector<1x256xf32> -> vector<1x256xf32>
    %542 = arith.addf %541, %160 : vector<1x256xf32>
    %543 = vector.extract_strided_slice %542 {offsets = [0, 0], sizes = [1, 128], strides = [1, 1]} : vector<1x256xf32> to vector<1x128xf32>
    %544 = vector.extract_strided_slice %542 {offsets = [0, 128], sizes = [1, 128], strides = [1, 1]} : vector<1x256xf32> to vector<1x128xf32>
    %545 = arith.negf %543 : vector<1x128xf32>
    %546 = math.exp %545 : vector<1x128xf32>
    %cst_121 = arith.constant 1.000000e+00 : f32
    %547 = vector.broadcast %cst_121 : f32 to vector<1x128xf32>
    %548 = arith.addf %547, %546 : vector<1x128xf32>
    %549 = arith.divf %547, %548 : vector<1x128xf32>
    %550 = math.tanh %543 : vector<1x128xf32>
    %551 = vector.extract_strided_slice %549 {offsets = [0, 0], sizes = [1, 32], strides = [1, 1]} : vector<1x128xf32> to vector<1x32xf32>
    %552 = vector.extract_strided_slice %549 {offsets = [0, 32], sizes = [1, 32], strides = [1, 1]} : vector<1x128xf32> to vector<1x32xf32>
    %553 = vector.extract_strided_slice %550 {offsets = [0, 64], sizes = [1, 32], strides = [1, 1]} : vector<1x128xf32> to vector<1x32xf32>
    %554 = vector.extract_strided_slice %549 {offsets = [0, 96], sizes = [1, 32], strides = [1, 1]} : vector<1x128xf32> to vector<1x32xf32>
    %555 = arith.mulf %552, %495 : vector<1x32xf32>
    %556 = arith.mulf %551, %553 : vector<1x32xf32>
    %557 = arith.addf %555, %556 : vector<1x32xf32>
    %558 = math.tanh %557 : vector<1x32xf32>
    %559 = arith.mulf %554, %558 : vector<1x32xf32>
    %cst_122 = arith.constant dense<0xFF800000> : vector<1xf32>
    %560 = vector.multi_reduction <maximumf>, %544, %cst_122 [1] : vector<1x128xf32> to vector<1xf32>
    %561 = vector.shape_cast %560 : vector<1xf32> to vector<1x1xf32>
    %562 = vector.broadcast %561 : vector<1x1xf32> to vector<1x128xf32>
    %563 = arith.subf %544, %562 : vector<1x128xf32>
    %564 = math.exp %563 : vector<1x128xf32>
    %cst_123 = arith.constant dense<0.000000e+00> : vector<1xf32>
    %565 = vector.multi_reduction <add>, %564, %cst_123 [1] : vector<1x128xf32> to vector<1xf32>
    %566 = vector.shape_cast %565 : vector<1xf32> to vector<1x1xf32>
    %567 = math.log %566 : vector<1x1xf32>
    %568 = arith.addf %561, %567 : vector<1x1xf32>
    %569 = vector.broadcast %568 : vector<1x1xf32> to vector<1x128xf32>
    %570 = arith.subf %544, %569 : vector<1x128xf32>
    %cst_124 = arith.constant dense<0xFF800000> : vector<1xf32>
    %571 = vector.multi_reduction <maximumf>, %570, %cst_124 [1] : vector<1x128xf32> to vector<1xf32>
    %572 = vector.shape_cast %571 : vector<1xf32> to vector<1x1xf32>
    %573 = vector.broadcast %572 : vector<1x1xf32> to vector<1x128xf32>
    %574 = arith.cmpf oeq, %570, %573 : vector<1x128xf32>
    %c128_i32_125 = arith.constant 128 : i32
    %575 = vector.broadcast %c128_i32_125 : i32 to vector<1x128xi32>
    %576 = arith.select %574, %153, %575 : vector<1x128xi1>, vector<1x128xi32>
    %cst_126 = arith.constant dense<2147483647> : vector<1xi32>
    %577 = vector.multi_reduction <minsi>, %576, %cst_126 [1] : vector<1x128xi32> to vector<1xi32>
    %578 = vector.shape_cast %577 : vector<1xi32> to vector<1x1xi32>
    %c6 = arith.constant 6 : index
    %c0_127 = arith.constant 0 : index
    %579 = vector.load %arg7[%c6, %c0_127] : memref<12x128xf32, #tpu.memory_space<vmem>>, vector<1x128xf32>
    tpu.vector_store %arg7[%c6, %c0_127], %570 {strides = array<i32>} : memref<12x128xf32, #tpu.memory_space<vmem>>, vector<1x128xf32>,
    %c7_i32 = arith.constant 7 : i32
    %580 = vector.broadcast %c7_i32 : i32 to vector<1x128xi32>
    %581 = arith.cmpi eq, %153, %580 : vector<1x128xi32>
    %582 = vector.shape_cast %578 : vector<1x1xi32> to vector<1x1xi32>
    %583 = vector.broadcast %582 : vector<1x1xi32> to vector<1x128xi32>
    %584 = arith.select %581, %583, %522 : vector<1x128xi1>, vector<1x128xi32>
    %c0_i32_128 = arith.constant 0 : i32
    %585 = vector.broadcast %c0_i32_128 : i32 to vector<1x1xi32>
    %586 = arith.cmpi eq, %532, %585 : vector<1x1xi32>
    %c1_i32_129 = arith.constant 1 : i32
    %587 = vector.broadcast %c1_i32_129 : i32 to vector<1x1xi32>
    %588 = arith.addi %527, %587 : vector<1x1xi32>
    %589 = arith.select %586, %588, %527 : vector<1x1xi1>, vector<1x1xi32>
    %c1_i32_130 = arith.constant 1 : i32
    %590 = vector.broadcast %c1_i32_130 : i32 to vector<1x1xi32>
    %591 = arith.cmpi eq, %578, %590 : vector<1x1xi32>
    %592 = arith.andi %586, %591 : vector<1x1xi1>
    %c1_i32_131 = arith.constant 1 : i32
    %593 = vector.broadcast %c1_i32_131 : i32 to vector<1x1xi32>
    %594 = arith.select %592, %593, %532 : vector<1x1xi1>, vector<1x1xi32>
    %595 = vector.broadcast %578 : vector<1x1xi32> to vector<1x128xi32>
    %596 = arith.cmpi eq, %153, %595 : vector<1x128xi32>
    %597 = arith.extui %596 : vector<1x128xi1> to vector<1x128xi32>
    %598 = arith.sitofp %597 : vector<1x128xi32> to vector<1x128xf32>
    %cst_132 = arith.constant dense<0.000000e+00> : vector<1x32xf32>
    %599 = tpu.matmul %598, %158, %cst_132 {dimension_numbers = #tpu.dot_dimension_numbers<[1], [0], [0], [1], [0, 0, 1, 1], [], []>} : vector<1x128xf32>, vector<128x32xf32>, vector<1x32xf32> -> vector<1x32xf32>
    %cst_133 = arith.constant 0.000000e+00 : f32
    %600 = vector.broadcast %cst_133 : f32 to vector<1x32xf32>
    %601 = arith.maximumf %599, %600 : vector<1x32xf32>
    %602 = tpu.concatenate %601, %559 in 1 : vector<1x32xf32>, vector<1x32xf32> -> vector<1x64xf32>
    %cst_134 = arith.constant dense<0.000000e+00> : vector<1x256xf32>
    %603 = tpu.matmul %602, %159, %cst_134 {dimension_numbers = #tpu.dot_dimension_numbers<[1], [0], [0], [1], [0, 0, 1, 1], [], []>} : vector<1x64xf32>, vector<64x256xf32>, vector<1x256xf32> -> vector<1x256xf32>
    %604 = arith.addf %603, %160 : vector<1x256xf32>
    %605 = vector.extract_strided_slice %604 {offsets = [0, 0], sizes = [1, 128], strides = [1, 1]} : vector<1x256xf32> to vector<1x128xf32>
    %606 = vector.extract_strided_slice %604 {offsets = [0, 128], sizes = [1, 128], strides = [1, 1]} : vector<1x256xf32> to vector<1x128xf32>
    %607 = arith.negf %605 : vector<1x128xf32>
    %608 = math.exp %607 : vector<1x128xf32>
    %cst_135 = arith.constant 1.000000e+00 : f32
    %609 = vector.broadcast %cst_135 : f32 to vector<1x128xf32>
    %610 = arith.addf %609, %608 : vector<1x128xf32>
    %611 = arith.divf %609, %610 : vector<1x128xf32>
    %612 = math.tanh %605 : vector<1x128xf32>
    %613 = vector.extract_strided_slice %611 {offsets = [0, 0], sizes = [1, 32], strides = [1, 1]} : vector<1x128xf32> to vector<1x32xf32>
    %614 = vector.extract_strided_slice %611 {offsets = [0, 32], sizes = [1, 32], strides = [1, 1]} : vector<1x128xf32> to vector<1x32xf32>
    %615 = vector.extract_strided_slice %612 {offsets = [0, 64], sizes = [1, 32], strides = [1, 1]} : vector<1x128xf32> to vector<1x32xf32>
    %616 = vector.extract_strided_slice %611 {offsets = [0, 96], sizes = [1, 32], strides = [1, 1]} : vector<1x128xf32> to vector<1x32xf32>
    %617 = arith.mulf %614, %557 : vector<1x32xf32>
    %618 = arith.mulf %613, %615 : vector<1x32xf32>
    %619 = arith.addf %617, %618 : vector<1x32xf32>
    %620 = math.tanh %619 : vector<1x32xf32>
    %621 = arith.mulf %616, %620 : vector<1x32xf32>
    %cst_136 = arith.constant dense<0xFF800000> : vector<1xf32>
    %622 = vector.multi_reduction <maximumf>, %606, %cst_136 [1] : vector<1x128xf32> to vector<1xf32>
    %623 = vector.shape_cast %622 : vector<1xf32> to vector<1x1xf32>
    %624 = vector.broadcast %623 : vector<1x1xf32> to vector<1x128xf32>
    %625 = arith.subf %606, %624 : vector<1x128xf32>
    %626 = math.exp %625 : vector<1x128xf32>
    %cst_137 = arith.constant dense<0.000000e+00> : vector<1xf32>
    %627 = vector.multi_reduction <add>, %626, %cst_137 [1] : vector<1x128xf32> to vector<1xf32>
    %628 = vector.shape_cast %627 : vector<1xf32> to vector<1x1xf32>
    %629 = math.log %628 : vector<1x1xf32>
    %630 = arith.addf %623, %629 : vector<1x1xf32>
    %631 = vector.broadcast %630 : vector<1x1xf32> to vector<1x128xf32>
    %632 = arith.subf %606, %631 : vector<1x128xf32>
    %cst_138 = arith.constant dense<0xFF800000> : vector<1xf32>
    %633 = vector.multi_reduction <maximumf>, %632, %cst_138 [1] : vector<1x128xf32> to vector<1xf32>
    %634 = vector.shape_cast %633 : vector<1xf32> to vector<1x1xf32>
    %635 = vector.broadcast %634 : vector<1x1xf32> to vector<1x128xf32>
    %636 = arith.cmpf oeq, %632, %635 : vector<1x128xf32>
    %c128_i32_139 = arith.constant 128 : i32
    %637 = vector.broadcast %c128_i32_139 : i32 to vector<1x128xi32>
    %638 = arith.select %636, %153, %637 : vector<1x128xi1>, vector<1x128xi32>
    %cst_140 = arith.constant dense<2147483647> : vector<1xi32>
    %639 = vector.multi_reduction <minsi>, %638, %cst_140 [1] : vector<1x128xi32> to vector<1xi32>
    %640 = vector.shape_cast %639 : vector<1xi32> to vector<1x1xi32>
    %c7 = arith.constant 7 : index
    %c0_141 = arith.constant 0 : index
    %641 = vector.load %arg7[%c7, %c0_141] : memref<12x128xf32, #tpu.memory_space<vmem>>, vector<1x128xf32>
    tpu.vector_store %arg7[%c7, %c0_141], %632 {strides = array<i32>} : memref<12x128xf32, #tpu.memory_space<vmem>>, vector<1x128xf32>,
    %c8_i32 = arith.constant 8 : i32
    %642 = vector.broadcast %c8_i32 : i32 to vector<1x128xi32>
    %643 = arith.cmpi eq, %153, %642 : vector<1x128xi32>
    %644 = vector.shape_cast %640 : vector<1x1xi32> to vector<1x1xi32>
    %645 = vector.broadcast %644 : vector<1x1xi32> to vector<1x128xi32>
    %646 = arith.select %643, %645, %584 : vector<1x128xi1>, vector<1x128xi32>
    %c0_i32_142 = arith.constant 0 : i32
    %647 = vector.broadcast %c0_i32_142 : i32 to vector<1x1xi32>
    %648 = arith.cmpi eq, %594, %647 : vector<1x1xi32>
    %c1_i32_143 = arith.constant 1 : i32
    %649 = vector.broadcast %c1_i32_143 : i32 to vector<1x1xi32>
    %650 = arith.addi %589, %649 : vector<1x1xi32>
    %651 = arith.select %648, %650, %589 : vector<1x1xi1>, vector<1x1xi32>
    %c1_i32_144 = arith.constant 1 : i32
    %652 = vector.broadcast %c1_i32_144 : i32 to vector<1x1xi32>
    %653 = arith.cmpi eq, %640, %652 : vector<1x1xi32>
    %654 = arith.andi %648, %653 : vector<1x1xi1>
    %c1_i32_145 = arith.constant 1 : i32
    %655 = vector.broadcast %c1_i32_145 : i32 to vector<1x1xi32>
    %656 = arith.select %654, %655, %594 : vector<1x1xi1>, vector<1x1xi32>
    %657 = vector.broadcast %640 : vector<1x1xi32> to vector<1x128xi32>
    %658 = arith.cmpi eq, %153, %657 : vector<1x128xi32>
    %659 = arith.extui %658 : vector<1x128xi1> to vector<1x128xi32>
    %660 = arith.sitofp %659 : vector<1x128xi32> to vector<1x128xf32>
    %cst_146 = arith.constant dense<0.000000e+00> : vector<1x32xf32>
    %661 = tpu.matmul %660, %158, %cst_146 {dimension_numbers = #tpu.dot_dimension_numbers<[1], [0], [0], [1], [0, 0, 1, 1], [], []>} : vector<1x128xf32>, vector<128x32xf32>, vector<1x32xf32> -> vector<1x32xf32>
    %cst_147 = arith.constant 0.000000e+00 : f32
    %662 = vector.broadcast %cst_147 : f32 to vector<1x32xf32>
    %663 = arith.maximumf %661, %662 : vector<1x32xf32>
    %664 = tpu.concatenate %663, %621 in 1 : vector<1x32xf32>, vector<1x32xf32> -> vector<1x64xf32>
    %cst_148 = arith.constant dense<0.000000e+00> : vector<1x256xf32>
    %665 = tpu.matmul %664, %159, %cst_148 {dimension_numbers = #tpu.dot_dimension_numbers<[1], [0], [0], [1], [0, 0, 1, 1], [], []>} : vector<1x64xf32>, vector<64x256xf32>, vector<1x256xf32> -> vector<1x256xf32>
    %666 = arith.addf %665, %160 : vector<1x256xf32>
    %667 = vector.extract_strided_slice %666 {offsets = [0, 0], sizes = [1, 128], strides = [1, 1]} : vector<1x256xf32> to vector<1x128xf32>
    %668 = vector.extract_strided_slice %666 {offsets = [0, 128], sizes = [1, 128], strides = [1, 1]} : vector<1x256xf32> to vector<1x128xf32>
    %669 = arith.negf %667 : vector<1x128xf32>
    %670 = math.exp %669 : vector<1x128xf32>
    %cst_149 = arith.constant 1.000000e+00 : f32
    %671 = vector.broadcast %cst_149 : f32 to vector<1x128xf32>
    %672 = arith.addf %671, %670 : vector<1x128xf32>
    %673 = arith.divf %671, %672 : vector<1x128xf32>
    %674 = math.tanh %667 : vector<1x128xf32>
    %675 = vector.extract_strided_slice %673 {offsets = [0, 0], sizes = [1, 32], strides = [1, 1]} : vector<1x128xf32> to vector<1x32xf32>
    %676 = vector.extract_strided_slice %673 {offsets = [0, 32], sizes = [1, 32], strides = [1, 1]} : vector<1x128xf32> to vector<1x32xf32>
    %677 = vector.extract_strided_slice %674 {offsets = [0, 64], sizes = [1, 32], strides = [1, 1]} : vector<1x128xf32> to vector<1x32xf32>
    %678 = vector.extract_strided_slice %673 {offsets = [0, 96], sizes = [1, 32], strides = [1, 1]} : vector<1x128xf32> to vector<1x32xf32>
    %679 = arith.mulf %676, %619 : vector<1x32xf32>
    %680 = arith.mulf %675, %677 : vector<1x32xf32>
    %681 = arith.addf %679, %680 : vector<1x32xf32>
    %682 = math.tanh %681 : vector<1x32xf32>
    %683 = arith.mulf %678, %682 : vector<1x32xf32>
    %cst_150 = arith.constant dense<0xFF800000> : vector<1xf32>
    %684 = vector.multi_reduction <maximumf>, %668, %cst_150 [1] : vector<1x128xf32> to vector<1xf32>
    %685 = vector.shape_cast %684 : vector<1xf32> to vector<1x1xf32>
    %686 = vector.broadcast %685 : vector<1x1xf32> to vector<1x128xf32>
    %687 = arith.subf %668, %686 : vector<1x128xf32>
    %688 = math.exp %687 : vector<1x128xf32>
    %cst_151 = arith.constant dense<0.000000e+00> : vector<1xf32>
    %689 = vector.multi_reduction <add>, %688, %cst_151 [1] : vector<1x128xf32> to vector<1xf32>
    %690 = vector.shape_cast %689 : vector<1xf32> to vector<1x1xf32>
    %691 = math.log %690 : vector<1x1xf32>
    %692 = arith.addf %685, %691 : vector<1x1xf32>
    %693 = vector.broadcast %692 : vector<1x1xf32> to vector<1x128xf32>
    %694 = arith.subf %668, %693 : vector<1x128xf32>
    %cst_152 = arith.constant dense<0xFF800000> : vector<1xf32>
    %695 = vector.multi_reduction <maximumf>, %694, %cst_152 [1] : vector<1x128xf32> to vector<1xf32>
    %696 = vector.shape_cast %695 : vector<1xf32> to vector<1x1xf32>
    %697 = vector.broadcast %696 : vector<1x1xf32> to vector<1x128xf32>
    %698 = arith.cmpf oeq, %694, %697 : vector<1x128xf32>
    %c128_i32_153 = arith.constant 128 : i32
    %699 = vector.broadcast %c128_i32_153 : i32 to vector<1x128xi32>
    %700 = arith.select %698, %153, %699 : vector<1x128xi1>, vector<1x128xi32>
    %cst_154 = arith.constant dense<2147483647> : vector<1xi32>
    %701 = vector.multi_reduction <minsi>, %700, %cst_154 [1] : vector<1x128xi32> to vector<1xi32>
    %702 = vector.shape_cast %701 : vector<1xi32> to vector<1x1xi32>
    %c8 = arith.constant 8 : index
    %c0_155 = arith.constant 0 : index
    %703 = vector.load %arg7[%c8, %c0_155] : memref<12x128xf32, #tpu.memory_space<vmem>>, vector<1x128xf32>
    tpu.vector_store %arg7[%c8, %c0_155], %694 {strides = array<i32>} : memref<12x128xf32, #tpu.memory_space<vmem>>, vector<1x128xf32>,
    %c9_i32 = arith.constant 9 : i32
    %704 = vector.broadcast %c9_i32 : i32 to vector<1x128xi32>
    %705 = arith.cmpi eq, %153, %704 : vector<1x128xi32>
    %706 = vector.shape_cast %702 : vector<1x1xi32> to vector<1x1xi32>
    %707 = vector.broadcast %706 : vector<1x1xi32> to vector<1x128xi32>
    %708 = arith.select %705, %707, %646 : vector<1x128xi1>, vector<1x128xi32>
    %c0_i32_156 = arith.constant 0 : i32
    %709 = vector.broadcast %c0_i32_156 : i32 to vector<1x1xi32>
    %710 = arith.cmpi eq, %656, %709 : vector<1x1xi32>
    %c1_i32_157 = arith.constant 1 : i32
    %711 = vector.broadcast %c1_i32_157 : i32 to vector<1x1xi32>
    %712 = arith.addi %651, %711 : vector<1x1xi32>
    %713 = arith.select %710, %712, %651 : vector<1x1xi1>, vector<1x1xi32>
    %c1_i32_158 = arith.constant 1 : i32
    %714 = vector.broadcast %c1_i32_158 : i32 to vector<1x1xi32>
    %715 = arith.cmpi eq, %702, %714 : vector<1x1xi32>
    %716 = arith.andi %710, %715 : vector<1x1xi1>
    %c1_i32_159 = arith.constant 1 : i32
    %717 = vector.broadcast %c1_i32_159 : i32 to vector<1x1xi32>
    %718 = arith.select %716, %717, %656 : vector<1x1xi1>, vector<1x1xi32>
    %719 = vector.broadcast %702 : vector<1x1xi32> to vector<1x128xi32>
    %720 = arith.cmpi eq, %153, %719 : vector<1x128xi32>
    %721 = arith.extui %720 : vector<1x128xi1> to vector<1x128xi32>
    %722 = arith.sitofp %721 : vector<1x128xi32> to vector<1x128xf32>
    %cst_160 = arith.constant dense<0.000000e+00> : vector<1x32xf32>
    %723 = tpu.matmul %722, %158, %cst_160 {dimension_numbers = #tpu.dot_dimension_numbers<[1], [0], [0], [1], [0, 0, 1, 1], [], []>} : vector<1x128xf32>, vector<128x32xf32>, vector<1x32xf32> -> vector<1x32xf32>
    %cst_161 = arith.constant 0.000000e+00 : f32
    %724 = vector.broadcast %cst_161 : f32 to vector<1x32xf32>
    %725 = arith.maximumf %723, %724 : vector<1x32xf32>
    %726 = tpu.concatenate %725, %683 in 1 : vector<1x32xf32>, vector<1x32xf32> -> vector<1x64xf32>
    %cst_162 = arith.constant dense<0.000000e+00> : vector<1x256xf32>
    %727 = tpu.matmul %726, %159, %cst_162 {dimension_numbers = #tpu.dot_dimension_numbers<[1], [0], [0], [1], [0, 0, 1, 1], [], []>} : vector<1x64xf32>, vector<64x256xf32>, vector<1x256xf32> -> vector<1x256xf32>
    %728 = arith.addf %727, %160 : vector<1x256xf32>
    %729 = vector.extract_strided_slice %728 {offsets = [0, 0], sizes = [1, 128], strides = [1, 1]} : vector<1x256xf32> to vector<1x128xf32>
    %730 = vector.extract_strided_slice %728 {offsets = [0, 128], sizes = [1, 128], strides = [1, 1]} : vector<1x256xf32> to vector<1x128xf32>
    %731 = arith.negf %729 : vector<1x128xf32>
    %732 = math.exp %731 : vector<1x128xf32>
    %cst_163 = arith.constant 1.000000e+00 : f32
    %733 = vector.broadcast %cst_163 : f32 to vector<1x128xf32>
    %734 = arith.addf %733, %732 : vector<1x128xf32>
    %735 = arith.divf %733, %734 : vector<1x128xf32>
    %736 = math.tanh %729 : vector<1x128xf32>
    %737 = vector.extract_strided_slice %735 {offsets = [0, 0], sizes = [1, 32], strides = [1, 1]} : vector<1x128xf32> to vector<1x32xf32>
    %738 = vector.extract_strided_slice %735 {offsets = [0, 32], sizes = [1, 32], strides = [1, 1]} : vector<1x128xf32> to vector<1x32xf32>
    %739 = vector.extract_strided_slice %736 {offsets = [0, 64], sizes = [1, 32], strides = [1, 1]} : vector<1x128xf32> to vector<1x32xf32>
    %740 = vector.extract_strided_slice %735 {offsets = [0, 96], sizes = [1, 32], strides = [1, 1]} : vector<1x128xf32> to vector<1x32xf32>
    %741 = arith.mulf %738, %681 : vector<1x32xf32>
    %742 = arith.mulf %737, %739 : vector<1x32xf32>
    %743 = arith.addf %741, %742 : vector<1x32xf32>
    %744 = math.tanh %743 : vector<1x32xf32>
    %745 = arith.mulf %740, %744 : vector<1x32xf32>
    %cst_164 = arith.constant dense<0xFF800000> : vector<1xf32>
    %746 = vector.multi_reduction <maximumf>, %730, %cst_164 [1] : vector<1x128xf32> to vector<1xf32>
    %747 = vector.shape_cast %746 : vector<1xf32> to vector<1x1xf32>
    %748 = vector.broadcast %747 : vector<1x1xf32> to vector<1x128xf32>
    %749 = arith.subf %730, %748 : vector<1x128xf32>
    %750 = math.exp %749 : vector<1x128xf32>
    %cst_165 = arith.constant dense<0.000000e+00> : vector<1xf32>
    %751 = vector.multi_reduction <add>, %750, %cst_165 [1] : vector<1x128xf32> to vector<1xf32>
    %752 = vector.shape_cast %751 : vector<1xf32> to vector<1x1xf32>
    %753 = math.log %752 : vector<1x1xf32>
    %754 = arith.addf %747, %753 : vector<1x1xf32>
    %755 = vector.broadcast %754 : vector<1x1xf32> to vector<1x128xf32>
    %756 = arith.subf %730, %755 : vector<1x128xf32>
    %cst_166 = arith.constant dense<0xFF800000> : vector<1xf32>
    %757 = vector.multi_reduction <maximumf>, %756, %cst_166 [1] : vector<1x128xf32> to vector<1xf32>
    %758 = vector.shape_cast %757 : vector<1xf32> to vector<1x1xf32>
    %759 = vector.broadcast %758 : vector<1x1xf32> to vector<1x128xf32>
    %760 = arith.cmpf oeq, %756, %759 : vector<1x128xf32>
    %c128_i32_167 = arith.constant 128 : i32
    %761 = vector.broadcast %c128_i32_167 : i32 to vector<1x128xi32>
    %762 = arith.select %760, %153, %761 : vector<1x128xi1>, vector<1x128xi32>
    %cst_168 = arith.constant dense<2147483647> : vector<1xi32>
    %763 = vector.multi_reduction <minsi>, %762, %cst_168 [1] : vector<1x128xi32> to vector<1xi32>
    %764 = vector.shape_cast %763 : vector<1xi32> to vector<1x1xi32>
    %c9 = arith.constant 9 : index
    %c0_169 = arith.constant 0 : index
    %765 = vector.load %arg7[%c9, %c0_169] : memref<12x128xf32, #tpu.memory_space<vmem>>, vector<1x128xf32>
    tpu.vector_store %arg7[%c9, %c0_169], %756 {strides = array<i32>} : memref<12x128xf32, #tpu.memory_space<vmem>>, vector<1x128xf32>,
    %c10_i32 = arith.constant 10 : i32
    %766 = vector.broadcast %c10_i32 : i32 to vector<1x128xi32>
    %767 = arith.cmpi eq, %153, %766 : vector<1x128xi32>
    %768 = vector.shape_cast %764 : vector<1x1xi32> to vector<1x1xi32>
    %769 = vector.broadcast %768 : vector<1x1xi32> to vector<1x128xi32>
    %770 = arith.select %767, %769, %708 : vector<1x128xi1>, vector<1x128xi32>
    %c0_i32_170 = arith.constant 0 : i32
    %771 = vector.broadcast %c0_i32_170 : i32 to vector<1x1xi32>
    %772 = arith.cmpi eq, %718, %771 : vector<1x1xi32>
    %c1_i32_171 = arith.constant 1 : i32
    %773 = vector.broadcast %c1_i32_171 : i32 to vector<1x1xi32>
    %774 = arith.addi %713, %773 : vector<1x1xi32>
    %775 = arith.select %772, %774, %713 : vector<1x1xi1>, vector<1x1xi32>
    %c1_i32_172 = arith.constant 1 : i32
    %776 = vector.broadcast %c1_i32_172 : i32 to vector<1x1xi32>
    %777 = arith.cmpi eq, %764, %776 : vector<1x1xi32>
    %778 = arith.andi %772, %777 : vector<1x1xi1>
    %c1_i32_173 = arith.constant 1 : i32
    %779 = vector.broadcast %c1_i32_173 : i32 to vector<1x1xi32>
    %780 = arith.select %778, %779, %718 : vector<1x1xi1>, vector<1x1xi32>
    %781 = vector.broadcast %764 : vector<1x1xi32> to vector<1x128xi32>
    %782 = arith.cmpi eq, %153, %781 : vector<1x128xi32>
    %783 = arith.extui %782 : vector<1x128xi1> to vector<1x128xi32>
    %784 = arith.sitofp %783 : vector<1x128xi32> to vector<1x128xf32>
    %cst_174 = arith.constant dense<0.000000e+00> : vector<1x32xf32>
    %785 = tpu.matmul %784, %158, %cst_174 {dimension_numbers = #tpu.dot_dimension_numbers<[1], [0], [0], [1], [0, 0, 1, 1], [], []>} : vector<1x128xf32>, vector<128x32xf32>, vector<1x32xf32> -> vector<1x32xf32>
    %cst_175 = arith.constant 0.000000e+00 : f32
    %786 = vector.broadcast %cst_175 : f32 to vector<1x32xf32>
    %787 = arith.maximumf %785, %786 : vector<1x32xf32>
    %788 = tpu.concatenate %787, %745 in 1 : vector<1x32xf32>, vector<1x32xf32> -> vector<1x64xf32>
    %cst_176 = arith.constant dense<0.000000e+00> : vector<1x256xf32>
    %789 = tpu.matmul %788, %159, %cst_176 {dimension_numbers = #tpu.dot_dimension_numbers<[1], [0], [0], [1], [0, 0, 1, 1], [], []>} : vector<1x64xf32>, vector<64x256xf32>, vector<1x256xf32> -> vector<1x256xf32>
    %790 = arith.addf %789, %160 : vector<1x256xf32>
    %791 = vector.extract_strided_slice %790 {offsets = [0, 0], sizes = [1, 128], strides = [1, 1]} : vector<1x256xf32> to vector<1x128xf32>
    %792 = vector.extract_strided_slice %790 {offsets = [0, 128], sizes = [1, 128], strides = [1, 1]} : vector<1x256xf32> to vector<1x128xf32>
    %793 = arith.negf %791 : vector<1x128xf32>
    %794 = math.exp %793 : vector<1x128xf32>
    %cst_177 = arith.constant 1.000000e+00 : f32
    %795 = vector.broadcast %cst_177 : f32 to vector<1x128xf32>
    %796 = arith.addf %795, %794 : vector<1x128xf32>
    %797 = arith.divf %795, %796 : vector<1x128xf32>
    %798 = math.tanh %791 : vector<1x128xf32>
    %799 = vector.extract_strided_slice %797 {offsets = [0, 0], sizes = [1, 32], strides = [1, 1]} : vector<1x128xf32> to vector<1x32xf32>
    %800 = vector.extract_strided_slice %797 {offsets = [0, 32], sizes = [1, 32], strides = [1, 1]} : vector<1x128xf32> to vector<1x32xf32>
    %801 = vector.extract_strided_slice %798 {offsets = [0, 64], sizes = [1, 32], strides = [1, 1]} : vector<1x128xf32> to vector<1x32xf32>
    %802 = vector.extract_strided_slice %797 {offsets = [0, 96], sizes = [1, 32], strides = [1, 1]} : vector<1x128xf32> to vector<1x32xf32>
    %803 = arith.mulf %800, %743 : vector<1x32xf32>
    %804 = arith.mulf %799, %801 : vector<1x32xf32>
    %805 = arith.addf %803, %804 : vector<1x32xf32>
    %806 = math.tanh %805 : vector<1x32xf32>
    %807 = arith.mulf %802, %806 : vector<1x32xf32>
    %cst_178 = arith.constant dense<0xFF800000> : vector<1xf32>
    %808 = vector.multi_reduction <maximumf>, %792, %cst_178 [1] : vector<1x128xf32> to vector<1xf32>
    %809 = vector.shape_cast %808 : vector<1xf32> to vector<1x1xf32>
    %810 = vector.broadcast %809 : vector<1x1xf32> to vector<1x128xf32>
    %811 = arith.subf %792, %810 : vector<1x128xf32>
    %812 = math.exp %811 : vector<1x128xf32>
    %cst_179 = arith.constant dense<0.000000e+00> : vector<1xf32>
    %813 = vector.multi_reduction <add>, %812, %cst_179 [1] : vector<1x128xf32> to vector<1xf32>
    %814 = vector.shape_cast %813 : vector<1xf32> to vector<1x1xf32>
    %815 = math.log %814 : vector<1x1xf32>
    %816 = arith.addf %809, %815 : vector<1x1xf32>
    %817 = vector.broadcast %816 : vector<1x1xf32> to vector<1x128xf32>
    %818 = arith.subf %792, %817 : vector<1x128xf32>
    %cst_180 = arith.constant dense<0xFF800000> : vector<1xf32>
    %819 = vector.multi_reduction <maximumf>, %818, %cst_180 [1] : vector<1x128xf32> to vector<1xf32>
    %820 = vector.shape_cast %819 : vector<1xf32> to vector<1x1xf32>
    %821 = vector.broadcast %820 : vector<1x1xf32> to vector<1x128xf32>
    %822 = arith.cmpf oeq, %818, %821 : vector<1x128xf32>
    %c128_i32_181 = arith.constant 128 : i32
    %823 = vector.broadcast %c128_i32_181 : i32 to vector<1x128xi32>
    %824 = arith.select %822, %153, %823 : vector<1x128xi1>, vector<1x128xi32>
    %cst_182 = arith.constant dense<2147483647> : vector<1xi32>
    %825 = vector.multi_reduction <minsi>, %824, %cst_182 [1] : vector<1x128xi32> to vector<1xi32>
    %826 = vector.shape_cast %825 : vector<1xi32> to vector<1x1xi32>
    %c10 = arith.constant 10 : index
    %c0_183 = arith.constant 0 : index
    %827 = vector.load %arg7[%c10, %c0_183] : memref<12x128xf32, #tpu.memory_space<vmem>>, vector<1x128xf32>
    tpu.vector_store %arg7[%c10, %c0_183], %818 {strides = array<i32>} : memref<12x128xf32, #tpu.memory_space<vmem>>, vector<1x128xf32>,
    %c11_i32 = arith.constant 11 : i32
    %828 = vector.broadcast %c11_i32 : i32 to vector<1x128xi32>
    %829 = arith.cmpi eq, %153, %828 : vector<1x128xi32>
    %830 = vector.shape_cast %826 : vector<1x1xi32> to vector<1x1xi32>
    %831 = vector.broadcast %830 : vector<1x1xi32> to vector<1x128xi32>
    %832 = arith.select %829, %831, %770 : vector<1x128xi1>, vector<1x128xi32>
    %c0_i32_184 = arith.constant 0 : i32
    %833 = vector.broadcast %c0_i32_184 : i32 to vector<1x1xi32>
    %834 = arith.cmpi eq, %780, %833 : vector<1x1xi32>
    %c1_i32_185 = arith.constant 1 : i32
    %835 = vector.broadcast %c1_i32_185 : i32 to vector<1x1xi32>
    %836 = arith.addi %775, %835 : vector<1x1xi32>
    %837 = arith.select %834, %836, %775 : vector<1x1xi1>, vector<1x1xi32>
    %c1_i32_186 = arith.constant 1 : i32
    %838 = vector.broadcast %c1_i32_186 : i32 to vector<1x1xi32>
    %839 = arith.cmpi eq, %826, %838 : vector<1x1xi32>
    %840 = arith.andi %834, %839 : vector<1x1xi1>
    %c1_i32_187 = arith.constant 1 : i32
    %841 = vector.broadcast %c1_i32_187 : i32 to vector<1x1xi32>
    %842 = arith.select %840, %841, %780 : vector<1x1xi1>, vector<1x1xi32>
    %843 = vector.broadcast %826 : vector<1x1xi32> to vector<1x128xi32>
    %844 = arith.cmpi eq, %153, %843 : vector<1x128xi32>
    %845 = arith.extui %844 : vector<1x128xi1> to vector<1x128xi32>
    %846 = arith.sitofp %845 : vector<1x128xi32> to vector<1x128xf32>
    %cst_188 = arith.constant dense<0.000000e+00> : vector<1x32xf32>
    %847 = tpu.matmul %846, %158, %cst_188 {dimension_numbers = #tpu.dot_dimension_numbers<[1], [0], [0], [1], [0, 0, 1, 1], [], []>} : vector<1x128xf32>, vector<128x32xf32>, vector<1x32xf32> -> vector<1x32xf32>
    %cst_189 = arith.constant 0.000000e+00 : f32
    %848 = vector.broadcast %cst_189 : f32 to vector<1x32xf32>
    %849 = arith.maximumf %847, %848 : vector<1x32xf32>
    %850 = tpu.concatenate %849, %807 in 1 : vector<1x32xf32>, vector<1x32xf32> -> vector<1x64xf32>
    %cst_190 = arith.constant dense<0.000000e+00> : vector<1x256xf32>
    %851 = tpu.matmul %850, %159, %cst_190 {dimension_numbers = #tpu.dot_dimension_numbers<[1], [0], [0], [1], [0, 0, 1, 1], [], []>} : vector<1x64xf32>, vector<64x256xf32>, vector<1x256xf32> -> vector<1x256xf32>
    %852 = arith.addf %851, %160 : vector<1x256xf32>
    %853 = vector.extract_strided_slice %852 {offsets = [0, 128], sizes = [1, 128], strides = [1, 1]} : vector<1x256xf32> to vector<1x128xf32>
    %cst_191 = arith.constant dense<0xFF800000> : vector<1xf32>
    %854 = vector.multi_reduction <maximumf>, %853, %cst_191 [1] : vector<1x128xf32> to vector<1xf32>
    %855 = vector.shape_cast %854 : vector<1xf32> to vector<1x1xf32>
    %856 = vector.broadcast %855 : vector<1x1xf32> to vector<1x128xf32>
    %857 = arith.subf %853, %856 : vector<1x128xf32>
    %858 = math.exp %857 : vector<1x128xf32>
    %cst_192 = arith.constant dense<0.000000e+00> : vector<1xf32>
    %859 = vector.multi_reduction <add>, %858, %cst_192 [1] : vector<1x128xf32> to vector<1xf32>
    %860 = vector.shape_cast %859 : vector<1xf32> to vector<1x1xf32>
    %861 = math.log %860 : vector<1x1xf32>
    %862 = arith.addf %855, %861 : vector<1x1xf32>
    %863 = vector.broadcast %862 : vector<1x1xf32> to vector<1x128xf32>
    %864 = arith.subf %853, %863 : vector<1x128xf32>
    %cst_193 = arith.constant dense<0xFF800000> : vector<1xf32>
    %865 = vector.multi_reduction <maximumf>, %864, %cst_193 [1] : vector<1x128xf32> to vector<1xf32>
    %866 = vector.shape_cast %865 : vector<1xf32> to vector<1x1xf32>
    %867 = vector.broadcast %866 : vector<1x1xf32> to vector<1x128xf32>
    %868 = arith.cmpf oeq, %864, %867 : vector<1x128xf32>
    %c128_i32_194 = arith.constant 128 : i32
    %869 = vector.broadcast %c128_i32_194 : i32 to vector<1x128xi32>
    %870 = arith.select %868, %153, %869 : vector<1x128xi1>, vector<1x128xi32>
    %cst_195 = arith.constant dense<2147483647> : vector<1xi32>
    %871 = vector.multi_reduction <minsi>, %870, %cst_195 [1] : vector<1x128xi32> to vector<1xi32>
    %872 = vector.shape_cast %871 : vector<1xi32> to vector<1x1xi32>
    %c11 = arith.constant 11 : index
    %c0_196 = arith.constant 0 : index
    %873 = vector.load %arg7[%c11, %c0_196] : memref<12x128xf32, #tpu.memory_space<vmem>>, vector<1x128xf32>
    tpu.vector_store %arg7[%c11, %c0_196], %864 {strides = array<i32>} : memref<12x128xf32, #tpu.memory_space<vmem>>, vector<1x128xf32>,
    %c12_i32 = arith.constant 12 : i32
    %874 = vector.broadcast %c12_i32 : i32 to vector<1x128xi32>
    %875 = arith.cmpi eq, %153, %874 : vector<1x128xi32>
    %876 = vector.shape_cast %872 : vector<1x1xi32> to vector<1x1xi32>
    %877 = vector.broadcast %876 : vector<1x1xi32> to vector<1x128xi32>
    %878 = arith.select %875, %877, %832 : vector<1x128xi1>, vector<1x128xi32>
    %c0_i32_197 = arith.constant 0 : i32
    %879 = vector.broadcast %c0_i32_197 : i32 to vector<1x1xi32>
    %880 = arith.cmpi eq, %842, %879 : vector<1x1xi32>
    %c1_i32_198 = arith.constant 1 : i32
    %881 = vector.broadcast %c1_i32_198 : i32 to vector<1x1xi32>
    %882 = arith.addi %837, %881 : vector<1x1xi32>
    %883 = arith.select %880, %882, %837 : vector<1x1xi1>, vector<1x1xi32>
    %c0_199 = arith.constant 0 : index
    %c0_200 = arith.constant 0 : index
    %884 = vector.load %arg8[%c0_199, %c0_200] : memref<1x128xi32, #tpu.memory_space<vmem>>, vector<1x128xi32>
    tpu.vector_store %arg8[%c0_199, %c0_200], %878 {strides = array<i32>} : memref<1x128xi32, #tpu.memory_space<vmem>>, vector<1x128xi32>,
    %c0_201 = arith.constant 0 : index
    %c0_202 = arith.constant 0 : index
    %885 = vector.load %arg9[%c0_201, %c0_202] : memref<1x1xi32, #tpu.memory_space<vmem>>, vector<1x1xi32>
    tpu.vector_store %arg9[%c0_201, %c0_202], %883 {strides = array<i32>} : memref<1x1xi32, #tpu.memory_space<vmem>>, vector<1x1xi32>,
    return
  }
}

</mosaic_0001>

<bundles_post_ra>
// kernel: run_seq2seq.1
= control target key start
LH: loop header
LB: loop body
LE: loop exit
PB: predicated region body
PF: predicated region fallthrough
CT: control target
= control target key end

     0   :  { %15 = vsyncpa [#allocation3], 0  ;;  %v5310_v3 = vmov 0.0|0.0   ;;  %vm5311_vm0 = vmmov 0   ;;  %v5312_v11 = vmov 0.0   ;;  %s6412_s0 = inlined_call_operand.vmem [shape: f32[8,32], index: 0, kind: input, shape index: {}]   ;;  %s6413_s1 = inlined_call_operand.vmem [shape: f32[32,128], index: 1, kind: input, shape index: {}]   ;;  %s6414_s2 = inlined_call_operand.vmem [shape: f32[32,128], index: 2, kind: input, shape index: {}]   ;;  %s6415_s3 = inlined_call_operand.vmem [shape: f32[1,128], index: 3, kind: input, shape index: {}]   ;;  %s6416_s4 = inlined_call_operand.vmem [shape: f32[128,32], index: 4, kind: input, shape index: {}]   ;;  %s6417_s5 = inlined_call_operand.vmem [shape: f32[64,256], index: 5, kind: input, shape index: {}]   ;;  %s6418_s6 = inlined_call_operand.vmem [shape: f32[1,256], index: 6, kind: input, shape index: {}]   ;;  %s6419_s7 = inlined_call_operand.hbm [shape: f32[12,128], index: 7, kind: output, shape index: {0}]   ;;  %s6420_s8 = inlined_call_operand.hbm [shape: s32[1,128], index: 8, kind: output, shape index: {1}]   ;;  %s6421_s9 = inlined_call_operand.hbm [shape: s32[1,1], index: 9, kind: output, shape index: {2}]  }
   0x1   :  { %v32_v0 = vld [vmem:[%s6413_s1] sm:$0xff]  ;;  %v33_v1 = vld [vmem:[%s6413_s1 + $0x8] sm:$0xff]  ;;  %4493 = vmatprep.subr.bf16.mxu0 %v5310_v3  ;;  %4499 = vmatprep.subr.bf16.mxu1 %v5310_v3  ;;  %v34_v6 = vld [vmem:[%s6413_s1 + $0x10] sm:$0xff] }
   0x2   :  { %v117_v2 = vld [vmem:[%s6414_s2] sm:$0xff]  ;;  %v4494_v4 = vpack.c.bf16 %v33_v1, %v32_v0  ;;  %v118_v5 = vld [vmem:[%s6414_s2 + $0x8] sm:$0xff]  ;;  %v35_v7 = vld [vmem:[%s6413_s1 + $0x18] sm:$0xff]  ;;  %3982 = vmatprep.mubr.msk.f32.mxu0 %vm5311_vm0, %v5312_v11  ;;  %3993 = vmatprep.mubr.msk.f32.mxu1 %vm5311_vm0, %v5312_v11 }
   0x3   :  { %v5393_v8 = vpack.c.bf16 %v118_v5, %v117_v2  ;;  %v119_v9 = vld [vmem:[%s6414_s2 + $0x10] sm:$0xff]  ;;  %v120_v10 = vld [vmem:[%s6414_s2 + $0x18] sm:$0xff]  ;;  %v4497_v12 = vpack.c.bf16 %v35_v7, %v34_v6 }
   0x4   :  { %4495 = vmatpush3.bf16.msra.mxu0 %v4494_v4 }
   0x5   :  { %16 = vsyncpa [#allocation5], 0  ;;  %4501 = vmatpush3.bf16.msra.mxu1 %v5393_v8  ;;  %4496 = vmatprep.subr.bf16.mxu0 %v5310_v3  ;;  %v5407_v13 = vpack.c.bf16 %v120_v10, %v119_v9  ;;  %v31_v14 = vld [vmem:[%s6412_s0] sm:$0xff]  ;;  %vm43_vm1 = vcmask 261120   ;;  %s5313_s26 = smov 64   ;;  %vm1093_vm3 = vcmask 523264  }
   0x6   :  { %4502 = vmatprep.subr.bf16.mxu1 %v5310_v3  ;;  %v3660_v15 = vld [vmem:[%s6415_s3] ss:$0 sm:$0xff]  ;;  %s5314_s3 = smov 32   ;;  %vm1195_vm4 = vcmask 1040384  }
   0x8   :  { %4498 = vmatpush3.bf16.msra.mxu0 %v4497_v12 }
   0x9   :  { %4504 = vmatpush3.bf16.msra.mxu1 %v5407_v13  ;;  %4505 = vmatprep.subr.bf16.mxu0 %v5310_v3 }
   0xa   :  { %4511 = vmatprep.subr.bf16.mxu1 %v5310_v3 }
   0xb   :  { %3983 = vmatmul.mubr.msk.f32.vlgmr.msra.gmra.mrb[0].mxu0 %vm43_vm1, %v31_v14 }
   0xc   :  { %3994 = vmatmul.mubr.f32.vlgmr.msra.gmra.mrb[0].mxu1 %v5312_v11  ;;  %4507 = vmatpush3.bf16.msra.mxu0 %v5393_v8 }
   0xd   :  { %4508 = vmatprep.subr.bf16.mxu0 %v5310_v3  ;;  %4004 = vmatprep.mubr.msk.f32.mxu0 %vm5311_vm0, %v5312_v11 }
   0xe   :  { %4513 = vmatpush3.bf16.msra.mxu1 %v5393_v8  ;;  %4015 = vmatprep.mubr.msk.f32.mxu1 %vm5311_vm0, %v5312_v11 }
   0xf   :  { %4514 = vmatprep.subr.bf16.mxu1 %v5310_v3 }
  0x10   :  { %4510 = vmatpush3.bf16.msra.mxu0 %v5407_v13 }
  0x11   :  { %4517 = vmatprep.subr.bf16.mxu0 %v5310_v3 }
  0x12   :  { %4516 = vmatpush3.bf16.msra.mxu1 %v5407_v13 }
  0x13   :  { %4523 = vmatprep.subr.bf16.mxu1 %v5310_v3 }
  0xde   :  { %v113_v16 = vpop.f32.mrb[0].mxu0 }
  0xdf   :  { %v5433_v17 = vadd.f32 %v3660_v15, %v113_v16  ;;  %v3984_v18 = vpop.f32.mrb[1].mxu0  ;;  %v190_v19 = vpop.f32.mrb[0].mxu1 }
  0xe0   :  { %v3995_v20 = vpop.f32.mrb[1].mxu1 }
  0xe1   :  { %v194_v21 = vadd.f32 %v190_v19, %v5433_v17 }
  0xe3   :  { %5040 = vtanh.f32 %v194_v21  ;;  %v3662_v23 = vmul.f32 -1.442695, %v194_v21 }
  0xe5   :  { %5042 = vpow2.f32 %v3662_v23 }
  0xed   :  { %v5041_v22 = vpop.eup %5040 }
  0xee   :  { %204 = vrot.lane.b32.xlu0 %v5041_v22, %s5313_s26 }
  0xef   :  { %v5043_v24 = vpop.eup %5042 }
  0xf0   :  { %v198_v25 = vadd.f32 1.0, %v5043_v24 }
  0xf2   :  { %5044 = vrcp.f32 %v198_v25 }
  0xfc   :  { %v5045_v26 = vpop.eup %5044 }
  0xfd   :  { %v202_v29 = vmul.f32 0.0, %v5045_v26 }
 0x160   :  { %v205_v27 = vpop.permute.xlu0 %204 }
 0x161   :  { %v207_v28 = vmul.f32 %v5045_v26, %v205_v27 }
 0x163   :  { %209 = vrot.lane.b32.xlu0 %v207_v28, %s5314_s3 }
 0x1d5   :  { %v210_v30 = vpop.permute.xlu0 %209 }
 0x1d6   :  { %v212_v31 = vadd.f32 %v210_v30, %v202_v29 }
 0x1d8   :  { %5046 = vtanh.f32 %v212_v31  ;;  %v306_v47 = vrot.slane %v212_v31, 7 }
 0x1e2   :  { %v5047_v32 = vpop.eup %5046 }
 0x1e3   :  { %215 = vrot.lane.b32.xlu1 %v5047_v32, %s5313_s26 }
 0x255   :  { %v216_v33 = vpop.permute.xlu1 %215 }
 0x256   :  { %v218_v34 = vmul.f32 %v5045_v26, %v216_v33 }
 0x258   :  { %220 = vrot.lane.b32.xlu1 %v218_v34, %s5314_s3 }
 0x2ca   :  { %v221_v35 = vpop.permute.xlu1 %220 }
 0x2cb   :  { %4005 = vmatmul.mubr.msk.f32.vlgmr.msra.gmra.mrb[2].mxu0 %vm43_vm1, %v221_v35 }
 0x2cc   :  { %4519 = vmatpush3.bf16.msra.mxu0 %v5393_v8  ;;  %4026 = vmatprep.mubr.msk.f32.mxu0 %vm5311_vm0, %v5312_v11 }
 0x2cd   :  { %4520 = vmatprep.subr.bf16.mxu0 %v5310_v3 }
 0x2d0   :  { %4522 = vmatpush3.bf16.msra.mxu0 %v5407_v13 }
 0x2d1   :  { %4529 = vmatprep.subr.bf16.mxu0 %v5310_v3 }
 0x39e   :  { %v290_v36 = vpop.f32.mrb[2].mxu0 }
 0x39f   :  { %v295_v37 = vrot.slane %v290_v36, 7  ;;  %v4006_v38 = vpop.f32.mrb[3].mxu0 }
 0x3a1   :  { %v297_v39 = vadd.f32 %v295_v37, %v5433_v17 }
 0x3a3   :  { %5048 = vtanh.f32 %v297_v39  ;;  %v3664_v41 = vmul.f32 -1.442695, %v297_v39 }
 0x3a5   :  { %5050 = vpow2.f32 %v3664_v41 }
 0x3ad   :  { %v5049_v40 = vpop.eup %5048 }
 0x3ae   :  { %310 = vrot.lane.b32.xlu0 %v5049_v40, %s5313_s26 }
 0x3af   :  { %v5051_v42 = vpop.eup %5050 }
 0x3b0   :  { %v301_v43 = vadd.f32 1.0, %v5051_v42 }
 0x3b2   :  { %5052 = vrcp.f32 %v301_v43 }
 0x3bc   :  { %v5053_v44 = vpop.eup %5052 }
 0x3bd   :  { %v308_v48 = vmul.f32 %v5053_v44, %v306_v47 }
 0x420   :  { %v311_v45 = vpop.permute.xlu0 %310 }
 0x421   :  { %v313_v46 = vmul.f32 %v5053_v44, %v311_v45 }
 0x423   :  { %315 = vrot.lane.b32.xlu1 %v313_v46, %s5314_s3 }
 0x495   :  { %v316_v49 = vpop.permute.xlu1 %315 }
 0x496   :  { %v318_v50 = vadd.f32 %v316_v49, %v308_v48 }
 0x498   :  { %5054 = vtanh.f32 %v318_v50  ;;  %v413_v4 = vrot.slane %v318_v50, 7 }
 0x4a2   :  { %v5055_v51 = vpop.eup %5054 }
 0x4a3   :  { %321 = vrot.lane.b32.xlu0 %v5055_v51, %s5313_s26 }
 0x515   :  { %v322_v52 = vpop.permute.xlu0 %321 }
 0x516   :  { %v324_v53 = vmul.f32 %v5053_v44, %v322_v52 }
 0x518   :  { %v326_v54 = vrot.slane %v324_v53, 1 }
 0x51a   :  { %327 = vrot.lane.b32.xlu1 %v326_v54, %s5314_s3 }
 0x58c   :  { %v328_v55 = vpop.permute.xlu1 %327 }
 0x58d   :  { %4016 = vmatmul.mubr.msk.f32.vlgmr.msra.gmra.mrb[2].mxu1 %vm43_vm1, %v328_v55 }
 0x58e   :  { %4525 = vmatpush3.bf16.msra.mxu1 %v5393_v8  ;;  %4037 = vmatprep.mubr.msk.f32.mxu1 %vm5311_vm0, %v5312_v11 }
 0x58f   :  { %4526 = vmatprep.subr.bf16.mxu1 %v5310_v3 }
 0x592   :  { %4528 = vmatpush3.bf16.msra.mxu1 %v5407_v13 }
 0x593   :  { %4535 = vmatprep.subr.bf16.mxu1 %v5310_v3 }
 0x660   :  { %v397_v56 = vpop.f32.mrb[2].mxu1 }
 0x661   :  { %v402_v57 = vrot.slane %v397_v56, 6  ;;  %v4017_v58 = vpop.f32.mrb[3].mxu1 }
 0x663   :  { %v404_v59 = vadd.f32 %v402_v57, %v5433_v17 }
 0x665   :  { %5056 = vtanh.f32 %v404_v59  ;;  %v3666_v61 = vmul.f32 -1.442695, %v404_v59 }
 0x667   :  { %5058 = vpow2.f32 %v3666_v61 }
 0x66f   :  { %v5057_v60 = vpop.eup %5056 }
 0x670   :  { %417 = vrot.lane.b32.xlu0 %v5057_v60, %s5313_s26 }
 0x671   :  { %v5059_v62 = vpop.eup %5058 }
 0x672   :  { %v408_v63 = vadd.f32 1.0, %v5059_v62 }
 0x674   :  { %5060 = vrcp.f32 %v408_v63 }
 0x67e   :  { %v5061_v0 = vpop.eup %5060 }
 0x67f   :  { %v415_v5 = vmul.f32 %v5061_v0, %v413_v4 }
 0x6e2   :  { %v418_v1 = vpop.permute.xlu0 %417 }
 0x6e3   :  { %v420_v2 = vmul.f32 %v5061_v0, %v418_v1 }
 0x6e5   :  { %422 = vrot.lane.b32.xlu1 %v420_v2, %s5314_s3 }
 0x757   :  { %v423_v6 = vpop.permute.xlu1 %422 }
 0x758   :  { %v425_v7 = vadd.f32 %v423_v6, %v415_v5 }
 0x75a   :  { %5062 = vtanh.f32 %v425_v7  ;;  %v520_v28 = vrot.slane %v425_v7, 7 }
 0x764   :  { %v5063_v9 = vpop.eup %5062 }
 0x765   :  { %428 = vrot.lane.b32.xlu0 %v5063_v9, %s5313_s26 }
 0x7d7   :  { %v429_v10 = vpop.permute.xlu0 %428 }
 0x7d8   :  { %v431_v12 = vmul.f32 %v5061_v0, %v429_v10 }
 0x7da   :  { %v433_v14 = vrot.slane %v431_v12, 2 }
 0x7dc   :  { %434 = vrot.lane.b32.xlu1 %v433_v14, %s5314_s3 }
 0x84e   :  { %v435_v15 = vpop.permute.xlu1 %434 }
 0x84f   :  { %4027 = vmatmul.mubr.msk.f32.vlgmr.msra.gmra.mrb[4].mxu0 %vm43_vm1, %v435_v15 }
 0x850   :  { %4531 = vmatpush3.bf16.msra.mxu0 %v5393_v8  ;;  %4048 = vmatprep.mubr.msk.f32.mxu0 %vm5311_vm0, %v5312_v11 }
 0x851   :  { %4532 = vmatprep.subr.bf16.mxu0 %v5310_v3 }
 0x854   :  { %4534 = vmatpush3.bf16.msra.mxu0 %v5407_v13 }
 0x855   :  { %4541 = vmatprep.subr.bf16.mxu0 %v5310_v3 }
 0x922   :  { %v504_v16 = vpop.f32.mrb[4].mxu0 }
 0x923   :  { %v509_v18 = vrot.slane %v504_v16, 5  ;;  %v4028_v19 = vpop.f32.mrb[5].mxu0 }
 0x925   :  { %v511_v20 = vadd.f32 %v509_v18, %v5433_v17 }
 0x927   :  { %5064 = vtanh.f32 %v511_v20  ;;  %v3668_v22 = vmul.f32 -1.442695, %v511_v20 }
 0x929   :  { %5066 = vpow2.f32 %v3668_v22 }
 0x931   :  { %v5065_v21 = vpop.eup %5064 }
 0x932   :  { %524 = vrot.lane.b32.xlu0 %v5065_v21, %s5313_s26 }
 0x933   :  { %v5067_v23 = vpop.eup %5066 }
 0x934   :  { %v515_v24 = vadd.f32 1.0, %v5067_v23 }
 0x936   :  { %5068 = vrcp.f32 %v515_v24 }
 0x940   :  { %v5069_v25 = vpop.eup %5068 }
 0x941   :  { %v522_v29 = vmul.f32 %v5069_v25, %v520_v28 }
 0x9a4   :  { %v525_v26 = vpop.permute.xlu0 %524 }
 0x9a5   :  { %v527_v27 = vmul.f32 %v5069_v25, %v525_v26 }
 0x9a7   :  { %529 = vrot.lane.b32.xlu1 %v527_v27, %s5314_s3 }
 0xa19   :  { %v530_v30 = vpop.permute.xlu1 %529 }
 0xa1a   :  { %v532_v31 = vadd.f32 %v530_v30, %v522_v29 }
 0xa1c   :  { %5070 = vtanh.f32 %v532_v31  ;;  %v627_v48 = vrot.slane %v532_v31, 7 }
 0xa26   :  { %v5071_v32 = vpop.eup %5070 }
 0xa27   :  { %535 = vrot.lane.b32.xlu0 %v5071_v32, %s5313_s26 }
 0xa99   :  { %v536_v33 = vpop.permute.xlu0 %535 }
 0xa9a   :  { %v538_v34 = vmul.f32 %v5069_v25, %v536_v33 }
 0xa9c   :  { %v540_v35 = vrot.slane %v538_v34, 3 }
 0xa9e   :  { %541 = vrot.lane.b32.xlu1 %v540_v35, %s5314_s3 }
 0xb10   :  { %v542_v36 = vpop.permute.xlu1 %541 }
 0xb11   :  { %4038 = vmatmul.mubr.msk.f32.vlgmr.msra.gmra.mrb[4].mxu1 %vm43_vm1, %v542_v36 }
 0xb12   :  { %4537 = vmatpush3.bf16.msra.mxu1 %v5393_v8  ;;  %4059 = vmatprep.mubr.msk.f32.mxu1 %vm5311_vm0, %v5312_v11 }
 0xb13   :  { %4538 = vmatprep.subr.bf16.mxu1 %v5310_v3 }
 0xb16   :  { %4540 = vmatpush3.bf16.msra.mxu1 %v5407_v13 }
 0xb17   :  { %4547 = vmatprep.subr.bf16.mxu1 %v5310_v3 }
 0xbe4   :  { %v611_v37 = vpop.f32.mrb[4].mxu1 }
 0xbe5   :  { %v616_v38 = vrot.slane %v611_v37, 4  ;;  %v4039_v39 = vpop.f32.mrb[5].mxu1 }
 0xbe7   :  { %v618_v40 = vadd.f32 %v616_v38, %v5433_v17 }
 0xbe9   :  { %5072 = vtanh.f32 %v618_v40  ;;  %v3670_v42 = vmul.f32 -1.442695, %v618_v40 }
 0xbeb   :  { %5074 = vpow2.f32 %v3670_v42 }
 0xbf3   :  { %v5073_v41 = vpop.eup %5072 }
 0xbf4   :  { %631 = vrot.lane.b32.xlu0 %v5073_v41, %s5313_s26 }
 0xbf5   :  { %v5075_v43 = vpop.eup %5074 }
 0xbf6   :  { %v622_v44 = vadd.f32 1.0, %v5075_v43 }
 0xbf8   :  { %5076 = vrcp.f32 %v622_v44  ;;  %v969_v44 = vld [vmem:[%s6416_s4] sm:$0xff] }
 0xc02   :  { %v5077_v45 = vpop.eup %5076 }
 0xc03   :  { %v629_v49 = vmul.f32 %v5077_v45, %v627_v48  ;;  %v973_v48 = vld [vmem:[%s6416_s4 + $0x20] sm:$0xff] }
 0xc66   :  { %v632_v46 = vpop.permute.xlu0 %631 }
 0xc67   :  { %v634_v47 = vmul.f32 %v5077_v45, %v632_v46 }
 0xc69   :  { %636 = vrot.lane.b32.xlu1 %v634_v47, %s5314_s3  ;;  %v972_v47 = vld [vmem:[%s6416_s4 + $0x18] sm:$0xff] }
 0xcdb   :  { %v637_v50 = vpop.permute.xlu1 %636 }
 0xcdc   :  { %v639_v51 = vadd.f32 %v637_v50, %v629_v49  ;;  %v974_v50 = vld [vmem:[%s6416_s4 + $0x28] sm:$0xff] }
 0xcde   :  { %5078 = vtanh.f32 %v639_v51 }
 0xce8   :  { %v5079_v52 = vpop.eup %5078 }
 0xce9   :  { %642 = vrot.lane.b32.xlu0 %v5079_v52, %s5313_s26  ;;  %v975_v52 = vld [vmem:[%s6416_s4 + $0x30] sm:$0xff] }
 0xd5b   :  { %v643_v53 = vpop.permute.xlu0 %642 }
 0xd5c   :  { %v645_v54 = vmul.f32 %v5077_v45, %v643_v53  ;;  %v970_v45 = vld [vmem:[%s6416_s4 + $0x8] sm:$0xff]  ;;  %v976_v53 = vld [vmem:[%s6416_s4 + $0x38] sm:$0xff] }
 0xd5d   :  { %v5520_v46 = vpack.c.bf16 %v970_v45, %v969_v44  ;;  %v1001_v44 = vld [vmem:[%s6418_s6] sm:$0x3]  ;;  %s5318_s6 = smov [#allocation2]  }
 0xd5e   :  { %v647_v55 = vrot.slane %v645_v54, 4  ;;  %v5549_v54 = vpack.c.bf16 %v976_v53, %v975_v52 }
 0xd60   :  { %648 = vrot.lane.b32.xlu1 %v647_v55, %s5314_s3 }
 0xdd2   :  { %v649_v56 = vpop.permute.xlu1 %648 }
 0xdd3   :  { %4049 = vmatmul.mubr.msk.f32.vlgmr.msra.gmra.mrb[6].mxu0 %vm43_vm1, %v649_v56 }
 0xdd4   :  { %4543 = vmatpush3.bf16.msra.mxu0 %v5393_v8  ;;  %4070 = vmatprep.mubr.msk.f32.mxu0 %vm5311_vm0, %v5312_v11 }
 0xdd5   :  { %4544 = vmatprep.subr.bf16.mxu0 %v5310_v3 }
 0xdd8   :  { %4546 = vmatpush3.bf16.msra.mxu0 %v5407_v13  ;;  %v734_v13 = vrot.slane %v639_v51, 7  ;;  %v5539_v51 = vpack.c.bf16 %v974_v50, %v973_v48 }
 0xea6   :  { %v718_v57 = vpop.f32.mrb[6].mxu0 }
 0xea7   :  { %v723_v58 = vrot.slane %v718_v57, 3  ;;  %v4050_v59 = vpop.f32.mrb[7].mxu0 }
 0xea8   :  { %v978_v59 = vld [vmem:[%s6416_s4 + $0x48] sm:$0xff] }
 0xea9   :  { %v725_v60 = vadd.f32 %v723_v58, %v5433_v17  ;;  %v977_v58 = vld [vmem:[%s6416_s4 + $0x40] sm:$0xff] }
 0xeab   :  { %5080 = vtanh.f32 %v725_v60  ;;  %v3672_v62 = vmul.f32 -1.442695, %v725_v60  ;;  %v5564_v60 = vpack.c.bf16 %v978_v59, %v977_v58 }
 0xead   :  { %5082 = vpow2.f32 %v3672_v62  ;;  %v980_v62 = vld [vmem:[%s6416_s4 + $0x58] sm:$0xff] }
 0xeb5   :  { %v5081_v61 = vpop.eup %5080 }
 0xeb6   :  { %738 = vrot.lane.b32.xlu0 %v5081_v61, %s5313_s26  ;;  %v979_v61 = vld [vmem:[%s6416_s4 + $0x50] sm:$0xff] }
 0xeb7   :  { %v5083_v63 = vpop.eup %5082 }
 0xeb8   :  { %v729_v8 = vadd.f32 1.0, %v5083_v63  ;;  %v5573_v63 = vpack.c.bf16 %v980_v62, %v979_v61 }
 0xeba   :  { %5084 = vrcp.f32 %v729_v8  ;;  %v981_v8 = vld [vmem:[%s6416_s4 + $0x60] sm:$0xff] }
 0xec4   :  { %v5085_v0 = vpop.eup %5084 }
 0xec5   :  { %v736_v4 = vmul.f32 %v5085_v0, %v734_v13  ;;  %v983_v13 = vld [vmem:[%s6416_s4 + $0x70] sm:$0xff] }
 0xf28   :  { %v739_v1 = vpop.permute.xlu0 %738 }
 0xf29   :  { %v741_v2 = vmul.f32 %v5085_v0, %v739_v1 }
 0xf2b   :  { %743 = vrot.lane.b32.xlu1 %v741_v2, %s5314_s3  ;;  %v967_v2 = vlaneseq }
 0xf9d   :  { %v744_v5 = vpop.permute.xlu1 %743 }
 0xf9e   :  { %v746_v6 = vadd.f32 %v744_v5, %v736_v4  ;;  %v984_v4 = vld [vmem:[%s6416_s4 + $0x78] sm:$0xff] }
 0xf9f   :  { %v5593_v5 = vpack.c.bf16 %v984_v4, %v983_v13 }
 0xfa0   :  { %5086 = vtanh.f32 %v746_v6  ;;  %v841_v27 = vrot.slane %v746_v6, 7  ;;  %v5596_v6 = vand.u32 127, %v967_v2 }
 0xfa2   :  { %vm1002_vm2 = vcmp.eq.s32.totalorder %v5596_v6, 0  ;;  %vm1230_vm11 = vcmp.eq.s32.totalorder %v5596_v6, 1  ;;  %vm1445_vm13 = vcmp.eq.s32.totalorder %v5596_v6, 2 }
 0xfaa   :  { %v5087_v7 = vpop.eup %5086 }
 0xfab   :  { %749 = vrot.lane.b32.xlu0 %v5087_v7, %s5313_s26  ;;  %v5315_v7 = vmov 1.0  }
0x101d   :  { %v750_v9 = vpop.permute.xlu0 %749 }
0x101e   :  { %v752_v10 = vmul.f32 %v5085_v0, %v750_v9  ;;  %v982_v0 = vld [vmem:[%s6416_s4 + $0x68] sm:$0xff] }
0x101f   :  { %v5583_v1 = vpack.c.bf16 %v982_v0, %v981_v8 }
0x1020   :  { %v754_v12 = vrot.slane %v752_v10, 5 }
0x1022   :  { %755 = vrot.lane.b32.xlu1 %v754_v12, %s5314_s3 }
0x1094   :  { %v756_v14 = vpop.permute.xlu1 %755 }
0x1095   :  { %4060 = vmatmul.mubr.msk.f32.vlgmr.msra.gmra.mrb[6].mxu1 %vm43_vm1, %v756_v14 }
0x1096   :  { %4105 = vmatprep.mubr.msk.f32.mxu1 %vm5311_vm0, %v5312_v11  ;;  %4549 = vmatpush3.bf16.msra.mxu1 %v5520_v46 }
0x1097   :  { %4550 = vmatprep.subr.bf16.mxu1 %v5310_v3 }
0x1168   :  { %v825_v15 = vpop.f32.mrb[6].mxu1 }
0x1169   :  { %v830_v16 = vrot.slane %v825_v15, 2  ;;  %v4061_v18 = vpop.f32.mrb[7].mxu1  ;;  %v986_v15 = vld [vmem:[%s6417_s5 + $0x8] sm:$0xff] }
0x116a   :  { %v985_v18 = vld [vmem:[%s6417_s5] sm:$0xff] }
0x116b   :  { %v832_v19 = vadd.f32 %v830_v16, %v5433_v17  ;;  %v988_v16 = vld [vmem:[%s6417_s5 + $0x18] sm:$0xff] }
0x116d   :  { %5088 = vtanh.f32 %v832_v19  ;;  %v3674_v21 = vmul.f32 -1.442695, %v832_v19  ;;  %v5617_v19 = vpack.c.bf16 %v988_v16, %v986_v15 }
0x116f   :  { %5090 = vpow2.f32 %v3674_v21  ;;  %v990_v21 = vld [vmem:[%s6417_s5 + $0x28] sm:$0xff]  ;;  %4572 = vmatprep.subr.bf16.mxu0 %v5617_v19 }
0x1177   :  { %v5089_v20 = vpop.eup %5088 }
0x1178   :  { %845 = vrot.lane.b32.xlu0 %v5089_v20, %s5313_s26  ;;  %v987_v20 = vld [vmem:[%s6417_s5 + $0x10] sm:$0xff] }
0x1179   :  { %v5091_v22 = vpop.eup %5090 }
0x117a   :  { %v836_v23 = vadd.f32 1.0, %v5091_v22  ;;  %v992_v22 = vld [vmem:[%s6417_s5 + $0x38] sm:$0xff] }
0x117c   :  { %5092 = vrcp.f32 %v836_v23  ;;  %v5628_v23 = vpack.c.bf16 %v987_v20, %v985_v18 }
0x1186   :  { %v5093_v24 = vpop.eup %5092 }
0x1187   :  { %v843_v28 = vmul.f32 %v5093_v24, %v841_v27  ;;  %v994_v27 = vld [vmem:[%s6417_s5 + $0x48] sm:$0xff] }
0x11ea   :  { %v846_v25 = vpop.permute.xlu0 %845 }
0x11eb   :  { %v848_v26 = vmul.f32 %v5093_v24, %v846_v25  ;;  %v989_v25 = vld [vmem:[%s6417_s5 + $0x20] sm:$0xff] }
0x11ed   :  { %850 = vrot.lane.b32.xlu1 %v848_v26, %s5314_s3  ;;  %v991_v26 = vld [vmem:[%s6417_s5 + $0x30] sm:$0xff] }
0x125f   :  { %v851_v29 = vpop.permute.xlu1 %850 }
0x1260   :  { %v5505_v30 = vadd.f32 %v851_v29, %v843_v28  ;;  %v996_v28 = vld [vmem:[%s6417_s5 + $0x58] sm:$0xff]  ;;  %v5647_v29 = vpack.c.bf16 %v991_v26, %v989_v25 }
0x1262   :  { %5094 = vtanh.f32 %v5505_v30  ;;  %v948_v9 = vrot.slane %v5505_v30, 7  ;;  %v5651_v30 = vpack.c.bf16 %v996_v28, %v994_v27 }
0x126c   :  { %v5095_v31 = vpop.eup %5094 }
0x126d   :  { %856 = vrot.lane.b32.xlu0 %v5095_v31, %s5313_s26  ;;  %v993_v31 = vld [vmem:[%s6417_s5 + $0x40] sm:$0xff] }
0x12df   :  { %v857_v32 = vpop.permute.xlu0 %856 }
0x12e0   :  { %v859_v33 = vmul.f32 %v5093_v24, %v857_v32  ;;  %v5630_v24 = vpack.c.bf16 %v992_v22, %v990_v21  ;;  %v995_v32 = vld [vmem:[%s6417_s5 + $0x50] sm:$0xff] }
0x12e2   :  { %v861_v34 = vrot.slane %v859_v33, 6  ;;  %v998_v33 = vld [vmem:[%s6417_s5 + $0x68] sm:$0xff] }
0x12e4   :  { %862 = vrot.lane.b32.xlu1 %v861_v34, %s5314_s3  ;;  %v1000_v34 = vld [vmem:[%s6417_s5 + $0x78] sm:$0xff] }
0x1356   :  { %v863_v35 = vpop.permute.xlu1 %862 }
0x1357   :  { %4071 = vmatmul.mubr.msk.f32.vlgmr.msra.gmra.mrb[8].mxu0 %vm43_vm1, %v863_v35 }
0x1358   :  { %1161 = vmatprep.mubr.f32.mxu0 %v5312_v11  ;;  %4574 = vmatpush1.bf16.msra.mxu0 %v5628_v23 }
0x1359   :  { %4576 = vmatprep.subr.bf16.mxu0 %v5630_v24 }
0x135c   :  { %4578 = vmatpush1.bf16.msra.mxu0 %v5647_v29 }
0x135d   :  { %4580 = vmatprep.subr.bf16.mxu0 %v5651_v30 }
0x142a   :  { %v932_v36 = vpop.f32.mrb[8].mxu0 }
0x142b   :  { %v937_v37 = vrot.slane %v932_v36, 1  ;;  %v4072_v38 = vpop.f32.mrb[9].mxu0  ;;  %v5667_v36 = vpack.c.bf16 %v995_v32, %v993_v31 }
0x142c   :  { %v997_v38 = vld [vmem:[%s6417_s5 + $0x60] sm:$0xff] }
0x142d   :  { %v939_v39 = vadd.f32 %v937_v37, %v5433_v17  ;;  %v971_v17 = vld [vmem:[%s6416_s4 + $0x10] sm:$0xff]  ;;  %v5672_v37 = vpack.c.bf16 %v1000_v34, %v998_v33  ;;  %4582 = vmatpush1.bf16.msra.mxu0 %v5667_v36 }
0x142e   :  { %v5533_v49 = vpack.c.bf16 %v972_v47, %v971_v17 }
0x142f   :  { %5096 = vtanh.f32 %v939_v39  ;;  %v3676_v41 = vmul.f32 -1.442695, %v939_v39  ;;  %v999_v39 = vld [vmem:[%s6417_s5 + $0x70] sm:$0xff]  ;;  %4584 = vmatprep.subr.bf16.mxu0 %v5672_v37 }
0x1430   :  { %4552 = vmatpush3.bf16.msra.mxu1 %v5533_v49 }
0x1431   :  { %5098 = vpow2.f32 %v3676_v41  ;;  %4553 = vmatprep.subr.bf16.mxu1 %v5310_v3 }
0x1434   :  { %4555 = vmatpush3.bf16.msra.mxu1 %v5539_v51 }
0x1435   :  { %4556 = vmatprep.subr.bf16.mxu1 %v5310_v3 }
0x1438   :  { %4558 = vmatpush3.bf16.msra.mxu1 %v5549_v54 }
0x1439   :  { %v5097_v40 = vpop.eup %5096  ;;  %4559 = vmatprep.subr.bf16.mxu1 %v5310_v3 }
0x143a   :  { %952 = vrot.lane.b32.xlu0 %v5097_v40, %s5313_s26  ;;  %v5682_v40 = vpack.c.bf16 %v999_v39, %v997_v38 }
0x143b   :  { %v5099_v42 = vpop.eup %5098 }
0x143c   :  { %v943_v43 = vadd.f32 1.0, %v5099_v42  ;;  %4561 = vmatpush3.bf16.msra.mxu1 %v5564_v60  ;;  %4586 = vmatpush1.bf16.msra.mxu0 %v5682_v40 }
0x143d   :  { %4562 = vmatprep.subr.bf16.mxu1 %v5310_v3  ;;  %4587 = vmatprep.subr.bf16.mxu0 %v5310_v3 }
0x143e   :  { %5100 = vrcp.f32 %v943_v43  ;;  %v1084_v43 = vshrl.u32 %v967_v2, 7 }
0x1440   :  { %4564 = vmatpush3.bf16.msra.mxu1 %v5573_v63  ;;  %v1085_v45 = vsub.s32 0, %v1084_v43 }
0x1441   :  { %4565 = vmatprep.subr.bf16.mxu1 %v5310_v3 }
0x1442   :  { %v5695_v17 = vrot.slane %v1001_v44, %v1085_v45 }
0x1444   :  { %4567 = vmatpush3.bf16.msra.mxu1 %v5583_v1 }
0x1445   :  { %4568 = vmatprep.subr.bf16.mxu1 %v5310_v3 }
0x1448   :  { %v5551_v55 = vpop.eup %5100  ;;  %4570 = vmatpush3.bf16.msra.mxu1 %v5593_v5 }
0x1449   :  { %v950_v10 = vmul.f32 %v5551_v55, %v948_v9  ;;  %4612 = vmatprep.subr.bf16.mxu1 %v5617_v19 }
0x144b   :  { %4106 = vmatmul.mubr.msk.f32.vlgmr.msra.gmra.mrb[8].mxu1 %vm1002_vm2, %v5315_v7 }
0x144c   :  { %1380 = vmatprep.mubr.f32.mxu1 %v5312_v11  ;;  %4614 = vmatpush1.bf16.msra.mxu1 %v5628_v23 }
0x144d   :  { %4616 = vmatprep.subr.bf16.mxu1 %v5630_v24 }
0x1450   :  { %4618 = vmatpush1.bf16.msra.mxu1 %v5647_v29 }
0x1451   :  { %4620 = vmatprep.subr.bf16.mxu1 %v5651_v30 }
0x1454   :  { %4622 = vmatpush1.bf16.msra.mxu1 %v5667_v36 }
0x1455   :  { %4624 = vmatprep.subr.bf16.mxu1 %v5672_v37 }
0x1458   :  { %4626 = vmatpush1.bf16.msra.mxu1 %v5682_v40 }
0x1459   :  { %4627 = vmatprep.subr.bf16.mxu1 %v5310_v3 }
0x14ac   :  { %v953_v56 = vpop.permute.xlu0 %952 }
0x14ad   :  { %v955_v57 = vmul.f32 %v5551_v55, %v953_v56 }
0x14af   :  { %957 = vrot.lane.b32.xlu1 %v955_v57, %s5314_s3 }
0x151e   :  { %v1071_v41 = vpop.f32.mrb[8].mxu1 }
0x151f   :  { %v4107_v42 = vpop.f32.mrb[9].mxu1  ;;  %v1075_v52 = vmax.f32 %v1071_v41, 0.0 }
0x1521   :  { %v958_v12 = vpop.permute.xlu1 %957 }
0x1522   :  { %v5605_v14 = vadd.f32 %v958_v12, %v950_v10 }
0x1524   :  { %5102 = vtanh.f32 %v5605_v14 }
0x152e   :  { %v5103_v35 = vpop.eup %5102 }
0x152f   :  { %963 = vrot.lane.b32.xlu0 %v5103_v35, %s5313_s26 }
0x15a1   :  { %v964_v47 = vpop.permute.xlu0 %963 }
0x15a2   :  { %v966_v48 = vmul.f32 %v5551_v55, %v964_v47  ;;  %v1089_v55 = vsub.s32 1, %v1084_v43  ;;  %v1176_v47 = vrot.slane %v5605_v14, 7 }
0x15a4   :  { %v1077_v50 = vrot.slane %v966_v48, 7  ;;  %v5719_v57 = vrot.slane %v1001_v44, %v1089_v55 }
0x15a6   :  { %1078 = vrot.lane.b32.xlu1 %v1077_v50, %s5313_s26 }
0x1618   :  { %v1079_v53 = vpop.permute.xlu1 %1078 }
0x1619   :  { %v1081_v56 = vsel %vm43_vm1, %v1075_v52, %v1079_v53 }
0x161a   :  { %3679 = vmatmul.mubr.msk.f32.vlgmr.msra.gmra.mrb[10].mxu0 %vm1093_vm3, %v1081_v56 }
0x161b   :  { %4589 = vmatpush3.bf16.msra.mxu0 %v5520_v46  ;;  %4140 = vmatprep.mubr.msk.f32.mxu0 %vm5311_vm0, %v5312_v11 }
0x161c   :  { %4590 = vmatprep.subr.bf16.mxu0 %v5310_v3 }
0x161f   :  { %4592 = vmatpush3.bf16.msra.mxu0 %v5533_v49 }
0x1620   :  { %4593 = vmatprep.subr.bf16.mxu0 %v5310_v3 }
0x1623   :  { %4595 = vmatpush3.bf16.msra.mxu0 %v5539_v51 }
0x1624   :  { %4596 = vmatprep.subr.bf16.mxu0 %v5310_v3 }
0x1627   :  { %4598 = vmatpush3.bf16.msra.mxu0 %v5549_v54 }
0x1628   :  { %4599 = vmatprep.subr.bf16.mxu0 %v5310_v3 }
0x162b   :  { %4601 = vmatpush3.bf16.msra.mxu0 %v5564_v60 }
0x162c   :  { %4602 = vmatprep.subr.bf16.mxu0 %v5310_v3 }
0x162f   :  { %4604 = vmatpush3.bf16.msra.mxu0 %v5573_v63 }
0x1630   :  { %4605 = vmatprep.subr.bf16.mxu0 %v5310_v3 }
0x1633   :  { %4607 = vmatpush3.bf16.msra.mxu0 %v5583_v1 }
0x1634   :  { %4608 = vmatprep.subr.bf16.mxu0 %v5310_v3 }
0x1637   :  { %4610 = vmatpush3.bf16.msra.mxu0 %v5593_v5 }
0x1638   :  { %4652 = vmatprep.subr.bf16.mxu0 %v5617_v19 }
0x16ed   :  { %v1163_v58 = vpop.f32.mrb[10].mxu0 }
0x16ee   :  { %v1165_v59 = vpop.f32.mrb[11].mxu0  ;;  %v1164_v27 = vadd.f32 %v1163_v58, %v5695_v17 }
0x16ef   :  { %v1166_v61 = vadd.f32 %v1165_v59, %v5719_v57 }
0x16f0   :  { %v3680_v31 = vmul.f32 -1.442695, %v1164_v27 }
0x16f1   :  { %v1196_v62 = vsel %vm1195_vm4, %v1166_v61, -inf }
0x16f2   :  { %1197 = vmax.xlane.f32.xlu0 %v1196_v62 }
0x177f   :  { %v1198_v8 = vpop.xlane.xlu0 %1197 }
0x1780   :  { %v1199_v0 = vsub.f32 %v1166_v61, %v1198_v8 }
0x1782   :  { %v1200_v2 = vmul.f32 1.442695, %v1199_v0 }
0x1784   :  { %5104 = vpow2.f32 %v1200_v2 }
0x178e   :  { %v5105_v13 = vpop.eup %5104 }
0x178f   :  { %v1202_v4 = vsel %vm1195_vm4, %v5105_v13, 0.0 }
0x1790   :  { %1203 = vadd.xlane.f32.xlu1 %v1202_v4 }
0x181d   :  { %v1204_v9 = vpop.xlane.xlu1 %1203 }
0x181e   :  { %5106 = vlog2.f32 %v1204_v9 }
0x181f   :  { %5108 = vtanh.f32 %v1164_v27 }
0x1820   :  { %5110 = vpow2.f32 %v3680_v31 }
0x1828   :  { %v5107_v10 = vpop.eup %5106 }
0x1829   :  { %v1206_v12 = vmul.f32 0.6931472, %v5107_v10  ;;  %v5109_v28 = vpop.eup %5108 }
0x182a   :  { %v5111_v33 = vpop.eup %5110 }
0x182b   :  { %v1207_v15 = vadd.f32 %v1206_v12, %v1198_v8  ;;  %v1171_v39 = vadd.f32 1.0, %v5111_v33 }
0x182d   :  { %v1208_v16 = vsub.f32 %v1166_v61, %v1207_v15  ;;  %5112 = vrcp.f32 %v1171_v39 }
0x182f   :  { %v1209_v18 = vsel %vm1195_vm4, %v1208_v16, -inf  ;;  %1229 = vst [vmem:[#allocation2] sm:$0x1] %v1208_v16 }
0x1830   :  { %1210 = vmax.xlane.f32.xlu0 %v1209_v18 }
0x1837   :  { %v5113_v42 = vpop.eup %5112 }
0x1838   :  { %v1178_v53 = vmul.f32 %v5113_v42, %v1176_v47 }
0x18bd   :  { %v1211_v20 = vpop.xlane.xlu0 %1210 }
0x18be   :  { %vm1212_vm5 = vcmp.eq.f32.partialorder %v1208_v16, %v1211_v20 }
0x18bf   :  { %v1213_v21 = vsel %vm1212_vm5, %v5596_v6, 128 }
0x18c0   :  { %v1214_v22 = vsel %vm1195_vm4, %v1213_v21, 2147483647 }
0x18c1   :  { %v1216_v25 = vshra.s32 %v1214_v22, 16  ;;  %v1215_v32 = vand.u32 65535, %v1214_v22 }
0x18c3   :  { %v1218_v26 = vcvt.s32.f32 %v1216_v25  ;;  %v1217_v35 = vcvt.s32.f32 %v1215_v32 }
0x18c5   :  { %1219 = vmin.xlane.f32.xlu0 %v1218_v26 }
0x18db   :  { %1180 = vrot.lane.b32.xlu0 %v5109_v28, %s5313_s26 }
0x1952   :  { %v1220_v34 = vpop.xlane.xlu0 %1219 }
0x1953   :  { %vm1221_vm6 = vcmp.eq.f32.partialorder %v1218_v26, %v1220_v34  ;;  %v1226_v44 = vcvt.f32.s32 %v1220_v34 }
0x1954   :  { %v1222_v38 = vsel %vm1221_vm6, %v1217_v35, inf }
0x1955   :  { %1223 = vmin.xlane.f32.xlu1 %v1222_v38  ;;  %v1227_v48 = vshll.u32 %v1226_v44, 16 }
0x1956   :  { %v1181_v41 = vpop.permute.xlu0 %1180 }
0x1957   :  { %v1183_v43 = vmul.f32 %v5113_v42, %v1181_v41 }
0x1966   :  { %1185 = vrot.lane.b32.xlu1 %v1183_v43, %s5314_s3 }
0x19e2   :  { %v1224_v45 = vpop.xlane.xlu1 %1223 }
0x19e3   :  { %v1225_v50 = vcvt.f32.s32 %v1224_v45 }
0x19e5   :  { %v5731_v52 = vadd.s32 %v1227_v48, %v1225_v50 }
0x19e6   :  { %v1186_v56 = vpop.permute.xlu1 %1185 }
0x19e7   :  { %v5733_v55 = vadd.f32 %v1186_v56, %v1178_v53  ;;  %vm1234_vm7 = vcmp.eq.s32.totalorder %v5596_v6, %v5731_v52  ;;  %vm1232_vm10 = vcmp.eq.s32.totalorder %v5731_v52, 1 }
0x19e8   :  { %4141 = vmatmul.mubr.msk.f32.vlgmr.msra.gmra.mrb[12].mxu0 %vm1234_vm7, %v5315_v7  ;;  %vm5783_vm12 = vmneg %vm1232_vm10 }
0x19e9   :  { %5114 = vtanh.f32 %v5733_v55  ;;  %4654 = vmatpush1.bf16.msra.mxu0 %v5628_v23  ;;  %1598 = vmatprep.mubr.f32.mxu0 %v5312_v11 }
0x19ea   :  { %4656 = vmatprep.subr.bf16.mxu0 %v5630_v24 }
0x19ed   :  { %4658 = vmatpush1.bf16.msra.mxu0 %v5647_v29 }
0x19ee   :  { %4660 = vmatprep.subr.bf16.mxu0 %v5651_v30 }
0x19f1   :  { %4662 = vmatpush1.bf16.msra.mxu0 %v5667_v36 }
0x19f2   :  { %4664 = vmatprep.subr.bf16.mxu0 %v5672_v37 }
0x19f3   :  { %v5115_v14 = vpop.eup %5114 }
0x19f4   :  { %1191 = vrot.lane.b32.xlu1 %v5115_v14, %s5313_s26 }
0x19f5   :  { %4666 = vmatpush1.bf16.msra.mxu0 %v5682_v40 }
0x19f6   :  { %4667 = vmatprep.subr.bf16.mxu0 %v5310_v3 }
0x1a66   :  { %v1192_v58 = vpop.permute.xlu1 %1191 }
0x1a67   :  { %v1194_v59 = vmul.f32 %v5113_v42, %v1192_v58 }
0x1a69   :  { %1309 = vrot.lane.b32.xlu0 %v1194_v59, %s5313_s26 }
0x1abb   :  { %v1303_v61 = vpop.f32.mrb[12].mxu0 }
0x1abc   :  { %v4142_v62 = vpop.f32.mrb[13].mxu0  ;;  %v1307_v8 = vmax.f32 %v1303_v61, 0.0 }
0x1adb   :  { %v1310_v0 = vpop.permute.xlu0 %1309 }
0x1adc   :  { %v1312_v2 = vsel %vm43_vm1, %v1307_v8, %v1310_v0 }
0x1add   :  { %3683 = vmatmul.mubr.msk.f32.vlgmr.msra.gmra.mrb[10].mxu1 %vm1093_vm3, %v1312_v2  ;;  %v1231_v2 = vsel %vm1230_vm11, %v5731_v52, 0 }
0x1ade   :  { %4629 = vmatpush3.bf16.msra.mxu1 %v5520_v46  ;;  %4175 = vmatprep.mubr.msk.f32.mxu1 %vm5311_vm0, %v5312_v11 }
0x1adf   :  { %4630 = vmatprep.subr.bf16.mxu1 %v5310_v3 }
0x1ae2   :  { %4632 = vmatpush3.bf16.msra.mxu1 %v5533_v49 }
0x1ae3   :  { %4633 = vmatprep.subr.bf16.mxu1 %v5310_v3 }
0x1ae6   :  { %4635 = vmatpush3.bf16.msra.mxu1 %v5539_v51 }
0x1ae7   :  { %4636 = vmatprep.subr.bf16.mxu1 %v5310_v3 }
0x1aea   :  { %4638 = vmatpush3.bf16.msra.mxu1 %v5549_v54 }
0x1aeb   :  { %4639 = vmatprep.subr.bf16.mxu1 %v5310_v3 }
0x1aee   :  { %4641 = vmatpush3.bf16.msra.mxu1 %v5564_v60 }
0x1aef   :  { %4642 = vmatprep.subr.bf16.mxu1 %v5310_v3 }
0x1af2   :  { %4644 = vmatpush3.bf16.msra.mxu1 %v5573_v63 }
0x1af3   :  { %4645 = vmatprep.subr.bf16.mxu1 %v5310_v3 }
0x1af6   :  { %4647 = vmatpush3.bf16.msra.mxu1 %v5583_v1 }
0x1af7   :  { %4648 = vmatprep.subr.bf16.mxu1 %v5310_v3 }
0x1afa   :  { %4650 = vmatpush3.bf16.msra.mxu1 %v5593_v5 }
0x1afb   :  { %4692 = vmatprep.subr.bf16.mxu1 %v5617_v19 }
0x1bb0   :  { %v1382_v13 = vpop.f32.mrb[10].mxu1 }
0x1bb1   :  { %v1384_v4 = vpop.f32.mrb[11].mxu1  ;;  %v1383_v38 = vadd.f32 %v1382_v13, %v5695_v17  ;;  %v5316_v13 = vmov 2  }
0x1bb2   :  { %v1385_v9 = vadd.f32 %v1384_v4, %v5719_v57  ;;  %v1448_v4 = vsel %vm5783_vm12, 3, %v5316_v13 }
0x1bb3   :  { %v3684_v41 = vmul.f32 -1.442695, %v1383_v38 }
0x1bb4   :  { %v1411_v10 = vsel %vm1195_vm4, %v1385_v9, -inf }
0x1bb5   :  { %1412 = vmax.xlane.f32.xlu1 %v1411_v10 }
0x1c42   :  { %v1413_v12 = vpop.xlane.xlu1 %1412 }
0x1c43   :  { %v1414_v15 = vsub.f32 %v1385_v9, %v1413_v12 }
0x1c45   :  { %v1415_v16 = vmul.f32 1.442695, %v1414_v15  ;;  %v5317_v15 = vmov 0  }
0x1c47   :  { %5116 = vpow2.f32 %v1415_v16  ;;  %v1233_v16 = vsel %vm1232_vm10, 1, %v5317_v15 }
0x1c51   :  { %v5117_v18 = vpop.eup %5116 }
0x1c52   :  { %v1417_v20 = vsel %vm1195_vm4, %v5117_v18, 0.0 }
0x1c53   :  { %1418 = vadd.xlane.f32.xlu0 %v1417_v20 }
0x1ce0   :  { %v1419_v21 = vpop.xlane.xlu0 %1418 }
0x1ce1   :  { %5118 = vlog2.f32 %v1419_v21 }
0x1ce2   :  { %5120 = vtanh.f32 %v1383_v38 }
0x1ce3   :  { %5122 = vpow2.f32 %v3684_v41 }
0x1ceb   :  { %v5119_v22 = vpop.eup %5118 }
0x1cec   :  { %v1421_v25 = vmul.f32 0.6931472, %v5119_v22  ;;  %v5121_v39 = vpop.eup %5120 }
0x1ced   :  { %v5123_v47 = vpop.eup %5122 }
0x1cee   :  { %v1422_v26 = vadd.f32 %v1421_v25, %v1413_v12  ;;  %v1390_v48 = vadd.f32 1.0, %v5123_v47 }
0x1cf0   :  { %v1423_v27 = vsub.f32 %v1385_v9, %v1422_v26  ;;  %5124 = vrcp.f32 %v1390_v48 }
0x1cf2   :  { %v1424_v28 = vsel %vm1195_vm4, %v1423_v27, -inf  ;;  %1444 = vst [vmem:[#allocation2 + $0x1] sm:$0x1] %v1423_v27 }
0x1cf3   :  { %1425 = vmax.xlane.f32.xlu0 %v1424_v28 }
0x1cfa   :  { %v5125_v53 = vpop.eup %5124 }
0x1cfb   :  { %v1394_v0 = vmul.f32 %v5125_v53, %v5733_v55  ;;  %v1666_v55 = vadd.s32 1, %v1448_v4 }
0x1d80   :  { %v1426_v31 = vpop.xlane.xlu0 %1425 }
0x1d81   :  { %vm1427_vm8 = vcmp.eq.f32.partialorder %v1423_v27, %v1426_v31 }
0x1d82   :  { %v1428_v32 = vsel %vm1427_vm8, %v5596_v6, 128  ;;  %vm1663_vm8 = vcmp.eq.s32.totalorder %v5596_v6, 3 }
0x1d83   :  { %v1429_v33 = vsel %vm1195_vm4, %v1428_v32, 2147483647 }
0x1d84   :  { %v1431_v34 = vshra.s32 %v1429_v33, 16  ;;  %v1430_v42 = vand.u32 65535, %v1429_v33 }
0x1d86   :  { %v1433_v35 = vcvt.s32.f32 %v1431_v34  ;;  %v1432_v44 = vcvt.s32.f32 %v1430_v42 }
0x1d88   :  { %1434 = vmin.xlane.f32.xlu1 %v1433_v35 }
0x1d99   :  { %1396 = vrot.lane.b32.xlu1 %v5121_v39, %s5313_s26 }
0x1e15   :  { %v1435_v43 = vpop.xlane.xlu1 %1434 }
0x1e16   :  { %vm1436_vm9 = vcmp.eq.f32.partialorder %v1433_v35, %v1435_v43  ;;  %v1441_v14 = vcvt.f32.s32 %v1435_v43 }
0x1e17   :  { %v1437_v45 = vsel %vm1436_vm9, %v1432_v44, inf }
0x1e18   :  { %1438 = vmin.xlane.f32.xlu0 %v1437_v45  ;;  %v1442_v59 = vshll.u32 %v1441_v14, 16 }
0x1e19   :  { %v1397_v50 = vpop.permute.xlu1 %1396 }
0x1e1a   :  { %v1399_v56 = vmul.f32 %v5125_v53, %v1397_v50 }
0x1e2e   :  { %1401 = vrot.lane.b32.xlu0 %v1399_v56, %s5314_s3 }
0x1ea5   :  { %v1439_v58 = vpop.xlane.xlu0 %1438 }
0x1ea6   :  { %v1440_v62 = vcvt.f32.s32 %v1439_v58 }
0x1ea8   :  { %v1443_v8 = vadd.s32 %v1442_v59, %v1440_v62 }
0x1ea9   :  { %v1402_v9 = vpop.permute.xlu0 %1401 }
0x1eaa   :  { %v5792_v10 = vsel %vm1445_vm13, %v1443_v8, %v1231_v2  ;;  %vm1449_vm14 = vcmp.eq.s32.totalorder %v1443_v8, 1  ;;  %v5794_v12 = vadd.f32 %v1402_v9, %v1394_v0  ;;  %vm1452_vm15 = vcmp.eq.s32.totalorder %v5596_v6, %v1443_v8 }
0x1eab   :  { %vm1450_vm2 = vmand %vm5783_vm12, %vm1449_vm14  ;;  %4176 = vmatmul.mubr.msk.f32.vlgmr.msra.gmra.mrb[12].mxu1 %vm1452_vm15, %v5315_v7  ;;  %vm1882_vm15 = vcmp.eq.s32.totalorder %v5596_v6, 4 }
0x1eac   :  { %v5802_v18 = vsel %vm1450_vm2, 1, %v1233_v16  ;;  %5126 = vtanh.f32 %v5794_v12  ;;  %4694 = vmatpush1.bf16.msra.mxu1 %v5628_v23  ;;  %1817 = vmatprep.mubr.f32.mxu1 %v5312_v11 }
0x1ead   :  { %vm1665_vm5 = vcmp.eq.s32.totalorder %v5802_v18, 0  ;;  %4696 = vmatprep.subr.bf16.mxu1 %v5630_v24 }
0x1eae   :  { %v5811_v52 = vsel %vm1665_vm5, %v1666_v55, %v1448_v4 }
0x1eb0   :  { %4698 = vmatpush1.bf16.msra.mxu1 %v5647_v29 }
0x1eb1   :  { %4700 = vmatprep.subr.bf16.mxu1 %v5651_v30 }
0x1eb4   :  { %4702 = vmatpush1.bf16.msra.mxu1 %v5667_v36 }
0x1eb5   :  { %4704 = vmatprep.subr.bf16.mxu1 %v5672_v37 }
0x1eb6   :  { %v5127_v20 = vpop.eup %5126 }
0x1eb7   :  { %1407 = vrot.lane.b32.xlu1 %v5127_v20, %s5313_s26 }
0x1eb8   :  { %4706 = vmatpush1.bf16.msra.mxu1 %v5682_v40 }
0x1eb9   :  { %4707 = vmatprep.subr.bf16.mxu1 %v5310_v3 }
0x1f29   :  { %v1408_v21 = vpop.permute.xlu1 %1407 }
0x1f2a   :  { %v1410_v22 = vmul.f32 %v5125_v53, %v1408_v21 }
0x1f2c   :  { %1527 = vrot.lane.b32.xlu1 %v1410_v22, %s5313_s26 }
0x1f7e   :  { %v1521_v25 = vpop.f32.mrb[12].mxu1 }
0x1f7f   :  { %v4177_v26 = vpop.f32.mrb[13].mxu1  ;;  %v1525_v27 = vmax.f32 %v1521_v25, 0.0 }
0x1f9e   :  { %v1528_v28 = vpop.permute.xlu1 %1527 }
0x1f9f   :  { %v1530_v31 = vsel %vm43_vm1, %v1525_v27, %v1528_v28 }
0x1fa0   :  { %3688 = vmatmul.mubr.msk.f32.vlgmr.msra.gmra.mrb[14].mxu0 %vm1093_vm3, %v1530_v31 }
0x1fa1   :  { %4669 = vmatpush3.bf16.msra.mxu0 %v5520_v46  ;;  %4210 = vmatprep.mubr.msk.f32.mxu0 %vm5311_vm0, %v5312_v11 }
0x1fa2   :  { %4670 = vmatprep.subr.bf16.mxu0 %v5310_v3 }
0x1fa5   :  { %4672 = vmatpush3.bf16.msra.mxu0 %v5533_v49 }
0x1fa6   :  { %4673 = vmatprep.subr.bf16.mxu0 %v5310_v3 }
0x1fa9   :  { %4675 = vmatpush3.bf16.msra.mxu0 %v5539_v51 }
0x1faa   :  { %4676 = vmatprep.subr.bf16.mxu0 %v5310_v3 }
0x1fad   :  { %4678 = vmatpush3.bf16.msra.mxu0 %v5549_v54 }
0x1fae   :  { %4679 = vmatprep.subr.bf16.mxu0 %v5310_v3 }
0x1fb1   :  { %4681 = vmatpush3.bf16.msra.mxu0 %v5564_v60 }
0x1fb2   :  { %4682 = vmatprep.subr.bf16.mxu0 %v5310_v3 }
0x1fb5   :  { %4684 = vmatpush3.bf16.msra.mxu0 %v5573_v63 }
0x1fb6   :  { %4685 = vmatprep.subr.bf16.mxu0 %v5310_v3 }
0x1fb9   :  { %4687 = vmatpush3.bf16.msra.mxu0 %v5583_v1 }
0x1fba   :  { %4688 = vmatprep.subr.bf16.mxu0 %v5310_v3 }
0x1fbd   :  { %4690 = vmatpush3.bf16.msra.mxu0 %v5593_v5 }
0x1fbe   :  { %4732 = vmatprep.subr.bf16.mxu0 %v5617_v19 }
0x2073   :  { %v1600_v32 = vpop.f32.mrb[14].mxu0 }
0x2074   :  { %v1602_v33 = vpop.f32.mrb[15].mxu0  ;;  %v1601_v62 = vadd.f32 %v1600_v32, %v5695_v17 }
0x2075   :  { %v1603_v34 = vadd.f32 %v1602_v33, %v5719_v57 }
0x2076   :  { %v3689_v0 = vmul.f32 -1.442695, %v1601_v62 }
0x2077   :  { %v1629_v35 = vsel %vm1195_vm4, %v1603_v34, -inf }
0x2078   :  { %1630 = vmax.xlane.f32.xlu0 %v1629_v35  ;;  %v1885_v35 = vadd.s32 1, %v5811_v52 }
0x2105   :  { %v1631_v38 = vpop.xlane.xlu0 %1630 }
0x2106   :  { %v1632_v39 = vsub.f32 %v1603_v34, %v1631_v38 }
0x2108   :  { %v1633_v41 = vmul.f32 1.442695, %v1632_v39 }
0x210a   :  { %5128 = vpow2.f32 %v1633_v41 }
0x2114   :  { %v5129_v42 = vpop.eup %5128 }
0x2115   :  { %v1635_v43 = vsel %vm1195_vm4, %v5129_v42, 0.0 }
0x2116   :  { %1636 = vadd.xlane.f32.xlu1 %v1635_v43 }
0x21a3   :  { %v1637_v44 = vpop.xlane.xlu1 %1636 }
0x21a4   :  { %5130 = vlog2.f32 %v1637_v44 }
0x21a5   :  { %5132 = vtanh.f32 %v1601_v62 }
0x21a6   :  { %5134 = vpow2.f32 %v3689_v0 }
0x21ae   :  { %v5131_v45 = vpop.eup %5130 }
0x21af   :  { %v1639_v47 = vmul.f32 0.6931472, %v5131_v45  ;;  %v5133_v8 = vpop.eup %5132 }
0x21b0   :  { %v5135_v13 = vpop.eup %5134 }
0x21b1   :  { %v1640_v48 = vadd.f32 %v1639_v47, %v1631_v38  ;;  %v1608_v16 = vadd.f32 1.0, %v5135_v13 }
0x21b3   :  { %v1641_v50 = vsub.f32 %v1603_v34, %v1640_v48  ;;  %5136 = vrcp.f32 %v1608_v16 }
0x21b5   :  { %v1642_v53 = vsel %vm1195_vm4, %v1641_v50, -inf  ;;  %1662 = vst [vmem:[#allocation2 + $0x2] sm:$0x1] %v1641_v50 }
0x21b6   :  { %1643 = vmax.xlane.f32.xlu0 %v1642_v53 }
0x21bd   :  { %v5137_v20 = vpop.eup %5136 }
0x21be   :  { %v1612_v31 = vmul.f32 %v5137_v20, %v5794_v12 }
0x2243   :  { %v1644_v56 = vpop.xlane.xlu0 %1643 }
0x2244   :  { %vm1645_vm6 = vcmp.eq.f32.partialorder %v1641_v50, %v1644_v56 }
0x2245   :  { %v1646_v14 = vsel %vm1645_vm6, %v5596_v6, 128 }
0x2246   :  { %v1647_v58 = vsel %vm1195_vm4, %v1646_v14, 2147483647 }
0x2247   :  { %v1649_v59 = vshra.s32 %v1647_v58, 16  ;;  %v1648_v2 = vand.u32 65535, %v1647_v58 }
0x2249   :  { %v1651_v61 = vcvt.s32.f32 %v1649_v59  ;;  %v1650_v9 = vcvt.s32.f32 %v1648_v2 }
0x224b   :  { %1652 = vmin.xlane.f32.xlu0 %v1651_v61 }
0x2261   :  { %1614 = vrot.lane.b32.xlu0 %v5133_v8, %s5313_s26 }
0x22d8   :  { %v1653_v4 = vpop.xlane.xlu0 %1652 }
0x22d9   :  { %vm1654_vm7 = vcmp.eq.f32.partialorder %v1651_v61, %v1653_v4  ;;  %v1659_v22 = vcvt.f32.s32 %v1653_v4 }
0x22da   :  { %v1655_v15 = vsel %vm1654_vm7, %v1650_v9, inf }
0x22db   :  { %1656 = vmin.xlane.f32.xlu1 %v1655_v15  ;;  %v1660_v26 = vshll.u32 %v1659_v22, 16 }
0x22dc   :  { %v1615_v55 = vpop.permute.xlu0 %1614 }
0x22dd   :  { %v1617_v21 = vmul.f32 %v5137_v20, %v1615_v55 }
0x22ec   :  { %1619 = vrot.lane.b32.xlu1 %v1617_v21, %s5314_s3 }
0x2368   :  { %v1657_v25 = vpop.xlane.xlu1 %1656 }
0x2369   :  { %v1658_v27 = vcvt.f32.s32 %v1657_v25 }
0x236b   :  { %v1661_v28 = vadd.s32 %v1660_v26, %v1658_v27 }
0x236c   :  { %v1620_v32 = vpop.permute.xlu1 %1619 }
0x236d   :  { %v5853_v33 = vsel %vm1663_vm8, %v1661_v28, %v5792_v10  ;;  %vm1668_vm9 = vcmp.eq.s32.totalorder %v1661_v28, 1  ;;  %v5855_v34 = vadd.f32 %v1620_v32, %v1612_v31  ;;  %vm1671_vm10 = vcmp.eq.s32.totalorder %v5596_v6, %v1661_v28 }
0x236e   :  { %vm1669_vm11 = vmand %vm1665_vm5, %vm1668_vm9  ;;  %4211 = vmatmul.mubr.msk.f32.vlgmr.msra.gmra.mrb[16].mxu0 %vm1671_vm10, %v5315_v7  ;;  %vm2101_vm10 = vcmp.eq.s32.totalorder %v5596_v6, 5 }
0x236f   :  { %v5863_v38 = vsel %vm1669_vm11, 1, %v5802_v18  ;;  %5138 = vtanh.f32 %v5855_v34  ;;  %4734 = vmatpush1.bf16.msra.mxu0 %v5628_v23  ;;  %2036 = vmatprep.mubr.f32.mxu0 %v5312_v11 }
0x2370   :  { %vm1884_vm12 = vcmp.eq.s32.totalorder %v5863_v38, 0  ;;  %4736 = vmatprep.subr.bf16.mxu0 %v5630_v24 }
0x2371   :  { %v5873_v10 = vsel %vm1884_vm12, %v1885_v35, %v5811_v52 }
0x2373   :  { %4738 = vmatpush1.bf16.msra.mxu0 %v5647_v29 }
0x2374   :  { %4740 = vmatprep.subr.bf16.mxu0 %v5651_v30 }
0x2377   :  { %4742 = vmatpush1.bf16.msra.mxu0 %v5667_v36 }
0x2378   :  { %4744 = vmatprep.subr.bf16.mxu0 %v5672_v37 }
0x2379   :  { %v5139_v12 = vpop.eup %5138 }
0x237a   :  { %1625 = vrot.lane.b32.xlu1 %v5139_v12, %s5313_s26 }
0x237b   :  { %4746 = vmatpush1.bf16.msra.mxu0 %v5682_v40 }
0x237c   :  { %4747 = vmatprep.subr.bf16.mxu0 %v5310_v3 }
0x23ec   :  { %v1626_v18 = vpop.permute.xlu1 %1625 }
0x23ed   :  { %v1628_v39 = vmul.f32 %v5137_v20, %v1626_v18 }
0x23ef   :  { %1746 = vrot.lane.b32.xlu0 %v1628_v39, %s5313_s26 }
0x2441   :  { %v1740_v52 = vpop.f32.mrb[16].mxu0 }
0x2442   :  { %v4212_v41 = vpop.f32.mrb[17].mxu0  ;;  %v1744_v42 = vmax.f32 %v1740_v52, 0.0 }
0x2461   :  { %v1747_v43 = vpop.permute.xlu0 %1746 }
0x2462   :  { %v1749_v44 = vsel %vm43_vm1, %v1744_v42, %v1747_v43 }
0x2463   :  { %3692 = vmatmul.mubr.msk.f32.vlgmr.msra.gmra.mrb[14].mxu1 %vm1093_vm3, %v1749_v44 }
0x2464   :  { %4709 = vmatpush3.bf16.msra.mxu1 %v5520_v46  ;;  %4245 = vmatprep.mubr.msk.f32.mxu1 %vm5311_vm0, %v5312_v11 }
0x2465   :  { %4710 = vmatprep.subr.bf16.mxu1 %v5310_v3 }
0x2468   :  { %4712 = vmatpush3.bf16.msra.mxu1 %v5533_v49 }
0x2469   :  { %4713 = vmatprep.subr.bf16.mxu1 %v5310_v3 }
0x246c   :  { %4715 = vmatpush3.bf16.msra.mxu1 %v5539_v51 }
0x246d   :  { %4716 = vmatprep.subr.bf16.mxu1 %v5310_v3 }
0x2470   :  { %4718 = vmatpush3.bf16.msra.mxu1 %v5549_v54 }
0x2471   :  { %4719 = vmatprep.subr.bf16.mxu1 %v5310_v3 }
0x2474   :  { %4721 = vmatpush3.bf16.msra.mxu1 %v5564_v60 }
0x2475   :  { %4722 = vmatprep.subr.bf16.mxu1 %v5310_v3 }
0x2478   :  { %4724 = vmatpush3.bf16.msra.mxu1 %v5573_v63 }
0x2479   :  { %4725 = vmatprep.subr.bf16.mxu1 %v5310_v3 }
0x247c   :  { %4727 = vmatpush3.bf16.msra.mxu1 %v5583_v1 }
0x247d   :  { %4728 = vmatprep.subr.bf16.mxu1 %v5310_v3 }
0x2480   :  { %4730 = vmatpush3.bf16.msra.mxu1 %v5593_v5 }
0x2481   :  { %4772 = vmatprep.subr.bf16.mxu1 %v5617_v19 }
0x2536   :  { %v1819_v45 = vpop.f32.mrb[14].mxu1 }
0x2537   :  { %v1821_v47 = vpop.f32.mrb[15].mxu1  ;;  %v1820_v20 = vadd.f32 %v1819_v45, %v5695_v17 }
0x2538   :  { %v1822_v48 = vadd.f32 %v1821_v47, %v5719_v57 }
0x2539   :  { %v3693_v22 = vmul.f32 -1.442695, %v1820_v20 }
0x253a   :  { %v1848_v50 = vsel %vm1195_vm4, %v1822_v48, -inf }
0x253b   :  { %1849 = vmax.xlane.f32.xlu1 %v1848_v50  ;;  %v2104_v50 = vadd.s32 1, %v5873_v10 }
0x25c8   :  { %v1850_v53 = vpop.xlane.xlu1 %1849 }
0x25c9   :  { %v1851_v56 = vsub.f32 %v1822_v48, %v1850_v53 }
0x25cb   :  { %v1852_v14 = vmul.f32 1.442695, %v1851_v56 }
0x25cd   :  { %5140 = vpow2.f32 %v1852_v14 }
0x25d7   :  { %v5141_v58 = vpop.eup %5140 }
0x25d8   :  { %v1854_v59 = vsel %vm1195_vm4, %v5141_v58, 0.0 }
0x25d9   :  { %1855 = vadd.xlane.f32.xlu0 %v1854_v59 }
0x2666   :  { %v1856_v61 = vpop.xlane.xlu0 %1855 }
0x2667   :  { %5142 = vlog2.f32 %v1856_v61 }
0x2668   :  { %5144 = vtanh.f32 %v1820_v20 }
0x2669   :  { %5146 = vpow2.f32 %v3693_v22 }
0x2671   :  { %v5143_v62 = vpop.eup %5142 }
0x2672   :  { %v1858_v8 = vmul.f32 0.6931472, %v5143_v62  ;;  %v5145_v21 = vpop.eup %5144 }
0x2673   :  { %v5147_v31 = vpop.eup %5146 }
0x2674   :  { %v1859_v0 = vadd.f32 %v1858_v8, %v1850_v53  ;;  %v1827_v32 = vadd.f32 1.0, %v5147_v31 }
0x2676   :  { %v1860_v2 = vsub.f32 %v1822_v48, %v1859_v0  ;;  %5148 = vrcp.f32 %v1827_v32 }
0x2678   :  { %v1861_v13 = vsel %vm1195_vm4, %v1860_v2, -inf  ;;  %1881 = vst [vmem:[#allocation2 + $0x3] sm:$0x1] %v1860_v2 }
0x2679   :  { %1862 = vmax.xlane.f32.xlu0 %v1861_v13 }
0x2680   :  { %v5149_v12 = vpop.eup %5148 }
0x2681   :  { %v1831_v44 = vmul.f32 %v5149_v12, %v5855_v34 }
0x2706   :  { %v1863_v4 = vpop.xlane.xlu0 %1862 }
0x2707   :  { %vm1864_vm13 = vcmp.eq.f32.partialorder %v1860_v2, %v1863_v4 }
0x2708   :  { %v1865_v9 = vsel %vm1864_vm13, %v5596_v6, 128 }
0x2709   :  { %v1866_v15 = vsel %vm1195_vm4, %v1865_v9, 2147483647 }
0x270a   :  { %v1868_v16 = vshra.s32 %v1866_v15, 16  ;;  %v1867_v25 = vand.u32 65535, %v1866_v15 }
0x270c   :  { %v1870_v55 = vcvt.s32.f32 %v1868_v16  ;;  %v1869_v27 = vcvt.s32.f32 %v1867_v25 }
0x270e   :  { %1871 = vmin.xlane.f32.xlu1 %v1870_v55 }
0x271f   :  { %1833 = vrot.lane.b32.xlu1 %v5145_v21, %s5313_s26 }
0x279b   :  { %v1872_v26 = vpop.xlane.xlu1 %1871 }
0x279c   :  { %vm1873_vm14 = vcmp.eq.f32.partialorder %v1870_v55, %v1872_v26  ;;  %v1878_v39 = vcvt.f32.s32 %v1872_v26 }
0x279d   :  { %v1874_v28 = vsel %vm1873_vm14, %v1869_v27, inf }
0x279e   :  { %1875 = vmin.xlane.f32.xlu0 %v1874_v28  ;;  %v1879_v41 = vshll.u32 %v1878_v39, 16 }
0x279f   :  { %v1834_v35 = vpop.permute.xlu1 %1833 }
0x27a0   :  { %v1836_v18 = vmul.f32 %v5149_v12, %v1834_v35 }
0x27b4   :  { %1838 = vrot.lane.b32.xlu0 %v1836_v18, %s5314_s3 }
0x282b   :  { %v1876_v52 = vpop.xlane.xlu0 %1875 }
0x282c   :  { %v1877_v42 = vcvt.f32.s32 %v1876_v52 }
0x282e   :  { %v1880_v43 = vadd.s32 %v1879_v41, %v1877_v42 }
0x282f   :  { %v1839_v45 = vpop.permute.xlu0 %1838 }
0x2830   :  { %v5915_v47 = vsel %vm1882_vm15, %v1880_v43, %v5853_v33  ;;  %vm1887_vm2 = vcmp.eq.s32.totalorder %v1880_v43, 1  ;;  %v5917_v48 = vadd.f32 %v1839_v45, %v1831_v44  ;;  %vm1890_vm5 = vcmp.eq.s32.totalorder %v5596_v6, %v1880_v43 }
0x2831   :  { %vm1888_vm6 = vmand %vm1884_vm12, %vm1887_vm2  ;;  %4246 = vmatmul.mubr.msk.f32.vlgmr.msra.gmra.mrb[16].mxu1 %vm1890_vm5, %v5315_v7  ;;  %vm2320_vm5 = vcmp.eq.s32.totalorder %v5596_v6, 6 }
0x2832   :  { %v5925_v53 = vsel %vm1888_vm6, 1, %v5863_v38  ;;  %5150 = vtanh.f32 %v5917_v48  ;;  %4774 = vmatpush1.bf16.msra.mxu1 %v5628_v23  ;;  %2255 = vmatprep.mubr.f32.mxu1 %v5312_v11 }
0x2833   :  { %vm2103_vm7 = vcmp.eq.s32.totalorder %v5925_v53, 0  ;;  %4776 = vmatprep.subr.bf16.mxu1 %v5630_v24 }
0x2834   :  { %v5935_v33 = vsel %vm2103_vm7, %v2104_v50, %v5873_v10 }
0x2836   :  { %4778 = vmatpush1.bf16.msra.mxu1 %v5647_v29 }
0x2837   :  { %4780 = vmatprep.subr.bf16.mxu1 %v5651_v30 }
0x283a   :  { %4782 = vmatpush1.bf16.msra.mxu1 %v5667_v36 }
0x283b   :  { %4784 = vmatprep.subr.bf16.mxu1 %v5672_v37 }
0x283c   :  { %v5151_v34 = vpop.eup %5150 }
0x283d   :  { %1844 = vrot.lane.b32.xlu1 %v5151_v34, %s5313_s26 }
0x283e   :  { %4786 = vmatpush1.bf16.msra.mxu1 %v5682_v40 }
0x283f   :  { %4787 = vmatprep.subr.bf16.mxu1 %v5310_v3 }
0x28af   :  { %v1845_v38 = vpop.permute.xlu1 %1844 }
0x28b0   :  { %v1847_v56 = vmul.f32 %v5149_v12, %v1845_v38 }
0x28b2   :  { %1965 = vrot.lane.b32.xlu1 %v1847_v56, %s5313_s26 }
0x2904   :  { %v1959_v10 = vpop.f32.mrb[16].mxu1 }
0x2905   :  { %v4247_v14 = vpop.f32.mrb[17].mxu1  ;;  %v1963_v58 = vmax.f32 %v1959_v10, 0.0 }
0x2924   :  { %v1966_v59 = vpop.permute.xlu1 %1965 }
0x2925   :  { %v1968_v61 = vsel %vm43_vm1, %v1963_v58, %v1966_v59 }
0x2926   :  { %3696 = vmatmul.mubr.msk.f32.vlgmr.msra.gmra.mrb[18].mxu0 %vm1093_vm3, %v1968_v61 }
0x2927   :  { %4749 = vmatpush3.bf16.msra.mxu0 %v5520_v46  ;;  %4280 = vmatprep.mubr.msk.f32.mxu0 %vm5311_vm0, %v5312_v11 }
0x2928   :  { %4750 = vmatprep.subr.bf16.mxu0 %v5310_v3 }
0x292b   :  { %4752 = vmatpush3.bf16.msra.mxu0 %v5533_v49 }
0x292c   :  { %4753 = vmatprep.subr.bf16.mxu0 %v5310_v3 }
0x292f   :  { %4755 = vmatpush3.bf16.msra.mxu0 %v5539_v51 }
0x2930   :  { %4756 = vmatprep.subr.bf16.mxu0 %v5310_v3 }
0x2933   :  { %4758 = vmatpush3.bf16.msra.mxu0 %v5549_v54 }
0x2934   :  { %4759 = vmatprep.subr.bf16.mxu0 %v5310_v3 }
0x2937   :  { %4761 = vmatpush3.bf16.msra.mxu0 %v5564_v60 }
0x2938   :  { %4762 = vmatprep.subr.bf16.mxu0 %v5310_v3 }
0x293b   :  { %4764 = vmatpush3.bf16.msra.mxu0 %v5573_v63 }
0x293c   :  { %4765 = vmatprep.subr.bf16.mxu0 %v5310_v3 }
0x293f   :  { %4767 = vmatpush3.bf16.msra.mxu0 %v5583_v1 }
0x2940   :  { %4768 = vmatprep.subr.bf16.mxu0 %v5310_v3 }
0x2943   :  { %4770 = vmatpush3.bf16.msra.mxu0 %v5593_v5 }
0x2944   :  { %4812 = vmatprep.subr.bf16.mxu0 %v5617_v19 }
0x29f9   :  { %v2038_v62 = vpop.f32.mrb[18].mxu0 }
0x29fa   :  { %v2040_v8 = vpop.f32.mrb[19].mxu0  ;;  %v2039_v12 = vadd.f32 %v2038_v62, %v5695_v17 }
0x29fb   :  { %v2041_v0 = vadd.f32 %v2040_v8, %v5719_v57 }
0x29fc   :  { %v3697_v39 = vmul.f32 -1.442695, %v2039_v12 }
0x29fd   :  { %v2067_v2 = vsel %vm1195_vm4, %v2041_v0, -inf }
0x29fe   :  { %2068 = vmax.xlane.f32.xlu0 %v2067_v2  ;;  %v2323_v2 = vadd.s32 1, %v5935_v33 }
0x2a8b   :  { %v2069_v13 = vpop.xlane.xlu0 %2068 }
0x2a8c   :  { %v2070_v4 = vsub.f32 %v2041_v0, %v2069_v13 }
0x2a8e   :  { %v2071_v9 = vmul.f32 1.442695, %v2070_v4 }
0x2a90   :  { %5152 = vpow2.f32 %v2071_v9 }
0x2a9a   :  { %v5153_v15 = vpop.eup %5152 }
0x2a9b   :  { %v2073_v16 = vsel %vm1195_vm4, %v5153_v15, 0.0 }
0x2a9c   :  { %2074 = vadd.xlane.f32.xlu1 %v2073_v16 }
0x2b29   :  { %v2075_v55 = vpop.xlane.xlu1 %2074 }
0x2b2a   :  { %5154 = vlog2.f32 %v2075_v55 }
0x2b2b   :  { %5156 = vtanh.f32 %v2039_v12 }
0x2b2c   :  { %5158 = vpow2.f32 %v3697_v39 }
0x2b34   :  { %v5155_v20 = vpop.eup %5154 }
0x2b35   :  { %v2077_v21 = vmul.f32 0.6931472, %v5155_v20  ;;  %v5157_v18 = vpop.eup %5156 }
0x2b36   :  { %v5159_v41 = vpop.eup %5158 }
0x2b37   :  { %v2078_v22 = vadd.f32 %v2077_v21, %v2069_v13  ;;  %v2046_v45 = vadd.f32 1.0, %v5159_v41 }
0x2b39   :  { %v2079_v25 = vsub.f32 %v2041_v0, %v2078_v22  ;;  %5160 = vrcp.f32 %v2046_v45 }
0x2b3b   :  { %v2080_v26 = vsel %vm1195_vm4, %v2079_v25, -inf  ;;  %2100 = vst [vmem:[#allocation2 + $0x4] sm:$0x1] %v2079_v25 }
0x2b3c   :  { %2081 = vmax.xlane.f32.xlu0 %v2080_v26 }
0x2b43   :  { %v5161_v34 = vpop.eup %5160 }
0x2b44   :  { %v2050_v61 = vmul.f32 %v5161_v34, %v5917_v48 }
0x2bc9   :  { %v2082_v27 = vpop.xlane.xlu0 %2081 }
0x2bca   :  { %vm2083_vm8 = vcmp.eq.f32.partialorder %v2079_v25, %v2082_v27 }
0x2bcb   :  { %v2084_v28 = vsel %vm2083_vm8, %v5596_v6, 128 }
0x2bcc   :  { %v2085_v31 = vsel %vm1195_vm4, %v2084_v28, 2147483647 }
0x2bcd   :  { %v2087_v32 = vshra.s32 %v2085_v31, 16  ;;  %v2086_v52 = vand.u32 65535, %v2085_v31 }
0x2bcf   :  { %v2089_v35 = vcvt.s32.f32 %v2087_v32  ;;  %v2088_v43 = vcvt.s32.f32 %v2086_v52 }
0x2bd1   :  { %2090 = vmin.xlane.f32.xlu0 %v2089_v35 }
0x2be7   :  { %2052 = vrot.lane.b32.xlu0 %v5157_v18, %s5313_s26 }
0x2c5e   :  { %v2091_v42 = vpop.xlane.xlu0 %2090 }
0x2c5f   :  { %vm2092_vm9 = vcmp.eq.f32.partialorder %v2089_v35, %v2091_v42  ;;  %v2097_v56 = vcvt.f32.s32 %v2091_v42 }
0x2c60   :  { %v2093_v44 = vsel %vm2092_vm9, %v2088_v43, inf }
0x2c61   :  { %2094 = vmin.xlane.f32.xlu1 %v2093_v44  ;;  %v2098_v14 = vshll.u32 %v2097_v56, 16 }
0x2c62   :  { %v2053_v50 = vpop.permute.xlu0 %2052 }
0x2c63   :  { %v2055_v38 = vmul.f32 %v5161_v34, %v2053_v50 }
0x2c72   :  { %2057 = vrot.lane.b32.xlu1 %v2055_v38, %s5314_s3 }
0x2cee   :  { %v2095_v10 = vpop.xlane.xlu1 %2094 }
0x2cef   :  { %v2096_v58 = vcvt.f32.s32 %v2095_v10 }
0x2cf1   :  { %v2099_v59 = vadd.s32 %v2098_v14, %v2096_v58 }
0x2cf2   :  { %v2058_v62 = vpop.permute.xlu1 %2057 }
0x2cf3   :  { %v5977_v8 = vsel %vm2101_vm10, %v2099_v59, %v5915_v47  ;;  %vm2106_vm11 = vcmp.eq.s32.totalorder %v2099_v59, 1  ;;  %v5979_v0 = vadd.f32 %v2058_v62, %v2050_v61  ;;  %vm2109_vm12 = vcmp.eq.s32.totalorder %v5596_v6, %v2099_v59 }
0x2cf4   :  { %vm2107_vm13 = vmand %vm2103_vm7, %vm2106_vm11  ;;  %4281 = vmatmul.mubr.msk.f32.vlgmr.msra.gmra.mrb[20].mxu0 %vm2109_vm12, %v5315_v7  ;;  %vm2539_vm12 = vcmp.eq.s32.totalorder %v5596_v6, 7 }
0x2cf5   :  { %v5987_v13 = vsel %vm2107_vm13, 1, %v5925_v53  ;;  %5162 = vtanh.f32 %v5979_v0  ;;  %4814 = vmatpush1.bf16.msra.mxu0 %v5628_v23  ;;  %2474 = vmatprep.mubr.f32.mxu0 %v5312_v11 }
0x2cf6   :  { %vm2322_vm14 = vcmp.eq.s32.totalorder %v5987_v13, 0  ;;  %4816 = vmatprep.subr.bf16.mxu0 %v5630_v24 }
0x2cf7   :  { %v5997_v47 = vsel %vm2322_vm14, %v2323_v2, %v5935_v33 }
0x2cf9   :  { %4818 = vmatpush1.bf16.msra.mxu0 %v5647_v29 }
0x2cfa   :  { %4820 = vmatprep.subr.bf16.mxu0 %v5651_v30 }
0x2cfd   :  { %4822 = vmatpush1.bf16.msra.mxu0 %v5667_v36 }
0x2cfe   :  { %4824 = vmatprep.subr.bf16.mxu0 %v5672_v37 }
0x2cff   :  { %v5163_v48 = vpop.eup %5162 }
0x2d00   :  { %2063 = vrot.lane.b32.xlu1 %v5163_v48, %s5313_s26 }
0x2d01   :  { %4826 = vmatpush1.bf16.msra.mxu0 %v5682_v40 }
0x2d02   :  { %4827 = vmatprep.subr.bf16.mxu0 %v5310_v3 }
0x2d72   :  { %v2064_v53 = vpop.permute.xlu1 %2063 }
0x2d73   :  { %v2066_v4 = vmul.f32 %v5161_v34, %v2064_v53 }
0x2d75   :  { %2184 = vrot.lane.b32.xlu0 %v2066_v4, %s5313_s26 }
0x2dc7   :  { %v2178_v33 = vpop.f32.mrb[20].mxu0 }
0x2dc8   :  { %v4282_v9 = vpop.f32.mrb[21].mxu0  ;;  %v2182_v15 = vmax.f32 %v2178_v33, 0.0 }
0x2de7   :  { %v2185_v16 = vpop.permute.xlu0 %2184 }
0x2de8   :  { %v2187_v55 = vsel %vm43_vm1, %v2182_v15, %v2185_v16 }
0x2de9   :  { %3700 = vmatmul.mubr.msk.f32.vlgmr.msra.gmra.mrb[18].mxu1 %vm1093_vm3, %v2187_v55 }
0x2dea   :  { %4789 = vmatpush3.bf16.msra.mxu1 %v5520_v46  ;;  %4315 = vmatprep.mubr.msk.f32.mxu1 %vm5311_vm0, %v5312_v11 }
0x2deb   :  { %4790 = vmatprep.subr.bf16.mxu1 %v5310_v3 }
0x2dee   :  { %4792 = vmatpush3.bf16.msra.mxu1 %v5533_v49 }
0x2def   :  { %4793 = vmatprep.subr.bf16.mxu1 %v5310_v3 }
0x2df2   :  { %4795 = vmatpush3.bf16.msra.mxu1 %v5539_v51 }
0x2df3   :  { %4796 = vmatprep.subr.bf16.mxu1 %v5310_v3 }
0x2df6   :  { %4798 = vmatpush3.bf16.msra.mxu1 %v5549_v54 }
0x2df7   :  { %4799 = vmatprep.subr.bf16.mxu1 %v5310_v3 }
0x2dfa   :  { %4801 = vmatpush3.bf16.msra.mxu1 %v5564_v60 }
0x2dfb   :  { %4802 = vmatprep.subr.bf16.mxu1 %v5310_v3 }
0x2dfe   :  { %4804 = vmatpush3.bf16.msra.mxu1 %v5573_v63 }
0x2dff   :  { %4805 = vmatprep.subr.bf16.mxu1 %v5310_v3 }
0x2e02   :  { %4807 = vmatpush3.bf16.msra.mxu1 %v5583_v1 }
0x2e03   :  { %4808 = vmatprep.subr.bf16.mxu1 %v5310_v3 }
0x2e06   :  { %4810 = vmatpush3.bf16.msra.mxu1 %v5593_v5 }
0x2e07   :  { %4852 = vmatprep.subr.bf16.mxu1 %v5617_v19 }
0x2ebc   :  { %v2257_v20 = vpop.f32.mrb[18].mxu1 }
0x2ebd   :  { %v2259_v21 = vpop.f32.mrb[19].mxu1  ;;  %v2258_v34 = vadd.f32 %v2257_v20, %v5695_v17 }
0x2ebe   :  { %v2260_v22 = vadd.f32 %v2259_v21, %v5719_v57 }
0x2ebf   :  { %v3701_v56 = vmul.f32 -1.442695, %v2258_v34 }
0x2ec0   :  { %v2286_v25 = vsel %vm1195_vm4, %v2260_v22, -inf }
0x2ec1   :  { %2287 = vmax.xlane.f32.xlu1 %v2286_v25  ;;  %v2542_v25 = vadd.s32 1, %v5997_v47 }
0x2f4e   :  { %v2288_v26 = vpop.xlane.xlu1 %2287 }
0x2f4f   :  { %v2289_v27 = vsub.f32 %v2260_v22, %v2288_v26 }
0x2f51   :  { %v2290_v28 = vmul.f32 1.442695, %v2289_v27 }
0x2f53   :  { %5164 = vpow2.f32 %v2290_v28 }
0x2f5d   :  { %v5165_v31 = vpop.eup %5164 }
0x2f5e   :  { %v2292_v32 = vsel %vm1195_vm4, %v5165_v31, 0.0 }
0x2f5f   :  { %2293 = vadd.xlane.f32.xlu0 %v2292_v32 }
0x2fec   :  { %v2294_v35 = vpop.xlane.xlu0 %2293 }
0x2fed   :  { %5166 = vlog2.f32 %v2294_v35 }
0x2fee   :  { %5168 = vtanh.f32 %v2258_v34 }
0x2fef   :  { %5170 = vpow2.f32 %v3701_v56 }
0x2ff7   :  { %v5167_v12 = vpop.eup %5166 }
0x2ff8   :  { %v2296_v18 = vmul.f32 0.6931472, %v5167_v12  ;;  %v5169_v38 = vpop.eup %5168 }
0x2ff9   :  { %v5171_v61 = vpop.eup %5170 }
0x2ffa   :  { %v2297_v39 = vadd.f32 %v2296_v18, %v2288_v26  ;;  %v2265_v62 = vadd.f32 1.0, %v5171_v61 }
0x2ffc   :  { %v2298_v52 = vsub.f32 %v2260_v22, %v2297_v39  ;;  %5172 = vrcp.f32 %v2265_v62 }
0x2ffe   :  { %v2299_v41 = vsel %vm1195_vm4, %v2298_v52, -inf  ;;  %2319 = vst [vmem:[#allocation2 + $0x5] sm:$0x1] %v2298_v52 }
0x2fff   :  { %2300 = vmax.xlane.f32.xlu0 %v2299_v41 }
0x3006   :  { %v5173_v48 = vpop.eup %5172 }
0x3007   :  { %v2269_v55 = vmul.f32 %v5173_v48, %v5979_v0 }
0x308c   :  { %v2301_v42 = vpop.xlane.xlu0 %2300 }
0x308d   :  { %vm2302_vm15 = vcmp.eq.f32.partialorder %v2298_v52, %v2301_v42 }
0x308e   :  { %v2303_v43 = vsel %vm2302_vm15, %v5596_v6, 128 }
0x308f   :  { %v2304_v44 = vsel %vm1195_vm4, %v2303_v43, 2147483647 }
0x3090   :  { %v2306_v45 = vshra.s32 %v2304_v44, 16  ;;  %v2305_v10 = vand.u32 65535, %v2304_v44 }
0x3092   :  { %v2308_v50 = vcvt.s32.f32 %v2306_v45  ;;  %v2307_v58 = vcvt.s32.f32 %v2305_v10 }
0x3094   :  { %2309 = vmin.xlane.f32.xlu1 %v2308_v50 }
0x30a5   :  { %2271 = vrot.lane.b32.xlu1 %v5169_v38, %s5313_s26 }
0x3121   :  { %v2310_v14 = vpop.xlane.xlu1 %2309 }
0x3122   :  { %vm2311_vm2 = vcmp.eq.f32.partialorder %v2308_v50, %v2310_v14  ;;  %v2316_v4 = vcvt.f32.s32 %v2310_v14 }
0x3123   :  { %v2312_v59 = vsel %vm2311_vm2, %v2307_v58, inf }
0x3124   :  { %2313 = vmin.xlane.f32.xlu0 %v2312_v59  ;;  %v2317_v9 = vshll.u32 %v2316_v4, 16 }
0x3125   :  { %v2272_v2 = vpop.permute.xlu1 %2271 }
0x3126   :  { %v2274_v53 = vmul.f32 %v5173_v48, %v2272_v2 }
0x313a   :  { %2276 = vrot.lane.b32.xlu0 %v2274_v53, %s5314_s3 }
0x31b1   :  { %v2314_v33 = vpop.xlane.xlu0 %2313 }
0x31b2   :  { %v2315_v15 = vcvt.f32.s32 %v2314_v33 }
0x31b4   :  { %v2318_v16 = vadd.s32 %v2317_v9, %v2315_v15 }
0x31b5   :  { %v2277_v20 = vpop.permute.xlu0 %2276 }
0x31b6   :  { %v6039_v21 = vsel %vm2320_vm5, %v2318_v16, %v5977_v8  ;;  %vm2325_vm6 = vcmp.eq.s32.totalorder %v2318_v16, 1  ;;  %v6041_v22 = vadd.f32 %v2277_v20, %v2269_v55  ;;  %vm2328_vm7 = vcmp.eq.s32.totalorder %v5596_v6, %v2318_v16 }
0x31b7   :  { %vm2326_vm8 = vmand %vm2322_vm14, %vm2325_vm6  ;;  %4316 = vmatmul.mubr.msk.f32.vlgmr.msra.gmra.mrb[20].mxu1 %vm2328_vm7, %v5315_v7  ;;  %vm2758_vm7 = vcmp.eq.s32.totalorder %v5596_v6, 8 }
0x31b8   :  { %v6049_v26 = vsel %vm2326_vm8, 1, %v5987_v13  ;;  %5174 = vtanh.f32 %v6041_v22  ;;  %4854 = vmatpush1.bf16.msra.mxu1 %v5628_v23  ;;  %2693 = vmatprep.mubr.f32.mxu1 %v5312_v11 }
0x31b9   :  { %vm2541_vm9 = vcmp.eq.s32.totalorder %v6049_v26, 0  ;;  %4856 = vmatprep.subr.bf16.mxu1 %v5630_v24 }
0x31ba   :  { %v6059_v8 = vsel %vm2541_vm9, %v2542_v25, %v5997_v47 }
0x31bc   :  { %4858 = vmatpush1.bf16.msra.mxu1 %v5647_v29 }
0x31bd   :  { %4860 = vmatprep.subr.bf16.mxu1 %v5651_v30 }
0x31c0   :  { %4862 = vmatpush1.bf16.msra.mxu1 %v5667_v36 }
0x31c1   :  { %4864 = vmatprep.subr.bf16.mxu1 %v5672_v37 }
0x31c2   :  { %v5175_v0 = vpop.eup %5174 }
0x31c3   :  { %2282 = vrot.lane.b32.xlu1 %v5175_v0, %s5313_s26 }
0x31c4   :  { %4866 = vmatpush1.bf16.msra.mxu1 %v5682_v40 }
0x31c5   :  { %4867 = vmatprep.subr.bf16.mxu1 %v5310_v3 }
0x3235   :  { %v2283_v13 = vpop.permute.xlu1 %2282 }
0x3236   :  { %v2285_v27 = vmul.f32 %v5173_v48, %v2283_v13 }
0x3238   :  { %2403 = vrot.lane.b32.xlu1 %v2285_v27, %s5313_s26 }
0x328a   :  { %v2397_v47 = vpop.f32.mrb[20].mxu1 }
0x328b   :  { %v4317_v28 = vpop.f32.mrb[21].mxu1  ;;  %v2401_v31 = vmax.f32 %v2397_v47, 0.0 }
0x32aa   :  { %v2404_v32 = vpop.permute.xlu1 %2403 }
0x32ab   :  { %v2406_v35 = vsel %vm43_vm1, %v2401_v31, %v2404_v32 }
0x32ac   :  { %3704 = vmatmul.mubr.msk.f32.vlgmr.msra.gmra.mrb[22].mxu0 %vm1093_vm3, %v2406_v35 }
0x32ad   :  { %4829 = vmatpush3.bf16.msra.mxu0 %v5520_v46  ;;  %4350 = vmatprep.mubr.msk.f32.mxu0 %vm5311_vm0, %v5312_v11 }
0x32ae   :  { %4830 = vmatprep.subr.bf16.mxu0 %v5310_v3 }
0x32b1   :  { %4832 = vmatpush3.bf16.msra.mxu0 %v5533_v49 }
0x32b2   :  { %4833 = vmatprep.subr.bf16.mxu0 %v5310_v3 }
0x32b5   :  { %4835 = vmatpush3.bf16.msra.mxu0 %v5539_v51 }
0x32b6   :  { %4836 = vmatprep.subr.bf16.mxu0 %v5310_v3 }
0x32b9   :  { %4838 = vmatpush3.bf16.msra.mxu0 %v5549_v54 }
0x32ba   :  { %4839 = vmatprep.subr.bf16.mxu0 %v5310_v3 }
0x32bd   :  { %4841 = vmatpush3.bf16.msra.mxu0 %v5564_v60 }
0x32be   :  { %4842 = vmatprep.subr.bf16.mxu0 %v5310_v3 }
0x32c1   :  { %4844 = vmatpush3.bf16.msra.mxu0 %v5573_v63 }
0x32c2   :  { %4845 = vmatprep.subr.bf16.mxu0 %v5310_v3 }
0x32c5   :  { %4847 = vmatpush3.bf16.msra.mxu0 %v5583_v1 }
0x32c6   :  { %4848 = vmatprep.subr.bf16.mxu0 %v5310_v3 }
0x32c9   :  { %4850 = vmatpush3.bf16.msra.mxu0 %v5593_v5 }
0x32ca   :  { %4892 = vmatprep.subr.bf16.mxu0 %v5617_v19 }
0x337f   :  { %v2476_v12 = vpop.f32.mrb[22].mxu0 }
0x3380   :  { %v2478_v18 = vpop.f32.mrb[23].mxu0  ;;  %v2477_v48 = vadd.f32 %v2476_v12, %v5695_v17 }
0x3381   :  { %v2479_v39 = vadd.f32 %v2478_v18, %v5719_v57 }
0x3382   :  { %v3705_v4 = vmul.f32 -1.442695, %v2477_v48 }
0x3383   :  { %v2505_v52 = vsel %vm1195_vm4, %v2479_v39, -inf }
0x3384   :  { %2506 = vmax.xlane.f32.xlu0 %v2505_v52  ;;  %v2761_v52 = vadd.s32 1, %v6059_v8 }
0x3411   :  { %v2507_v41 = vpop.xlane.xlu0 %2506 }
0x3412   :  { %v2508_v42 = vsub.f32 %v2479_v39, %v2507_v41 }
0x3414   :  { %v2509_v43 = vmul.f32 1.442695, %v2508_v42 }
0x3416   :  { %5176 = vpow2.f32 %v2509_v43 }
0x3420   :  { %v5177_v44 = vpop.eup %5176 }
0x3421   :  { %v2511_v45 = vsel %vm1195_vm4, %v5177_v44, 0.0 }
0x3422   :  { %2512 = vadd.xlane.f32.xlu1 %v2511_v45 }
0x34af   :  { %v2513_v50 = vpop.xlane.xlu1 %2512 }
0x34b0   :  { %5178 = vlog2.f32 %v2513_v50 }
0x34b1   :  { %5180 = vtanh.f32 %v2477_v48 }
0x34b2   :  { %5182 = vpow2.f32 %v3705_v4 }
0x34ba   :  { %v5179_v34 = vpop.eup %5178 }
0x34bb   :  { %v2515_v38 = vmul.f32 0.6931472, %v5179_v34  ;;  %v5181_v53 = vpop.eup %5180 }
0x34bc   :  { %v5183_v9 = vpop.eup %5182 }
0x34bd   :  { %v2516_v56 = vadd.f32 %v2515_v38, %v2507_v41  ;;  %v2484_v20 = vadd.f32 1.0, %v5183_v9 }
0x34bf   :  { %v2517_v10 = vsub.f32 %v2479_v39, %v2516_v56  ;;  %5184 = vrcp.f32 %v2484_v20 }
0x34c1   :  { %v2518_v14 = vsel %vm1195_vm4, %v2517_v10, -inf  ;;  %2538 = vst [vmem:[#allocation2 + $0x6] sm:$0x1] %v2517_v10 }
0x34c2   :  { %2519 = vmax.xlane.f32.xlu0 %v2518_v14 }
0x34c9   :  { %v5185_v0 = vpop.eup %5184 }
0x34ca   :  { %v2488_v35 = vmul.f32 %v5185_v0, %v6041_v22 }
0x354f   :  { %v2520_v58 = vpop.xlane.xlu0 %2519 }
0x3550   :  { %vm2521_vm10 = vcmp.eq.f32.partialorder %v2517_v10, %v2520_v58 }
0x3551   :  { %v2522_v59 = vsel %vm2521_vm10, %v5596_v6, 128 }
0x3552   :  { %v2523_v61 = vsel %vm1195_vm4, %v2522_v59, 2147483647 }
0x3553   :  { %v2525_v62 = vshra.s32 %v2523_v61, 16  ;;  %v2524_v33 = vand.u32 65535, %v2523_v61 }
0x3555   :  { %v2527_v2 = vcvt.s32.f32 %v2525_v62  ;;  %v2526_v16 = vcvt.s32.f32 %v2524_v33 }
0x3557   :  { %2528 = vmin.xlane.f32.xlu0 %v2527_v2 }
0x356d   :  { %2490 = vrot.lane.b32.xlu0 %v5181_v53, %s5313_s26 }
0x35e4   :  { %v2529_v15 = vpop.xlane.xlu0 %2528 }
0x35e5   :  { %vm2530_vm11 = vcmp.eq.f32.partialorder %v2527_v2, %v2529_v15  ;;  %v2535_v27 = vcvt.f32.s32 %v2529_v15 }
0x35e6   :  { %v2531_v55 = vsel %vm2530_vm11, %v2526_v16, inf }
0x35e7   :  { %2532 = vmin.xlane.f32.xlu1 %v2531_v55  ;;  %v2536_v28 = vshll.u32 %v2535_v27, 16 }
0x35e8   :  { %v2491_v25 = vpop.permute.xlu0 %2490 }
0x35e9   :  { %v2493_v13 = vmul.f32 %v5185_v0, %v2491_v25 }
0x35f8   :  { %2495 = vrot.lane.b32.xlu1 %v2493_v13, %s5314_s3 }
0x3674   :  { %v2533_v47 = vpop.xlane.xlu1 %2532 }
0x3675   :  { %v2534_v31 = vcvt.f32.s32 %v2533_v47 }
0x3677   :  { %v2537_v32 = vadd.s32 %v2536_v28, %v2534_v31 }
0x3678   :  { %v2496_v12 = vpop.permute.xlu1 %2495 }
0x3679   :  { %v6101_v18 = vsel %vm2539_vm12, %v2537_v32, %v6039_v21  ;;  %vm2544_vm13 = vcmp.eq.s32.totalorder %v2537_v32, 1  ;;  %v6103_v39 = vadd.f32 %v2496_v12, %v2488_v35  ;;  %vm2547_vm14 = vcmp.eq.s32.totalorder %v5596_v6, %v2537_v32 }
0x367a   :  { %vm2545_vm15 = vmand %vm2541_vm9, %vm2544_vm13  ;;  %4351 = vmatmul.mubr.msk.f32.vlgmr.msra.gmra.mrb[24].mxu0 %vm2547_vm14, %v5315_v7  ;;  %vm2977_vm14 = vcmp.eq.s32.totalorder %v5596_v6, 9 }
0x367b   :  { %v6111_v41 = vsel %vm2545_vm15, 1, %v6049_v26  ;;  %5186 = vtanh.f32 %v6103_v39  ;;  %4894 = vmatpush1.bf16.msra.mxu0 %v5628_v23  ;;  %2912 = vmatprep.mubr.f32.mxu0 %v5312_v11 }
0x367c   :  { %vm2760_vm2 = vcmp.eq.s32.totalorder %v6111_v41, 0  ;;  %4896 = vmatprep.subr.bf16.mxu0 %v5630_v24 }
0x367d   :  { %v6121_v21 = vsel %vm2760_vm2, %v2761_v52, %v6059_v8 }
0x367f   :  { %4898 = vmatpush1.bf16.msra.mxu0 %v5647_v29 }
0x3680   :  { %4900 = vmatprep.subr.bf16.mxu0 %v5651_v30 }
0x3683   :  { %4902 = vmatpush1.bf16.msra.mxu0 %v5667_v36 }
0x3684   :  { %4904 = vmatprep.subr.bf16.mxu0 %v5672_v37 }
0x3685   :  { %v5187_v22 = vpop.eup %5186 }
0x3686   :  { %2501 = vrot.lane.b32.xlu1 %v5187_v22, %s5313_s26 }
0x3687   :  { %4906 = vmatpush1.bf16.msra.mxu0 %v5682_v40 }
0x3688   :  { %4907 = vmatprep.subr.bf16.mxu0 %v5310_v3 }
0x36f8   :  { %v2502_v26 = vpop.permute.xlu1 %2501 }
0x36f9   :  { %v2504_v42 = vmul.f32 %v5185_v0, %v2502_v26 }
0x36fb   :  { %2622 = vrot.lane.b32.xlu0 %v2504_v42, %s5313_s26 }
0x374d   :  { %v2616_v8 = vpop.f32.mrb[24].mxu0 }
0x374e   :  { %v4352_v43 = vpop.f32.mrb[25].mxu0  ;;  %v2620_v44 = vmax.f32 %v2616_v8, 0.0 }
0x376d   :  { %v2623_v45 = vpop.permute.xlu0 %2622 }
0x376e   :  { %v2625_v50 = vsel %vm43_vm1, %v2620_v44, %v2623_v45 }
0x376f   :  { %3708 = vmatmul.mubr.msk.f32.vlgmr.msra.gmra.mrb[22].mxu1 %vm1093_vm3, %v2625_v50 }
0x3770   :  { %4869 = vmatpush3.bf16.msra.mxu1 %v5520_v46  ;;  %4385 = vmatprep.mubr.msk.f32.mxu1 %vm5311_vm0, %v5312_v11 }
0x3771   :  { %4870 = vmatprep.subr.bf16.mxu1 %v5310_v3 }
0x3774   :  { %4872 = vmatpush3.bf16.msra.mxu1 %v5533_v49 }
0x3775   :  { %4873 = vmatprep.subr.bf16.mxu1 %v5310_v3 }
0x3778   :  { %4875 = vmatpush3.bf16.msra.mxu1 %v5539_v51 }
0x3779   :  { %4876 = vmatprep.subr.bf16.mxu1 %v5310_v3 }
0x377c   :  { %4878 = vmatpush3.bf16.msra.mxu1 %v5549_v54 }
0x377d   :  { %4879 = vmatprep.subr.bf16.mxu1 %v5310_v3 }
0x3780   :  { %4881 = vmatpush3.bf16.msra.mxu1 %v5564_v60 }
0x3781   :  { %4882 = vmatprep.subr.bf16.mxu1 %v5310_v3 }
0x3784   :  { %4884 = vmatpush3.bf16.msra.mxu1 %v5573_v63 }
0x3785   :  { %4885 = vmatprep.subr.bf16.mxu1 %v5310_v3 }
0x3788   :  { %4887 = vmatpush3.bf16.msra.mxu1 %v5583_v1 }
0x3789   :  { %4888 = vmatprep.subr.bf16.mxu1 %v5310_v3 }
0x378c   :  { %4890 = vmatpush3.bf16.msra.mxu1 %v5593_v5 }
0x378d   :  { %4932 = vmatprep.subr.bf16.mxu1 %v5617_v19 }
0x3842   :  { %v2695_v34 = vpop.f32.mrb[22].mxu1 }
0x3843   :  { %v2697_v38 = vpop.f32.mrb[23].mxu1  ;;  %v2696_v0 = vadd.f32 %v2695_v34, %v5695_v17 }
0x3844   :  { %v2698_v56 = vadd.f32 %v2697_v38, %v5719_v57 }
0x3845   :  { %v3709_v27 = vmul.f32 -1.442695, %v2696_v0 }
0x3846   :  { %v2724_v10 = vsel %vm1195_vm4, %v2698_v56, -inf }
0x3847   :  { %2725 = vmax.xlane.f32.xlu1 %v2724_v10  ;;  %v2980_v10 = vadd.s32 1, %v6121_v21 }
0x38d4   :  { %v2726_v14 = vpop.xlane.xlu1 %2725 }
0x38d5   :  { %v2727_v58 = vsub.f32 %v2698_v56, %v2726_v14 }
0x38d7   :  { %v2728_v59 = vmul.f32 1.442695, %v2727_v58 }
0x38d9   :  { %5188 = vpow2.f32 %v2728_v59 }
0x38e3   :  { %v5189_v61 = vpop.eup %5188 }
0x38e4   :  { %v2730_v62 = vsel %vm1195_vm4, %v5189_v61, 0.0 }
0x38e5   :  { %2731 = vadd.xlane.f32.xlu0 %v2730_v62 }
0x3972   :  { %v2732_v2 = vpop.xlane.xlu0 %2731 }
0x3973   :  { %5190 = vlog2.f32 %v2732_v2 }
0x3974   :  { %5192 = vtanh.f32 %v2696_v0 }
0x3975   :  { %5194 = vpow2.f32 %v3709_v27 }
0x397d   :  { %v5191_v48 = vpop.eup %5190 }
0x397e   :  { %v2734_v53 = vmul.f32 0.6931472, %v5191_v48  ;;  %v5193_v13 = vpop.eup %5192 }
0x397f   :  { %v5195_v35 = vpop.eup %5194 }
0x3980   :  { %v2735_v4 = vadd.f32 %v2734_v53, %v2726_v14  ;;  %v2703_v12 = vadd.f32 1.0, %v5195_v35 }
0x3982   :  { %v2736_v33 = vsub.f32 %v2698_v56, %v2735_v4  ;;  %5196 = vrcp.f32 %v2703_v12 }
0x3984   :  { %v2737_v9 = vsel %vm1195_vm4, %v2736_v33, -inf  ;;  %2757 = vst [vmem:[#allocation2 + $0x7] sm:$0x1] %v2736_v33 }
0x3985   :  { %2738 = vmax.xlane.f32.xlu0 %v2737_v9 }
0x398c   :  { %v5197_v22 = vpop.eup %5196 }
0x398d   :  { %v2707_v50 = vmul.f32 %v5197_v22, %v6103_v39 }
0x3a12   :  { %v2739_v15 = vpop.xlane.xlu0 %2738 }
0x3a13   :  { %vm2740_vm5 = vcmp.eq.f32.partialorder %v2736_v33, %v2739_v15 }
0x3a14   :  { %v2741_v16 = vsel %vm2740_vm5, %v5596_v6, 128 }
0x3a15   :  { %v2742_v55 = vsel %vm1195_vm4, %v2741_v16, 2147483647 }
0x3a16   :  { %v2744_v20 = vshra.s32 %v2742_v55, 16  ;;  %v2743_v47 = vand.u32 65535, %v2742_v55 }
0x3a18   :  { %v2746_v25 = vcvt.s32.f32 %v2744_v20  ;;  %v2745_v31 = vcvt.s32.f32 %v2743_v47 }
0x3a1a   :  { %2747 = vmin.xlane.f32.xlu1 %v2746_v25 }
0x3a2b   :  { %2709 = vrot.lane.b32.xlu1 %v5193_v13, %s5313_s26 }
0x3aa7   :  { %v2748_v28 = vpop.xlane.xlu1 %2747 }
0x3aa8   :  { %vm2749_vm6 = vcmp.eq.f32.partialorder %v2746_v25, %v2748_v28  ;;  %v2754_v42 = vcvt.f32.s32 %v2748_v28 }
0x3aa9   :  { %v2750_v32 = vsel %vm2749_vm6, %v2745_v31, inf }
0x3aaa   :  { %2751 = vmin.xlane.f32.xlu0 %v2750_v32  ;;  %v2755_v43 = vshll.u32 %v2754_v42, 16 }
0x3aab   :  { %v2710_v52 = vpop.permute.xlu1 %2709 }
0x3aac   :  { %v2712_v26 = vmul.f32 %v5197_v22, %v2710_v52 }
0x3ac0   :  { %2714 = vrot.lane.b32.xlu0 %v2712_v26, %s5314_s3 }
0x3b37   :  { %v2752_v8 = vpop.xlane.xlu0 %2751 }
0x3b38   :  { %v2753_v44 = vcvt.f32.s32 %v2752_v8 }
0x3b3a   :  { %v2756_v45 = vadd.s32 %v2755_v43, %v2753_v44 }
0x3b3b   :  { %v2715_v34 = vpop.permute.xlu0 %2714 }
0x3b3c   :  { %v6163_v38 = vsel %vm2758_vm7, %v2756_v45, %v6101_v18  ;;  %vm2763_vm8 = vcmp.eq.s32.totalorder %v2756_v45, 1  ;;  %v6165_v56 = vadd.f32 %v2715_v34, %v2707_v50  ;;  %vm2766_vm9 = vcmp.eq.s32.totalorder %v5596_v6, %v2756_v45 }
0x3b3d   :  { %vm2764_vm10 = vmand %vm2760_vm2, %vm2763_vm8  ;;  %4386 = vmatmul.mubr.msk.f32.vlgmr.msra.gmra.mrb[24].mxu1 %vm2766_vm9, %v5315_v7  ;;  %vm3196_vm9 = vcmp.eq.s32.totalorder %v5596_v6, 10 }
0x3b3e   :  { %v6173_v14 = vsel %vm2764_vm10, 1, %v6111_v41  ;;  %5198 = vtanh.f32 %v6165_v56  ;;  %4934 = vmatpush1.bf16.msra.mxu1 %v5628_v23  ;;  %3131 = vmatprep.mubr.f32.mxu1 %v5312_v11 }
0x3b3f   :  { %vm2979_vm11 = vcmp.eq.s32.totalorder %v6173_v14, 0  ;;  %4936 = vmatprep.subr.bf16.mxu1 %v5630_v24 }
0x3b40   :  { %v6183_v18 = vsel %vm2979_vm11, %v2980_v10, %v6121_v21 }
0x3b42   :  { %4938 = vmatpush1.bf16.msra.mxu1 %v5647_v29 }
0x3b43   :  { %4940 = vmatprep.subr.bf16.mxu1 %v5651_v30 }
0x3b46   :  { %4942 = vmatpush1.bf16.msra.mxu1 %v5667_v36 }
0x3b47   :  { %4944 = vmatprep.subr.bf16.mxu1 %v5672_v37 }
0x3b48   :  { %v5199_v39 = vpop.eup %5198 }
0x3b49   :  { %2720 = vrot.lane.b32.xlu1 %v5199_v39, %s5313_s26 }
0x3b4a   :  { %4946 = vmatpush1.bf16.msra.mxu1 %v5682_v40 }
0x3b4b   :  { %4947 = vmatprep.subr.bf16.mxu1 %v5310_v3 }
0x3bbb   :  { %v2721_v41 = vpop.permute.xlu1 %2720 }
0x3bbc   :  { %v2723_v58 = vmul.f32 %v5197_v22, %v2721_v41 }
0x3bbe   :  { %2841 = vrot.lane.b32.xlu1 %v2723_v58, %s5313_s26 }
0x3c10   :  { %v2835_v21 = vpop.f32.mrb[24].mxu1 }
0x3c11   :  { %v4387_v59 = vpop.f32.mrb[25].mxu1  ;;  %v2839_v61 = vmax.f32 %v2835_v21, 0.0 }
0x3c30   :  { %v2842_v62 = vpop.permute.xlu1 %2841 }
0x3c31   :  { %v2844_v2 = vsel %vm43_vm1, %v2839_v61, %v2842_v62 }
0x3c32   :  { %3712 = vmatmul.mubr.msk.f32.vlgmr.msra.gmra.mrb[26].mxu0 %vm1093_vm3, %v2844_v2 }
0x3c33   :  { %4909 = vmatpush3.bf16.msra.mxu0 %v5520_v46  ;;  %4420 = vmatprep.mubr.msk.f32.mxu0 %vm5311_vm0, %v5312_v11 }
0x3c34   :  { %4910 = vmatprep.subr.bf16.mxu0 %v5310_v3 }
0x3c37   :  { %4912 = vmatpush3.bf16.msra.mxu0 %v5533_v49 }
0x3c38   :  { %4913 = vmatprep.subr.bf16.mxu0 %v5310_v3 }
0x3c3b   :  { %4915 = vmatpush3.bf16.msra.mxu0 %v5539_v51 }
0x3c3c   :  { %4916 = vmatprep.subr.bf16.mxu0 %v5310_v3 }
0x3c3f   :  { %4918 = vmatpush3.bf16.msra.mxu0 %v5549_v54 }
0x3c40   :  { %4919 = vmatprep.subr.bf16.mxu0 %v5310_v3 }
0x3c43   :  { %4921 = vmatpush3.bf16.msra.mxu0 %v5564_v60 }
0x3c44   :  { %4922 = vmatprep.subr.bf16.mxu0 %v5310_v3 }
0x3c47   :  { %4924 = vmatpush3.bf16.msra.mxu0 %v5573_v63 }
0x3c48   :  { %4925 = vmatprep.subr.bf16.mxu0 %v5310_v3 }
0x3c4b   :  { %4927 = vmatpush3.bf16.msra.mxu0 %v5583_v1 }
0x3c4c   :  { %4928 = vmatprep.subr.bf16.mxu0 %v5310_v3 }
0x3c4f   :  { %4930 = vmatpush3.bf16.msra.mxu0 %v5593_v5 }
0x3c50   :  { %4972 = vmatprep.subr.bf16.mxu0 %v5617_v19 }
0x3d05   :  { %v2914_v48 = vpop.f32.mrb[26].mxu0 }
0x3d06   :  { %v2916_v53 = vpop.f32.mrb[27].mxu0  ;;  %v2915_v22 = vadd.f32 %v2914_v48, %v5695_v17 }
0x3d07   :  { %v2917_v4 = vadd.f32 %v2916_v53, %v5719_v57 }
0x3d08   :  { %v3713_v42 = vmul.f32 -1.442695, %v2915_v22 }
0x3d09   :  { %v2943_v33 = vsel %vm1195_vm4, %v2917_v4, -inf }
0x3d0a   :  { %2944 = vmax.xlane.f32.xlu0 %v2943_v33 }
0x3d97   :  { %v2945_v9 = vpop.xlane.xlu0 %2944 }
0x3d98   :  { %v2946_v15 = vsub.f32 %v2917_v4, %v2945_v9 }
0x3d9a   :  { %v2947_v16 = vmul.f32 1.442695, %v2946_v15 }
0x3d9c   :  { %5200 = vpow2.f32 %v2947_v16 }
0x3da6   :  { %v5201_v55 = vpop.eup %5200 }
0x3da7   :  { %v2949_v20 = vsel %vm1195_vm4, %v5201_v55, 0.0 }
0x3da8   :  { %2950 = vadd.xlane.f32.xlu1 %v2949_v20 }
0x3e35   :  { %v2951_v25 = vpop.xlane.xlu1 %2950 }
0x3e36   :  { %5202 = vlog2.f32 %v2951_v25 }
0x3e37   :  { %5204 = vtanh.f32 %v2915_v22 }
0x3e38   :  { %5206 = vpow2.f32 %v3713_v42 }
0x3e40   :  { %v5203_v0 = vpop.eup %5202 }
0x3e41   :  { %v2953_v13 = vmul.f32 0.6931472, %v5203_v0  ;;  %v5205_v26 = vpop.eup %5204 }
0x3e42   :  { %v5207_v43 = vpop.eup %5206 }
0x3e43   :  { %v2954_v27 = vadd.f32 %v2953_v13, %v2945_v9  ;;  %v2922_v34 = vadd.f32 1.0, %v5207_v43 }
0x3e45   :  { %v2955_v47 = vsub.f32 %v2917_v4, %v2954_v27  ;;  %5208 = vrcp.f32 %v2922_v34 }
0x3e47   :  { %v2956_v28 = vsel %vm1195_vm4, %v2955_v47, -inf  ;;  %2976 = vst [vmem:[#allocation2 + $0x8] sm:$0x1] %v2955_v47 }
0x3e48   :  { %2957 = vmax.xlane.f32.xlu0 %v2956_v28 }
0x3e4f   :  { %v5209_v39 = vpop.eup %5208 }
0x3e50   :  { %v2926_v2 = vmul.f32 %v5209_v39, %v6165_v56 }
0x3ed5   :  { %v2958_v31 = vpop.xlane.xlu0 %2957 }
0x3ed6   :  { %vm2959_vm12 = vcmp.eq.f32.partialorder %v2955_v47, %v2958_v31 }
0x3ed7   :  { %v2960_v32 = vsel %vm2959_vm12, %v5596_v6, 128 }
0x3ed8   :  { %v2961_v35 = vsel %vm1195_vm4, %v2960_v32, 2147483647 }
0x3ed9   :  { %v2963_v12 = vshra.s32 %v2961_v35, 16  ;;  %v2962_v8 = vand.u32 65535, %v2961_v35 }
0x3edb   :  { %v2965_v52 = vcvt.s32.f32 %v2963_v12  ;;  %v2964_v45 = vcvt.s32.f32 %v2962_v8 }
0x3edd   :  { %2966 = vmin.xlane.f32.xlu0 %v2965_v52 }
0x3ef3   :  { %2928 = vrot.lane.b32.xlu0 %v5205_v26, %s5313_s26 }
0x3f6a   :  { %v2967_v44 = vpop.xlane.xlu0 %2966 }
0x3f6b   :  { %vm2968_vm13 = vcmp.eq.f32.partialorder %v2965_v52, %v2967_v44  ;;  %v2973_v58 = vcvt.f32.s32 %v2967_v44 }
0x3f6c   :  { %v2969_v50 = vsel %vm2968_vm13, %v2964_v45, inf }
0x3f6d   :  { %2970 = vmin.xlane.f32.xlu1 %v2969_v50  ;;  %v2974_v59 = vshll.u32 %v2973_v58, 16 }
0x3f6e   :  { %v2929_v10 = vpop.permute.xlu0 %2928 }
0x3f6f   :  { %v2931_v41 = vmul.f32 %v5209_v39, %v2929_v10 }
0x3f7e   :  { %2933 = vrot.lane.b32.xlu1 %v2931_v41, %s5314_s3 }
0x3ffa   :  { %v2971_v21 = vpop.xlane.xlu1 %2970 }
0x3ffb   :  { %v2972_v61 = vcvt.f32.s32 %v2971_v21 }
0x3ffd   :  { %v2975_v62 = vadd.s32 %v2974_v59, %v2972_v61 }
0x3ffe   :  { %v2934_v48 = vpop.permute.xlu1 %2933 }
0x3fff   :  { %v6225_v53 = vsel %vm2977_vm14, %v2975_v62, %v6163_v38  ;;  %vm2982_vm15 = vcmp.eq.s32.totalorder %v2975_v62, 1  ;;  %v6227_v4 = vadd.f32 %v2934_v48, %v2926_v2  ;;  %vm2985_vm2 = vcmp.eq.s32.totalorder %v5596_v6, %v2975_v62 }
0x4000   :  { %vm2983_vm5 = vmand %vm2979_vm11, %vm2982_vm15  ;;  %4421 = vmatmul.mubr.msk.f32.vlgmr.msra.gmra.mrb[28].mxu0 %vm2985_vm2, %v5315_v7  ;;  %v3199_v38 = vadd.s32 1, %v6183_v18  ;;  %vm3415_vm15 = vcmp.eq.s32.totalorder %v5596_v6, 11 }
0x4001   :  { %5210 = vtanh.f32 %v6227_v4  ;;  %4974 = vmatpush1.bf16.msra.mxu0 %v5628_v23  ;;  %3350 = vmatprep.mubr.f32.mxu0 %v5312_v11  ;;  %v6237_v56 = vsel %vm2983_vm5, 1, %v6173_v14 }
0x4002   :  { %4976 = vmatprep.subr.bf16.mxu0 %v5630_v24  ;;  %vm3198_vm6 = vcmp.eq.s32.totalorder %v6237_v56, 0 }
0x4003   :  { %v6245_v33 = vsel %vm3198_vm6, %v3199_v38, %v6183_v18 }
0x4005   :  { %4978 = vmatpush1.bf16.msra.mxu0 %v5647_v29 }
0x4006   :  { %4980 = vmatprep.subr.bf16.mxu0 %v5651_v30 }
0x4009   :  { %4982 = vmatpush1.bf16.msra.mxu0 %v5667_v36 }
0x400a   :  { %4984 = vmatprep.subr.bf16.mxu0 %v5672_v37 }
0x400b   :  { %v5211_v14 = vpop.eup %5210 }
0x400c   :  { %2939 = vrot.lane.b32.xlu1 %v5211_v14, %s5313_s26 }
0x400d   :  { %4986 = vmatpush1.bf16.msra.mxu0 %v5682_v40 }
0x400e   :  { %4987 = vmatprep.subr.bf16.mxu0 %v5310_v3 }
0x407e   :  { %v2940_v9 = vpop.permute.xlu1 %2939 }
0x407f   :  { %v2942_v15 = vmul.f32 %v5209_v39, %v2940_v9 }
0x4081   :  { %3060 = vrot.lane.b32.xlu0 %v2942_v15, %s5313_s26 }
0x40d3   :  { %v3054_v18 = vpop.f32.mrb[28].mxu0 }
0x40d4   :  { %v4422_v16 = vpop.f32.mrb[29].mxu0  ;;  %v3058_v55 = vmax.f32 %v3054_v18, 0.0 }
0x40f3   :  { %v3061_v20 = vpop.permute.xlu0 %3060 }
0x40f4   :  { %v3063_v25 = vsel %vm43_vm1, %v3058_v55, %v3061_v20 }
0x40f5   :  { %3716 = vmatmul.mubr.msk.f32.vlgmr.msra.gmra.mrb[26].mxu1 %vm1093_vm3, %v3063_v25 }
0x40f6   :  { %4949 = vmatpush3.bf16.msra.mxu1 %v5520_v46  ;;  %4455 = vmatprep.mubr.msk.f32.mxu1 %vm5311_vm0, %v5312_v11 }
0x40f7   :  { %4950 = vmatprep.subr.bf16.mxu1 %v5310_v3 }
0x40fa   :  { %4952 = vmatpush3.bf16.msra.mxu1 %v5533_v49 }
0x40fb   :  { %4953 = vmatprep.subr.bf16.mxu1 %v5310_v3 }
0x40fe   :  { %4955 = vmatpush3.bf16.msra.mxu1 %v5539_v51 }
0x40ff   :  { %4956 = vmatprep.subr.bf16.mxu1 %v5310_v3 }
0x4102   :  { %4958 = vmatpush3.bf16.msra.mxu1 %v5549_v54 }
0x4103   :  { %4959 = vmatprep.subr.bf16.mxu1 %v5310_v3 }
0x4106   :  { %4961 = vmatpush3.bf16.msra.mxu1 %v5564_v60 }
0x4107   :  { %4962 = vmatprep.subr.bf16.mxu1 %v5310_v3 }
0x410a   :  { %4964 = vmatpush3.bf16.msra.mxu1 %v5573_v63 }
0x410b   :  { %4965 = vmatprep.subr.bf16.mxu1 %v5310_v3 }
0x410e   :  { %4967 = vmatpush3.bf16.msra.mxu1 %v5583_v1 }
0x410f   :  { %4968 = vmatprep.subr.bf16.mxu1 %v5310_v3 }
0x4112   :  { %4970 = vmatpush3.bf16.msra.mxu1 %v5593_v5 }
0x4113   :  { %5012 = vmatprep.subr.bf16.mxu1 %v5617_v19 }
0x41c8   :  { %v3133_v0 = vpop.f32.mrb[26].mxu1 }
0x41c9   :  { %v3135_v13 = vpop.f32.mrb[27].mxu1  ;;  %v3134_v10 = vadd.f32 %v3133_v0, %v5695_v17 }
0x41ca   :  { %v3136_v27 = vadd.f32 %v3135_v13, %v5719_v57 }
0x41cb   :  { %v3717_v41 = vmul.f32 -1.442695, %v3134_v10 }
0x41cc   :  { %v3162_v47 = vsel %vm1195_vm4, %v3136_v27, -inf }
0x41cd   :  { %3163 = vmax.xlane.f32.xlu1 %v3162_v47 }
0x425a   :  { %v3164_v28 = vpop.xlane.xlu1 %3163 }
0x425b   :  { %v3165_v31 = vsub.f32 %v3136_v27, %v3164_v28 }
0x425d   :  { %v3166_v32 = vmul.f32 1.442695, %v3165_v31 }
0x425f   :  { %5212 = vpow2.f32 %v3166_v32 }
0x4269   :  { %v5213_v35 = vpop.eup %5212 }
0x426a   :  { %v3168_v12 = vsel %vm1195_vm4, %v5213_v35, 0.0 }
0x426b   :  { %3169 = vadd.xlane.f32.xlu0 %v3168_v12 }
0x42f8   :  { %v3170_v52 = vpop.xlane.xlu0 %3169 }
0x42f9   :  { %5214 = vlog2.f32 %v3170_v52 }
0x42fa   :  { %5216 = vtanh.f32 %v3134_v10 }
0x42fb   :  { %5218 = vpow2.f32 %v3717_v41 }
0x4303   :  { %v5215_v22 = vpop.eup %5214 }
0x4304   :  { %v3172_v26 = vmul.f32 0.6931472, %v5215_v22  ;;  %v5217_v39 = vpop.eup %5216 }
0x4305   :  { %v5219_v62 = vpop.eup %5218 }
0x4306   :  { %v3173_v19 = vadd.f32 %v3172_v26, %v3164_v28  ;;  %v3141_v2 = vadd.f32 1.0, %v5219_v62 }
0x4308   :  { %v3174_v42 = vsub.f32 %v3136_v27, %v3173_v19  ;;  %5220 = vrcp.f32 %v3141_v2  ;;  %v3418_v27 = vadd.s32 1, %v6245_v33 }
0x430a   :  { %v3175_v8 = vsel %vm1195_vm4, %v3174_v42, -inf  ;;  %3195 = vst [vmem:[#allocation2 + $0x9] sm:$0x1] %v3174_v42 }
0x430b   :  { %3176 = vmax.xlane.f32.xlu0 %v3175_v8 }
0x4312   :  { %v5221_v38 = vpop.eup %5220 }
0x4313   :  { %v3145_v20 = vmul.f32 %v5221_v38, %v6227_v4 }
0x4398   :  { %v3177_v43 = vpop.xlane.xlu0 %3176 }
0x4399   :  { %vm3178_vm7 = vcmp.eq.f32.partialorder %v3174_v42, %v3177_v43 }
0x439a   :  { %v3179_v44 = vsel %vm3178_vm7, %v5596_v6, 128  ;;  %vm3615_vm7 = vcmask 0  }
0x439b   :  { %v3180_v45 = vsel %vm1195_vm4, %v3179_v44, 2147483647 }
0x439c   :  { %v3182_v50 = vshra.s32 %v3180_v45, 16  ;;  %v3181_v58 = vand.u32 65535, %v3180_v45 }
0x439e   :  { %v3184_v34 = vcvt.s32.f32 %v3182_v50  ;;  %v3183_v59 = vcvt.s32.f32 %v3181_v58 }
0x43a0   :  { %3185 = vmin.xlane.f32.xlu1 %v3184_v34 }
0x43b1   :  { %3147 = vrot.lane.b32.xlu1 %v5217_v39, %s5313_s26 }
0x442d   :  { %v3186_v21 = vpop.xlane.xlu1 %3185 }
0x442e   :  { %vm3187_vm8 = vcmp.eq.f32.partialorder %v3184_v34, %v3186_v21  ;;  %v3192_v9 = vcvt.f32.s32 %v3186_v21 }
0x442f   :  { %v3188_v61 = vsel %vm3187_vm8, %v3183_v59, inf }
0x4430   :  { %3189 = vmin.xlane.f32.xlu0 %v3188_v61  ;;  %v3193_v18 = vshll.u32 %v3192_v9, 16 }
0x4431   :  { %v3148_v48 = vpop.permute.xlu1 %3147 }
0x4432   :  { %v3150_v14 = vmul.f32 %v5221_v38, %v3148_v48 }
0x4446   :  { %3152 = vrot.lane.b32.xlu0 %v3150_v14, %s5314_s3 }
0x44bd   :  { %v3190_v15 = vpop.xlane.xlu0 %3189 }
0x44be   :  { %v3191_v16 = vcvt.f32.s32 %v3190_v15 }
0x44c0   :  { %v3194_v55 = vadd.s32 %v3193_v18, %v3191_v16 }
0x44c1   :  { %v3153_v25 = vpop.permute.xlu0 %3152 }
0x44c2   :  { %vm3201_vm10 = vcmp.eq.s32.totalorder %v3194_v55, 1  ;;  %v6286_v0 = vadd.f32 %v3153_v25, %v3145_v20  ;;  %vm3204_vm11 = vcmp.eq.s32.totalorder %v5596_v6, %v3194_v55  ;;  %v6290_v13 = vsel %vm3196_vm9, %v3194_v55, %v6225_v53 }
0x44c3   :  { %4456 = vmatmul.mubr.msk.f32.vlgmr.msra.gmra.mrb[28].mxu1 %vm3204_vm11, %v5315_v7  ;;  %vm3202_vm12 = vmand %vm3198_vm6, %vm3201_vm10 }
0x44c4   :  { %5222 = vtanh.f32 %v6286_v0  ;;  %5014 = vmatpush1.bf16.msra.mxu1 %v5628_v23  ;;  %3569 = vmatprep.mubr.f32.mxu1 %v5312_v11  ;;  %v6299_v4 = vsel %vm3202_vm12, 1, %v6237_v56 }
0x44c5   :  { %5016 = vmatprep.subr.bf16.mxu1 %v5630_v24  ;;  %vm3417_vm13 = vcmp.eq.s32.totalorder %v6299_v4, 0 }
0x44c6   :  { %v6307_v53 = vsel %vm3417_vm13, %v3418_v27, %v6245_v33 }
0x44c7   :  { %v3612_v15 = vadd.s32 1, %v6307_v53 }
0x44c8   :  { %5018 = vmatpush1.bf16.msra.mxu1 %v5647_v29 }
0x44c9   :  { %5020 = vmatprep.subr.bf16.mxu1 %v5651_v30 }
0x44cc   :  { %5022 = vmatpush1.bf16.msra.mxu1 %v5667_v36 }
0x44cd   :  { %5024 = vmatprep.subr.bf16.mxu1 %v5672_v37 }
0x44ce   :  { %v5223_v23 = vpop.eup %5222 }
0x44cf   :  { %3158 = vrot.lane.b32.xlu1 %v5223_v23, %s5313_s26 }
0x44d0   :  { %5026 = vmatpush1.bf16.msra.mxu1 %v5682_v40 }
0x4541   :  { %v3159_v24 = vpop.permute.xlu1 %3158 }
0x4542   :  { %v3161_v56 = vmul.f32 %v5221_v38, %v3159_v24 }
0x4544   :  { %3279 = vrot.lane.b32.xlu1 %v3161_v56, %s5313_s26 }
0x4596   :  { %v3273_v47 = vpop.f32.mrb[28].mxu1 }
0x4597   :  { %v4457_v33 = vpop.f32.mrb[29].mxu1  ;;  %v3277_v28 = vmax.f32 %v3273_v47, 0.0 }
0x45b6   :  { %v3280_v31 = vpop.permute.xlu1 %3279 }
0x45b7   :  { %v3282_v29 = vsel %vm43_vm1, %v3277_v28, %v3280_v31 }
0x45b8   :  { %3720 = vmatmul.mubr.msk.f32.vlgmr.msra.gmra.mrb[30].mxu0 %vm1093_vm3, %v3282_v29 }
0x45b9   :  { %4989 = vmatpush3.bf16.msra.mxu0 %v5520_v46  ;;  %4490 = vmatprep.mubr.msk.f32.mxu0 %vm5311_vm0, %v5312_v11 }
0x45ba   :  { %4990 = vmatprep.subr.bf16.mxu0 %v5310_v3 }
0x45bd   :  { %4992 = vmatpush3.bf16.msra.mxu0 %v5533_v49 }
0x45be   :  { %4993 = vmatprep.subr.bf16.mxu0 %v5310_v3 }
0x45c1   :  { %4995 = vmatpush3.bf16.msra.mxu0 %v5539_v51 }
0x45c2   :  { %4996 = vmatprep.subr.bf16.mxu0 %v5310_v3 }
0x45c5   :  { %4998 = vmatpush3.bf16.msra.mxu0 %v5549_v54 }
0x45c6   :  { %4999 = vmatprep.subr.bf16.mxu0 %v5310_v3 }
0x45c9   :  { %5001 = vmatpush3.bf16.msra.mxu0 %v5564_v60 }
0x45ca   :  { %5002 = vmatprep.subr.bf16.mxu0 %v5310_v3 }
0x45cd   :  { %5004 = vmatpush3.bf16.msra.mxu0 %v5573_v63 }
0x45ce   :  { %5005 = vmatprep.subr.bf16.mxu0 %v5310_v3 }
0x45d1   :  { %5007 = vmatpush3.bf16.msra.mxu0 %v5583_v1 }
0x45d2   :  { %5008 = vmatprep.subr.bf16.mxu0 %v5310_v3 }
0x45d5   :  { %5010 = vmatpush3.bf16.msra.mxu0 %v5593_v5 }
0x468b   :  { %v3352_v11 = vpop.f32.mrb[30].mxu0 }
0x468c   :  { %v3354_v46 = vpop.f32.mrb[31].mxu0  ;;  %v3353_v19 = vadd.f32 %v3352_v11, %v5695_v17 }
0x468d   :  { %v3355_v49 = vadd.f32 %v3354_v46, %v5719_v57 }
0x468e   :  { %v3721_v8 = vmul.f32 -1.442695, %v3353_v19 }
0x468f   :  { %v3381_v51 = vsel %vm1195_vm4, %v3355_v49, -inf }
0x4690   :  { %3382 = vmax.xlane.f32.xlu0 %v3381_v51 }
0x471d   :  { %v3383_v54 = vpop.xlane.xlu0 %3382 }
0x471e   :  { %v3384_v60 = vsub.f32 %v3355_v49, %v3383_v54 }
0x4720   :  { %v3385_v30 = vmul.f32 1.442695, %v3384_v60 }
0x4722   :  { %5224 = vpow2.f32 %v3385_v30 }
0x472c   :  { %v5225_v63 = vpop.eup %5224 }
0x472d   :  { %v3387_v36 = vsel %vm1195_vm4, %v5225_v63, 0.0 }
0x472e   :  { %3388 = vadd.xlane.f32.xlu1 %v3387_v36 }
0x47bb   :  { %v3389_v1 = vpop.xlane.xlu1 %3388 }
0x47bc   :  { %5226 = vlog2.f32 %v3389_v1 }
0x47bd   :  { %5228 = vtanh.f32 %v3353_v19 }
0x47be   :  { %5230 = vpow2.f32 %v3721_v8 }
0x47c6   :  { %v5227_v3 = vpop.eup %5226 }
0x47c7   :  { %v3391_v37 = vmul.f32 0.6931472, %v5227_v3  ;;  %v5229_v42 = vpop.eup %5228 }
0x47c8   :  { %v5231_v44 = vpop.eup %5230 }
0x47c9   :  { %v3392_v5 = vadd.f32 %v3391_v37, %v3383_v54  ;;  %v3360_v10 = vadd.f32 1.0, %v5231_v44 }
0x47cb   :  { %v3393_v40 = vsub.f32 %v3355_v49, %v3392_v5  ;;  %5232 = vrcp.f32 %v3360_v10 }
0x47cd   :  { %v3394_v32 = vsel %vm1195_vm4, %v3393_v40, -inf  ;;  %3414 = vst [vmem:[#allocation2 + $0xa] sm:$0x1] %v3393_v40 }
0x47ce   :  { %3395 = vmax.xlane.f32.xlu0 %v3394_v32 }
0x47d5   :  { %v5233_v41 = vpop.eup %5232 }
0x47d6   :  { %v3364_v2 = vmul.f32 %v5233_v41, %v6286_v0 }
0x485b   :  { %v3396_v35 = vpop.xlane.xlu0 %3395 }
0x485c   :  { %vm3397_vm0 = vcmp.eq.f32.partialorder %v3393_v40, %v3396_v35 }
0x485d   :  { %v3398_v12 = vsel %vm3397_vm0, %v5596_v6, 128 }
0x485e   :  { %v3399_v52 = vsel %vm1195_vm4, %v3398_v12, 2147483647 }
0x485f   :  { %v3401_v22 = vshra.s32 %v3399_v52, 16  ;;  %v3400_v43 = vand.u32 65535, %v3399_v52 }
0x4861   :  { %v3403_v26 = vcvt.s32.f32 %v3401_v22  ;;  %v3402_v50 = vcvt.s32.f32 %v3400_v43 }
0x4863   :  { %3404 = vmin.xlane.f32.xlu0 %v3403_v26 }
0x4879   :  { %3366 = vrot.lane.b32.xlu0 %v5229_v42, %s5313_s26 }
0x48f0   :  { %v3405_v45 = vpop.xlane.xlu0 %3404 }
0x48f1   :  { %vm3406_vm14 = vcmp.eq.f32.partialorder %v3403_v26, %v3405_v45  ;;  %v3411_v17 = vcvt.f32.s32 %v3405_v45 }
0x48f2   :  { %v3407_v34 = vsel %vm3406_vm14, %v3402_v50, inf }
0x48f3   :  { %3408 = vmin.xlane.f32.xlu1 %v3407_v34  ;;  %v3412_v59 = vshll.u32 %v3411_v17, 16 }
0x48f4   :  { %v3367_v39 = vpop.permute.xlu0 %3366 }
0x48f5   :  { %v3369_v58 = vmul.f32 %v5233_v41, %v3367_v39 }
0x4904   :  { %3371 = vrot.lane.b32.xlu1 %v3369_v58, %s5314_s3 }
0x4980   :  { %v3409_v21 = vpop.xlane.xlu1 %3408 }
0x4981   :  { %v3410_v61 = vcvt.f32.s32 %v3409_v21 }
0x4983   :  { %v3413_v62 = vadd.s32 %v3412_v59, %v3410_v61 }
0x4984   :  { %v3372_v48 = vpop.permute.xlu1 %3371 }
0x4985   :  { %vm3420_vm2 = vcmp.eq.s32.totalorder %v3413_v62, 1  ;;  %v3374_v38 = vadd.f32 %v3372_v48, %v3364_v2  ;;  %vm3423_vm5 = vcmp.eq.s32.totalorder %v5596_v6, %v3413_v62  ;;  %v6348_v14 = vsel %vm3415_vm15, %v3413_v62, %v6290_v13 }
0x4986   :  { %4491 = vmatmul.mubr.msk.f32.vlgmr.msra.gmra.mrb[32].mxu0 %vm3423_vm5, %v5315_v7  ;;  %vm3421_vm6 = vmand %vm3417_vm13, %vm3420_vm2 }
0x4987   :  { %5234 = vtanh.f32 %v3374_v38  ;;  %v3422_v9 = vsel %vm3421_vm6, 1, %v6299_v4 }
0x4988   :  { %vm3611_vm8 = vcmp.eq.s32.totalorder %v3422_v9, 0 }
0x4989   :  { %v3613_v18 = vsel %vm3611_vm8, %v3612_v15, %v6307_v53 }
0x498a   :  { %3616 = vst.msk [vmem:[#allocation6] sm:$0x1] %vm3615_vm7, %v3613_v18 }
0x4991   :  { %v5235_v16 = vpop.eup %5234 }
0x4992   :  { %3377 = vrot.lane.b32.xlu1 %v5235_v16, %s5313_s26 }
0x4a04   :  { %v3378_v55 = vpop.permute.xlu1 %3377 }
0x4a05   :  { %v3380_v20 = vmul.f32 %v5233_v41, %v3378_v55 }
0x4a07   :  { %3498 = vrot.lane.b32.xlu0 %v3380_v20, %s5313_s26  ;;  %s3622_s26 = sshll.u32 %s5318_s6, 4  ;;  %s3623_s26 = int_to_ptr.vmem [resolvable:$true] %s3622_s26 }
0x4a08   :  { %s5240_s3 = scalar_lea.vmem %s3623_s26, 256  ;;  %p5245_p1 = scmp.lt.s32.totalorder %s3623_s26, %s3623_s26 }
0x4a09   :  { %p5241_p0 = scmp.ne.s32.totalorder %s3623_s26, %s5240_s3  ;;  %p5246_p2 = scmp.lt.s32.totalorder %s5240_s3, %s5240_s3 }
0x4a0b   :  { %p5247_p3 = por %p5246_p2, %p5245_p1 }
0x4a0d   :  { %p5248_p4 = pnand %p5247_p3, %p5241_p0 }
0x4a59   :  { %v3492_v7 = vpop.f32.mrb[32].mxu0 }
0x4a5a   :  { %v4492_v25 = vpop.f32.mrb[33].mxu0  ;;  %v3496_v0 = vmax.f32 %v3492_v7, 0.0 }
0x4a79   :  { %v3499_v13 = vpop.permute.xlu0 %3498 }
0x4a7a   :  { %v3501_v4 = vsel %vm43_vm1, %v3496_v0, %v3499_v13 }
0x4a7b   :  { %3724 = vmatmul.mubr.msk.f32.vlgmr.msra.gmra.mrb[30].mxu1 %vm1093_vm3, %v3501_v4 }
0x4b4e   :  { %v3571_v27 = vpop.f32.mrb[30].mxu1 }
0x4b4f   :  { %v3572_v23 = vpop.f32.mrb[31].mxu1 }
0x4b50   :  { %v3573_v53 = vadd.f32 %v3572_v23, %v5719_v57 }
0x4b52   :  { %v3575_v24 = vsel %vm1195_vm4, %v3573_v53, -inf }
0x4b53   :  { %3576 = vmax.xlane.f32.xlu1 %v3575_v24 }
0x4be0   :  { %v3577_v56 = vpop.xlane.xlu1 %3576 }
0x4be1   :  { %v3578_v47 = vsub.f32 %v3573_v53, %v3577_v56 }
0x4be3   :  { %v3579_v33 = vmul.f32 1.442695, %v3578_v47 }
0x4be5   :  { %5236 = vpow2.f32 %v3579_v33 }
0x4bef   :  { %v5237_v28 = vpop.eup %5236 }
0x4bf0   :  { %v3581_v31 = vsel %vm1195_vm4, %v5237_v28, 0.0 }
0x4bf1   :  { %3582 = vadd.xlane.f32.xlu0 %v3581_v31 }
0x4c7e   :  { %v3583_v29 = vpop.xlane.xlu0 %3582 }
0x4c7f   :  { %5238 = vlog2.f32 %v3583_v29 }
0x4c89   :  { %v5239_v11 = vpop.eup %5238 }
0x4c8a   :  { %v3585_v46 = vmul.f32 0.6931472, %v5239_v11 }
0x4c8c   :  { %v3586_v49 = vadd.f32 %v3585_v46, %v3577_v56 }
0x4c8e   :  { %v3587_v51 = vsub.f32 %v3573_v53, %v3586_v49 }
0x4c90   :  { %v3588_v54 = vsel %vm1195_vm4, %v3587_v51, -inf  ;;  %3608 = vst [vmem:[#allocation2 + $0xb] sm:$0x1] %v3587_v51 }
0x4c91   :  { %3589 = vmax.xlane.f32.xlu0 %v3588_v54 }
0x4d1e   :  { %v3590_v57 = vpop.xlane.xlu0 %3589 }
0x4d1f   :  { %vm3591_vm1 = vcmp.eq.f32.partialorder %v3587_v51, %v3590_v57 }
0x4d20   :  { %v3592_v60 = vsel %vm3591_vm1, %v5596_v6, 128 }
0x4d21   :  { %v3593_v30 = vsel %vm1195_vm4, %v3592_v60, 2147483647 }
0x4d22   :  { %v3595_v63 = vshra.s32 %v3593_v30, 16  ;;  %v3594_v1 = vand.u32 65535, %v3593_v30 }
0x4d24   :  { %v3597_v36 = vcvt.s32.f32 %v3595_v63  ;;  %v3596_v37 = vcvt.s32.f32 %v3594_v1 }
0x4d26   :  { %3598 = vmin.xlane.f32.xlu1 %v3597_v36 }
0x4db3   :  { %v3599_v3 = vpop.xlane.xlu1 %3598 }
0x4db4   :  { %vm3600_vm3 = vcmp.eq.f32.partialorder %v3597_v36, %v3599_v3 }
0x4db5   :  { %v3601_v5 = vsel %vm3600_vm3, %v3596_v37, inf }
0x4db6   :  { %3602 = vmin.xlane.f32.xlu0 %v3601_v5 }
0x4db7   :  { %5251 = shalt.err (!%p5248_p4)
}
0x4db8   :  { %s5252_s1 = scalar_lea.hbm %s6419_s7, 256 }
0x4db9   :  { %p5253_p5 = scmp.ne.s32.totalorder %s6419_s7, %s5252_s1  ;;  %p5256_p6 = scmp.lt.u32.totalorder %s5252_s1, %s6419_s7 }
0x4dbb   :  { %p5258_p7 = pnand %p5256_p6, %p5253_p5 }
0x4dbd   :  { %5261 = shalt.err (!%p5258_p7)
}
0x4dbe   :  { %s5319_s28 = smov 128   ;;  %s5320_s29 = smov 8   ;;  %v3605_v40 = vcvt.f32.s32 %v3599_v3  ;;  %vm3609_vm4 = vcmp.eq.s32.totalorder %v5596_v6, 12 }
0x4dbf   :  { %3628 = dma.vmem_to_hbm [thread:$0]  %s3623_s26, 256, %s6419_s7, [#allocation3], %s5319_s28, %s5319_s28, %s5320_s29  }
0x4dc0   :  { %v3606_v35 = vshll.u32 %v3605_v40, 16  ;;  %s5321_s11 = smov [#allocation4]   ;;  %s5322_s13 = smov [#allocation6]  }
0x4dc1   :  { %s3635_s12 = sshll.u32 %s5321_s11, 4  ;;  %s3645_s14 = sshll.u32 %s5322_s13, 4  ;;  %s3636_s12 = int_to_ptr.vmem [resolvable:$true] %s3635_s12  ;;  %s6380_s14 = int_to_ptr.vmem [resolvable:$true] %s3645_s14 }
0x4dc2   :  { %s5262_s4 = scalar_lea.vmem %s3636_s12, 16  ;;  %s5266_s7 = scalar_lea.vmem %s3636_s12, 32 }
0x4dc3   :  { %p5263_p8 = scmp.ne.s32.totalorder %s3636_s12, %s5262_s4  ;;  %p5267_p9 = scmp.lt.s32.totalorder %s3636_s12, %s3636_s12 }
0x4dc4   :  { %p5268_p10 = scmp.lt.s32.totalorder %s5266_s7, %s5262_s4 }
0x4dc6   :  { %p5269_p11 = por %p5268_p10, %p5267_p9 }
0x4dc8   :  { %p5270_p12 = pnand %p5269_p11, %p5263_p8 }
0x4e43   :  { %v3603_v32 = vpop.xlane.xlu0 %3602 }
0x4e44   :  { %v3604_v12 = vcvt.f32.s32 %v3603_v32 }
0x4e46   :  { %v3607_v52 = vadd.s32 %v3606_v35, %v3604_v12 }
0x4e48   :  { %v3610_v22 = vsel %vm3609_vm4, %v3607_v52, %v6348_v14 }
0x4e49   :  { %3614 = vst [vmem:[#allocation4] sm:$0x1] %v3610_v22 }
0x4e4a   :  { %5273 = shalt.err (!%p5270_p12)
}
0x4e4b   :  { %s5274_s17 = scalar_lea.hbm %s6420_s8, 16 }
0x4e4c   :  { %p5275_p13 = scmp.ne.s32.totalorder %s6420_s8, %s5274_s17  ;;  %p5278_p0 = scmp.lt.u32.totalorder %s5274_s17, %s6420_s8 }
0x4e4e   :  { %p5280_p1 = pnand %p5278_p0, %p5275_p13 }
0x4e50   :  { %5283 = shalt.err (!%p5280_p1)
}
0x4e51   :  { %3638 = dma.vmem_to_hbm [thread:$0]  %s3636_s12, 16, %s6420_s8, [#allocation5]  }
0x4e52   :  { %s5284_s6 = scalar_lea.vmem %s6380_s14, 16  ;;  %s5288_s26 = scalar_lea.vmem %s6380_s14, 32 }
0x4e53   :  { %p5285_p2 = scmp.ne.s32.totalorder %s6380_s14, %s5284_s6  ;;  %p5289_p3 = scmp.lt.s32.totalorder %s6380_s14, %s6380_s14 }
0x4e54   :  { %p5290_p4 = scmp.lt.s32.totalorder %s5288_s26, %s5284_s6 }
0x4e56   :  { %p5291_p5 = por %p5290_p4, %p5289_p3 }
0x4e58   :  { %p5292_p6 = pnand %p5291_p5, %p5285_p2 }
0x4e5a   :  { %5295 = shalt.err (!%p5292_p6)
}
0x4e5b   :  { %s5296_s24 = scalar_lea.hbm %s6421_s9, 16 }
0x4e5c   :  { %p5297_p7 = scmp.ne.s32.totalorder %s6421_s9, %s5296_s24  ;;  %p5300_p8 = scmp.lt.u32.totalorder %s5296_s24, %s6421_s9 }
0x4e5e   :  { %p5302_p9 = pnand %p5300_p8, %p5297_p7 }
0x4e60   :  { %5305 = shalt.err (!%p5302_p9)
}
0x4e61   :  { %3648 = dma.vmem_to_hbm [thread:$0]  %s6380_s14, 16, %s6421_s9, [#allocation5]  }
0x4e62   :  { %5306 = dma.done.wait [#allocation3], 256  }
0x4e63   :  { %5307 = vsyncadd [#allocation3], 4294967040 }
0x4e64   :  { %5308 = dma.done.wait [#allocation5], 32  }
0x4e65   :  { %5309 = vsyncadd [#allocation5], 4294967264 }
0x4e66   :  { %3658 = vsyncpa [#allocation3], 1 }
0x4e67   :  { %3659 = vsyncpa [#allocation5], 1 }

</bundles_post_ra>
